<compile_context>
chip_gen: v7x
topology: tpu7x:2x2x1
jax: 0.10.0
libtpu: 0.0.40
codegen_flags: <defaults>
</compile_context>

<pallas_src>
import functools
import math

import jax
import jax.numpy as jnp
from jax import lax
from jax.experimental import pallas as pl
from jax.experimental.pallas import tpu as pltpu


# ------------------------- fused forward kernel ----------------------------- #

def _fused_attention_kernel(num_heads, head_dim, field, rpe,
                            x_ref, wqkv_ref, wproj_ref, bproj_ref, *rest):
    if rpe:
        rpk_ref, rpv_ref, o_ref = rest
    else:
        (o_ref,) = rest

    bb, n, _ = x_ref.shape            # (batch_block, N, E)
    k_off = num_heads * field
    v_off = 2 * num_heads * field
    bias = bproj_ref[...]             # (1, E) f32 — no redundant cast

    # TODO(synk): if num_heads grows well beyond 2, move heads onto a grid axis
    # (or lax.fori_loop with ref slicing) instead of this static unroll.
    for b in range(bb):
        # Fused q/k/v projection: one lane-dense MXU matmul per sample,
        # bf16 operands, f32 accumulation. Output lanes are 128-aligned per
        # head field (padding columns are zero).
        qkv_b = jnp.dot(x_ref[b].astype(jnp.bfloat16), wqkv_ref[...],
                        preferred_element_type=jnp.float32)   # (N, 3*H*field)

        head_outs = []
        for h in range(num_heads):
            # Every slice start below is a multiple of 128 lanes -> no rotates.
            q = qkv_b[:, h * field: h * field + head_dim]                  # (N,D), scale pre-folded
            k = qkv_b[:, k_off + h * field: k_off + h * field + head_dim]  # (N,D)
            v = qkv_b[:, v_off + h * field: v_off + h * field + head_dim]  # (N,D)

            # q @ k^T on the MXU (bf16 operands, f32 accumulate).
            attn = lax.dot_general(
                q.astype(jnp.bfloat16), k.astype(jnp.bfloat16),
                (((1,), (1,)), ((), ())),
                preferred_element_type=jnp.float32)                        # (N,N)

            if rpe:
                # RPE key term: VPU multiply + lane reduce (replaces N tiny
                # M=1 MXU matmuls). rpk stays a bf16 ref, read at the use site
                # and promoted to f32 by the multiply.
                attn = attn + (q[:, None, :] * rpk_ref[...]).sum(axis=-1)

            # Numerically-stable softmax in f32; reciprocal on the EUP.
            m = jnp.max(attn, axis=-1, keepdims=True)
            p = jnp.exp(attn - m)
            l = jnp.sum(p, axis=-1, keepdims=True)
            p = p * pl.reciprocal(l, approx=True)

            out_h = jnp.dot(p.astype(jnp.bfloat16), v.astype(jnp.bfloat16),
                            preferred_element_type=jnp.float32)            # (N,D)
            if rpe:
                # RPE value term: VPU multiply + sublane reduce.
                out_h = out_h + (p[:, :, None] * rpv_ref[...]).sum(axis=1)

            head_outs.append(out_h)

        # Lane-concat head outputs -> single (N, H*D) @ (H*D, E) projection.
        merged = jnp.concatenate(head_outs, axis=-1)                       # (N, H*D)
        out_b = jnp.dot(merged.astype(jnp.bfloat16), wproj_ref[...],
                        preferred_element_type=jnp.float32) + bias
        o_ref[b] = out_b.astype(o_ref.dtype)


# --------------------- RelativePosition2D (index glue) ---------------------- #
# Tiny integer index-table construction + embedding gather; kept in plain JAX.

def rel_pos_2d_embeddings(table_v, table_h, n, length):
    """Mirrors RelativePosition2D.forward(n, n) -> (n, n, head_dim)."""
    lq = n - 1
    lk = n - 1
    s = math.isqrt(lq)
    assert s * s == lq, (
        f"RelativePosition2D expects n-1 to be a perfect square, got {lq}")
    rq = jnp.arange(lq, dtype=jnp.int32)
    rk = jnp.arange(lk, dtype=jnp.int32)
    dv = rk[None, :] // s - rq[:, None] // s
    dh = rk[None, :] % s - rq[:, None] % s
    fv = jnp.clip(dv, -length, length) + length + 1
    fh = jnp.clip(dh, -length, length) + length + 1
    fv = jnp.pad(fv, ((1, 0), (1, 0)))          # F.pad(..., (1, 0, 1, 0), value=0)
    fh = jnp.pad(fh, ((1, 0), (1, 0)))
    return table_v[fv] + table_h[fh]


# ------------------------- host-side weight packing ------------------------- #

def _build_fused_qkv_weight(wq, wk, wv, scale, num_heads, head_dim, field):
    """(E, 3*H*field) bf16; per-head fields padded to 128-lane boundaries,
    scale folded into the q columns (covers both q@k^T and the RPE key term)."""
    e = wq.shape[0]
    cols = []
    for w in (wq * scale, wk, wv):
        for h in range(num_heads):
            blk = jnp.zeros((e, field), jnp.float32)
            blk = blk.at[:, :head_dim].set(w[:, h * head_dim:(h + 1) * head_dim])
            cols.append(blk)
    return jnp.concatenate(cols, axis=1).astype(jnp.bfloat16)


# ------------------------------ full forward -------------------------------- #

def relative_position_attention_forward(x, params, *, num_heads, head_dim,
                                        scale, rpe, rpe_length,
                                        batch_block=1):
    B, N, E = x.shape
    assert B % batch_block == 0
    hd = num_heads * head_dim
    e_out = params["wproj"].shape[1]
    field = ((head_dim + 127) // 128) * 128      # lane-aligned per-head field

    wqkv = _build_fused_qkv_weight(params["wq"], params["wk"], params["wv"],
                                   scale, num_heads, head_dim, field)
    wproj = params["wproj"].astype(jnp.bfloat16)
    bproj = params["bproj"].reshape(1, e_out).astype(jnp.float32)

    args = [x, wqkv, wproj, bproj]
    in_specs = [
        pl.BlockSpec((batch_block, N, E), lambda b: (b, 0, 0)),      # activations
        pl.BlockSpec((E, 3 * num_heads * field), lambda b: (0, 0)),  # resident weights
        pl.BlockSpec((hd, e_out), lambda b: (0, 0)),
        pl.BlockSpec((1, e_out), lambda b: (0, 0)),
    ]
    if rpe:
        rpk = rel_pos_2d_embeddings(params["rpe_k_v"], params["rpe_k_h"],
                                    N, rpe_length).astype(jnp.bfloat16)
        rpv = rel_pos_2d_embeddings(params["rpe_v_v"], params["rpe_v_h"],
                                    N, rpe_length).astype(jnp.bfloat16)
        args += [rpk, rpv]
        in_specs += [pl.BlockSpec((N, N, head_dim), lambda b: (0, 0, 0)),
                     pl.BlockSpec((N, N, head_dim), lambda b: (0, 0, 0))]

    # Advisory cost estimate for the XLA scheduler.
    flops = (2 * B * N * E * 3 * num_heads * field              # fused qkv proj (incl. pad)
             + B * num_heads * (4 if rpe else 2) * 2 * N * N * head_dim
             + 2 * B * N * hd * e_out)
    transcendentals = B * num_heads * N * N
    bytes_accessed = (4 * B * N * (E + e_out)
                      + 2 * (E * 3 * num_heads * field + hd * e_out)
                      + 4 * e_out
                      + (2 * 2 * N * N * head_dim if rpe else 0))

    kernel = functools.partial(_fused_attention_kernel,
                               num_heads, head_dim, field, rpe)
    return pl.pallas_call(
        kernel,
        out_shape=jax.ShapeDtypeStruct((B, N, e_out), x.dtype),
        grid=(B // batch_block,),
        in_specs=in_specs,
        out_specs=pl.BlockSpec((batch_block, N, e_out), lambda b: (b, 0, 0)),
        compiler_params=pltpu.CompilerParams(
            dimension_semantics=("parallel",),
            vmem_limit_bytes=32 * 1024 * 1024,   # working set << 1 MiB; 32 MiB is plenty
        ),
        cost_estimate=pl.CostEstimate(
            flops=flops, transcendentals=transcendentals,
            bytes_accessed=bytes_accessed),
    )(*args)


# ----------------------------- pure-JAX reference --------------------------- #

def reference_forward(x, params, *, num_heads, head_dim, scale, rpe, rpe_length):
    B, N, E = x.shape

    def split_heads(y):
        return y.reshape(B, N, num_heads, head_dim).transpose(0, 2, 1, 3)

    q = split_heads(x @ params["wq"])
    k = split_heads(x @ params["wk"])
    v = split_heads(x @ params["wv"])
    attn = jnp.einsum("bhid,bhjd->bhij", q, k) * scale
    if rpe:
        rpk = rel_pos_2d_embeddings(params["rpe_k_v"], params["rpe_k_h"], N, rpe_length)
        attn = attn + jnp.einsum("bhid,ijd->bhij", q, rpk) * scale
    attn = jax.nn.softmax(attn, axis=-1)
    out = jnp.einsum("bhij,bhjd->bhid", attn, v)
    if rpe:
        rpv = rel_pos_2d_embeddings(params["rpe_v_v"], params["rpe_v_h"], N, rpe_length)
        out = out + jnp.einsum("bhij,ijd->bhid", attn, rpv)
    out = out.transpose(0, 2, 1, 3).reshape(B, N, num_heads * head_dim)
    return out @ params["wproj"] + params["bproj"]


# ---------------------------------- main ------------------------------------ #

if __name__ == "__main__":
    B, N, E = 2, 17, 64          # N = 1 (cls token) + 4*4 spatial tokens
    num_heads, head_dim = 2, 32
    rpe_length = 14
    rpe = True
    scale = head_dim ** (-0.5)
    table_rows = rpe_length * 2 + 2

    key = jax.random.PRNGKey(0)
    ks = jax.random.split(key, 11)
    params = {
        "wq":    jax.random.normal(ks[0], (E, num_heads * head_dim), jnp.float32) * 0.02,
        "wk":    jax.random.normal(ks[1], (E, num_heads * head_dim), jnp.float32) * 0.02,
        "wv":    jax.random.normal(ks[2], (E, num_heads * head_dim), jnp.float32) * 0.02,
        "wproj": jax.random.normal(ks[3], (num_heads * head_dim, E), jnp.float32) * 0.02,
        "bproj": jax.random.normal(ks[4], (E,), jnp.float32) * 0.02,
        # trunc_normal_(std=0.02) approximated by a plain normal * 0.02
        "rpe_k_v": jax.random.normal(ks[5], (table_rows, head_dim), jnp.float32) * 0.02,
        "rpe_k_h": jax.random.normal(ks[6], (table_rows, head_dim), jnp.float32) * 0.02,
        "rpe_v_v": jax.random.normal(ks[7], (table_rows, head_dim), jnp.float32) * 0.02,
        "rpe_v_h": jax.random.normal(ks[8], (table_rows, head_dim), jnp.float32) * 0.02,
    }
    x = jax.random.normal(ks[9], (B, N, E), jnp.float32)

    ref = reference_forward(
        x, params, num_heads=num_heads, head_dim=head_dim,
        scale=scale, rpe=rpe, rpe_length=rpe_length)

    # Path 1: grid=(B,) "parallel" — one sample per TensorCore on v7x.
    out1 = relative_position_attention_forward(
        x, params, num_heads=num_heads, head_dim=head_dim,
        scale=scale, rpe=rpe, rpe_length=rpe_length, batch_block=1)
    out1 = jax.block_until_ready(out1)

    # Path 2: single grid step with the batch folded inside — v5e/v6e (1 TC).
    out2 = relative_position_attention_forward(
        x, params, num_heads=num_heads, head_dim=head_dim,
        scale=scale, rpe=rpe, rpe_length=rpe_length, batch_block=B)
    out2 = jax.block_until_ready(out2)

    assert out1.shape == (B, N, E), out1.shape
    assert out2.shape == (B, N, E), out2.shape
    # Tolerance covers bf16 MXU operands + EUP approximate-reciprocal softmax.
    assert jnp.allclose(out1, ref, atol=5e-3, rtol=5e-3), \
        float(jnp.max(jnp.abs(out1 - ref)))
    assert jnp.allclose(out2, ref, atol=5e-3, rtol=5e-3), \
        float(jnp.max(jnp.abs(out2 - ref)))
    print("KERNEL_OK")
</pallas_src>

<mosaic_0001>
module attributes {stable_mosaic.version = 11 : i64} {
  func.func @_fused_attention_kernel(%arg0: i32, %arg1: memref<1x17x64xf32, #tpu.memory_space<vmem>>, %arg2: memref<64x768xbf16, #tpu.memory_space<vmem>>, %arg3: memref<64x64xbf16, #tpu.memory_space<vmem>>, %arg4: memref<1x64xf32, #tpu.memory_space<vmem>>, %arg5: memref<17x17x32xbf16, #tpu.memory_space<vmem>>, %arg6: memref<17x17x32xbf16, #tpu.memory_space<vmem>>, %arg7: memref<1x17x64xf32, #tpu.memory_space<vmem>>) attributes {dimension_semantics = [#tpu.dimension_semantics<parallel>], iteration_bounds = array<i64: 2>, scalar_prefetch = 0 : i64, scratch_operands = 0 : i64, tpu.core_type = #tpu.core_type<tc>, window_params = [{transform_indices = @transform_0, window_bounds = array<i64: 1, 17, 64>}, {pipeline_mode = #tpu.pipeline_mode<synchronous>, transform_indices = @transform_1, window_bounds = array<i64: 64, 768>}, {pipeline_mode = #tpu.pipeline_mode<synchronous>, transform_indices = @transform_2, window_bounds = array<i64: 64, 64>}, {pipeline_mode = #tpu.pipeline_mode<synchronous>, transform_indices = @transform_3, window_bounds = array<i64: 1, 64>}, {pipeline_mode = #tpu.pipeline_mode<synchronous>, transform_indices = @transform_4, window_bounds = array<i64: 17, 17, 32>}, {pipeline_mode = #tpu.pipeline_mode<synchronous>, transform_indices = @transform_5, window_bounds = array<i64: 17, 17, 32>}, {transform_indices = @transform_6, window_bounds = array<i64: 1, 17, 64>}]} {
    %c0 = arith.constant 0 : index
    %c0_0 = arith.constant 0 : index
    %0 = vector.load %arg4[%c0, %c0_0] : memref<1x64xf32, #tpu.memory_space<vmem>>, vector<1x64xf32>
    %c0_1 = arith.constant 0 : index
    %c0_2 = arith.constant 0 : index
    %c0_3 = arith.constant 0 : index
    %1 = vector.load %arg1[%c0_1, %c0_2, %c0_3] : memref<1x17x64xf32, #tpu.memory_space<vmem>>, vector<1x17x64xf32>
    %2 = vector.shape_cast %1 : vector<1x17x64xf32> to vector<17x64xf32>
    %3 = arith.truncf %2 : vector<17x64xf32> to vector<17x64xbf16>
    %c0_4 = arith.constant 0 : index
    %c0_5 = arith.constant 0 : index
    %4 = vector.load %arg2[%c0_4, %c0_5] : memref<64x768xbf16, #tpu.memory_space<vmem>>, vector<64x768xbf16>
    %cst = arith.constant dense<0.000000e+00> : vector<17x768xf32>
    %5 = tpu.matmul %3, %4, %cst {dimension_numbers = #tpu.dot_dimension_numbers<[1], [0], [0], [1], [0, 0, 1, 1], [], []>} : vector<17x64xbf16>, vector<64x768xbf16>, vector<17x768xf32> -> vector<17x768xf32>
    %6 = vector.extract_strided_slice %5 {offsets = [0, 0], sizes = [17, 32], strides = [1, 1]} : vector<17x768xf32> to vector<17x32xf32>
    %7 = vector.extract_strided_slice %5 {offsets = [0, 256], sizes = [17, 32], strides = [1, 1]} : vector<17x768xf32> to vector<17x32xf32>
    %8 = vector.extract_strided_slice %5 {offsets = [0, 512], sizes = [17, 32], strides = [1, 1]} : vector<17x768xf32> to vector<17x32xf32>
    %9 = arith.truncf %6 : vector<17x32xf32> to vector<17x32xbf16>
    %10 = arith.truncf %7 : vector<17x32xf32> to vector<17x32xbf16>
    %cst_6 = arith.constant dense<0.000000e+00> : vector<17x17xf32>
    %11 = tpu.matmul %9, %10, %cst_6 {dimension_numbers = #tpu.dot_dimension_numbers<[1], [1], [0], [0], [0, 0, 1, 0], [], []>} : vector<17x32xbf16>, vector<17x32xbf16>, vector<17x17xf32> -> vector<17x17xf32>
    %12 = vector.shape_cast %6 : vector<17x32xf32> to vector<17x1x32xf32>
    %c0_7 = arith.constant 0 : index
    %c0_8 = arith.constant 0 : index
    %c0_9 = arith.constant 0 : index
    %13 = vector.load %arg5[%c0_7, %c0_8, %c0_9] : memref<17x17x32xbf16, #tpu.memory_space<vmem>>, vector<17x17x32xbf16>
    %14 = arith.extf %13 : vector<17x17x32xbf16> to vector<17x17x32xf32>
    %15 = vector.broadcast %12 : vector<17x1x32xf32> to vector<17x17x32xf32>
    %16 = arith.mulf %15, %14 : vector<17x17x32xf32>
    %cst_10 = arith.constant dense<0.000000e+00> : vector<17x17xf32>
    %17 = vector.multi_reduction <add>, %16, %cst_10 [2] : vector<17x17x32xf32> to vector<17x17xf32>
    %18 = arith.addf %11, %17 : vector<17x17xf32>
    %cst_11 = arith.constant dense<0xFF800000> : vector<17xf32>
    %19 = vector.multi_reduction <maximumf>, %18, %cst_11 [1] : vector<17x17xf32> to vector<17xf32>
    %20 = vector.shape_cast %19 : vector<17xf32> to vector<17x1xf32>
    %21 = vector.broadcast %20 : vector<17x1xf32> to vector<17x17xf32>
    %22 = arith.subf %18, %21 : vector<17x17xf32>
    %23 = math.exp %22 : vector<17x17xf32>
    %cst_12 = arith.constant dense<0.000000e+00> : vector<17xf32>
    %24 = vector.multi_reduction <add>, %23, %cst_12 [1] : vector<17x17xf32> to vector<17xf32>
    %25 = vector.shape_cast %24 : vector<17xf32> to vector<17x1xf32>
    %26 = tpu.reciprocal %25 {approx = true} : vector<17x1xf32> -> vector<17x1xf32>
    %27 = vector.broadcast %26 : vector<17x1xf32> to vector<17x17xf32>
    %28 = arith.mulf %23, %27 : vector<17x17xf32>
    %29 = arith.truncf %28 : vector<17x17xf32> to vector<17x17xbf16>
    %30 = arith.truncf %8 : vector<17x32xf32> to vector<17x32xbf16>
    %cst_13 = arith.constant dense<0.000000e+00> : vector<17x32xf32>
    %31 = tpu.matmul %29, %30, %cst_13 {dimension_numbers = #tpu.dot_dimension_numbers<[1], [0], [0], [1], [0, 0, 1, 1], [], []>} : vector<17x17xbf16>, vector<17x32xbf16>, vector<17x32xf32> -> vector<17x32xf32>
    %32 = vector.shape_cast %28 : vector<17x17xf32> to vector<17x17x1xf32>
    %c0_14 = arith.constant 0 : index
    %c0_15 = arith.constant 0 : index
    %c0_16 = arith.constant 0 : index
    %33 = vector.load %arg6[%c0_14, %c0_15, %c0_16] : memref<17x17x32xbf16, #tpu.memory_space<vmem>>, vector<17x17x32xbf16>
    %34 = arith.extf %33 : vector<17x17x32xbf16> to vector<17x17x32xf32>
    %35 = vector.broadcast %32 : vector<17x17x1xf32> to vector<17x17x32xf32>
    %36 = arith.mulf %35, %34 : vector<17x17x32xf32>
    %cst_17 = arith.constant dense<0.000000e+00> : vector<17x32xf32>
    %37 = vector.multi_reduction <add>, %36, %cst_17 [1] : vector<17x17x32xf32> to vector<17x32xf32>
    %38 = arith.addf %31, %37 : vector<17x32xf32>
    %39 = vector.extract_strided_slice %5 {offsets = [0, 128], sizes = [17, 32], strides = [1, 1]} : vector<17x768xf32> to vector<17x32xf32>
    %40 = vector.extract_strided_slice %5 {offsets = [0, 384], sizes = [17, 32], strides = [1, 1]} : vector<17x768xf32> to vector<17x32xf32>
    %41 = vector.extract_strided_slice %5 {offsets = [0, 640], sizes = [17, 32], strides = [1, 1]} : vector<17x768xf32> to vector<17x32xf32>
    %42 = arith.truncf %39 : vector<17x32xf32> to vector<17x32xbf16>
    %43 = arith.truncf %40 : vector<17x32xf32> to vector<17x32xbf16>
    %cst_18 = arith.constant dense<0.000000e+00> : vector<17x17xf32>
    %44 = tpu.matmul %42, %43, %cst_18 {dimension_numbers = #tpu.dot_dimension_numbers<[1], [1], [0], [0], [0, 0, 1, 0], [], []>} : vector<17x32xbf16>, vector<17x32xbf16>, vector<17x17xf32> -> vector<17x17xf32>
    %45 = vector.shape_cast %39 : vector<17x32xf32> to vector<17x1x32xf32>
    %c0_19 = arith.constant 0 : index
    %c0_20 = arith.constant 0 : index
    %c0_21 = arith.constant 0 : index
    %46 = vector.load %arg5[%c0_19, %c0_20, %c0_21] : memref<17x17x32xbf16, #tpu.memory_space<vmem>>, vector<17x17x32xbf16>
    %47 = arith.extf %46 : vector<17x17x32xbf16> to vector<17x17x32xf32>
    %48 = vector.broadcast %45 : vector<17x1x32xf32> to vector<17x17x32xf32>
    %49 = arith.mulf %48, %47 : vector<17x17x32xf32>
    %cst_22 = arith.constant dense<0.000000e+00> : vector<17x17xf32>
    %50 = vector.multi_reduction <add>, %49, %cst_22 [2] : vector<17x17x32xf32> to vector<17x17xf32>
    %51 = arith.addf %44, %50 : vector<17x17xf32>
    %cst_23 = arith.constant dense<0xFF800000> : vector<17xf32>
    %52 = vector.multi_reduction <maximumf>, %51, %cst_23 [1] : vector<17x17xf32> to vector<17xf32>
    %53 = vector.shape_cast %52 : vector<17xf32> to vector<17x1xf32>
    %54 = vector.broadcast %53 : vector<17x1xf32> to vector<17x17xf32>
    %55 = arith.subf %51, %54 : vector<17x17xf32>
    %56 = math.exp %55 : vector<17x17xf32>
    %cst_24 = arith.constant dense<0.000000e+00> : vector<17xf32>
    %57 = vector.multi_reduction <add>, %56, %cst_24 [1] : vector<17x17xf32> to vector<17xf32>
    %58 = vector.shape_cast %57 : vector<17xf32> to vector<17x1xf32>
    %59 = tpu.reciprocal %58 {approx = true} : vector<17x1xf32> -> vector<17x1xf32>
    %60 = vector.broadcast %59 : vector<17x1xf32> to vector<17x17xf32>
    %61 = arith.mulf %56, %60 : vector<17x17xf32>
    %62 = arith.truncf %61 : vector<17x17xf32> to vector<17x17xbf16>
    %63 = arith.truncf %41 : vector<17x32xf32> to vector<17x32xbf16>
    %cst_25 = arith.constant dense<0.000000e+00> : vector<17x32xf32>
    %64 = tpu.matmul %62, %63, %cst_25 {dimension_numbers = #tpu.dot_dimension_numbers<[1], [0], [0], [1], [0, 0, 1, 1], [], []>} : vector<17x17xbf16>, vector<17x32xbf16>, vector<17x32xf32> -> vector<17x32xf32>
    %65 = vector.shape_cast %61 : vector<17x17xf32> to vector<17x17x1xf32>
    %c0_26 = arith.constant 0 : index
    %c0_27 = arith.constant 0 : index
    %c0_28 = arith.constant 0 : index
    %66 = vector.load %arg6[%c0_26, %c0_27, %c0_28] : memref<17x17x32xbf16, #tpu.memory_space<vmem>>, vector<17x17x32xbf16>
    %67 = arith.extf %66 : vector<17x17x32xbf16> to vector<17x17x32xf32>
    %68 = vector.broadcast %65 : vector<17x17x1xf32> to vector<17x17x32xf32>
    %69 = arith.mulf %68, %67 : vector<17x17x32xf32>
    %cst_29 = arith.constant dense<0.000000e+00> : vector<17x32xf32>
    %70 = vector.multi_reduction <add>, %69, %cst_29 [1] : vector<17x17x32xf32> to vector<17x32xf32>
    %71 = arith.addf %64, %70 : vector<17x32xf32>
    %72 = tpu.concatenate %38, %71 in 1 : vector<17x32xf32>, vector<17x32xf32> -> vector<17x64xf32>
    %73 = arith.truncf %72 : vector<17x64xf32> to vector<17x64xbf16>
    %c0_30 = arith.constant 0 : index
    %c0_31 = arith.constant 0 : index
    %74 = vector.load %arg3[%c0_30, %c0_31] : memref<64x64xbf16, #tpu.memory_space<vmem>>, vector<64x64xbf16>
    %cst_32 = arith.constant dense<0.000000e+00> : vector<17x64xf32>
    %75 = tpu.matmul %73, %74, %cst_32 {dimension_numbers = #tpu.dot_dimension_numbers<[1], [0], [0], [1], [0, 0, 1, 1], [], []>} : vector<17x64xbf16>, vector<64x64xbf16>, vector<17x64xf32> -> vector<17x64xf32>
    %76 = vector.broadcast %0 : vector<1x64xf32> to vector<17x64xf32>
    %77 = arith.addf %75, %76 : vector<17x64xf32>
    %c0_33 = arith.constant 0 : index
    %c0_34 = arith.constant 0 : index
    %c0_35 = arith.constant 0 : index
    %78 = vector.load %arg7[%c0_33, %c0_34, %c0_35] : memref<1x17x64xf32, #tpu.memory_space<vmem>>, vector<1x17x64xf32>
    %79 = vector.shape_cast %78 : vector<1x17x64xf32> to vector<17x64xf32>
    %80 = vector.shape_cast %77 : vector<17x64xf32> to vector<1x17x64xf32>
    tpu.vector_store %arg7[%c0_33, %c0_34, %c0_35], %80 {strides = array<i32>} : memref<1x17x64xf32, #tpu.memory_space<vmem>>, vector<1x17x64xf32>,
    return
  }
  func.func @transform_0(%arg0: i32) -> (i32, i32, i32) {
    %c0_i32 = arith.constant 0 : i32
    %c0_i32_0 = arith.constant 0 : i32
    %c0_i32_1 = arith.constant 0 : i32
    return %arg0, %c0_i32, %c0_i32_0 : i32, i32, i32
  }
  func.func @transform_1(%arg0: i32) -> (i32, i32) {
    %c0_i32 = arith.constant 0 : i32
    %c0_i32_0 = arith.constant 0 : i32
    %c0_i32_1 = arith.constant 0 : i32
    return %c0_i32, %c0_i32_0 : i32, i32
  }
  func.func @transform_2(%arg0: i32) -> (i32, i32) {
    %c0_i32 = arith.constant 0 : i32
    %c0_i32_0 = arith.constant 0 : i32
    %c0_i32_1 = arith.constant 0 : i32
    return %c0_i32, %c0_i32_0 : i32, i32
  }
  func.func @transform_3(%arg0: i32) -> (i32, i32) {
    %c0_i32 = arith.constant 0 : i32
    %c0_i32_0 = arith.constant 0 : i32
    %c0_i32_1 = arith.constant 0 : i32
    return %c0_i32, %c0_i32_0 : i32, i32
  }
  func.func @transform_4(%arg0: i32) -> (i32, i32, i32) {
    %c0_i32 = arith.constant 0 : i32
    %c0_i32_0 = arith.constant 0 : i32
    %c0_i32_1 = arith.constant 0 : i32
    %c0_i32_2 = arith.constant 0 : i32
    return %c0_i32, %c0_i32_0, %c0_i32_1 : i32, i32, i32
  }
  func.func @transform_5(%arg0: i32) -> (i32, i32, i32) {
    %c0_i32 = arith.constant 0 : i32
    %c0_i32_0 = arith.constant 0 : i32
    %c0_i32_1 = arith.constant 0 : i32
    %c0_i32_2 = arith.constant 0 : i32
    return %c0_i32, %c0_i32_0, %c0_i32_1 : i32, i32, i32
  }
  func.func @transform_6(%arg0: i32) -> (i32, i32, i32) {
    %c0_i32 = arith.constant 0 : i32
    %c0_i32_0 = arith.constant 0 : i32
    %c0_i32_1 = arith.constant 0 : i32
    return %arg0, %c0_i32, %c0_i32_0 : i32, i32, i32
  }
}

</mosaic_0001>

<bundles_post_ra>
// kernel: tpu_custom_call.1
= control target key start
LH: loop header
LB: loop body
LE: loop exit
PB: predicated region body
PF: predicated region fallthrough
CT: control target
= control target key end

     0   :  { %11 = vsyncpa [#allocation3], 0  ;;  %s6205_s0 = inlined_call_operand.vmem [shape: f32[2,17,64], index: 0, kind: input, shape index: {}]   ;;  %s6206_s1 = inlined_call_operand.hbm [shape: bf16[64,768], index: 1, kind: input, shape index: {}]   ;;  %s6207_s2 = inlined_call_operand.vmem [shape: bf16[64,64], index: 2, kind: input, shape index: {}]   ;;  %s6208_s3 = inlined_call_operand.vmem [shape: f32[1,64], index: 3, kind: input, shape index: {}]   ;;  %s6209_s4 = inlined_call_operand.hbm [shape: bf16[17,17,32], index: 4, kind: input, shape index: {}]   ;;  %s6210_s5 = inlined_call_operand.hbm [shape: bf16[17,17,32], index: 5, kind: input, shape index: {}]   ;;  %s6211_s6 = inlined_call_operand.vmem [shape: f32[2,17,64], index: 6, kind: output, shape index: {}]  }
   0x1   :  { %12 = vsyncpa [#allocation5], 0  ;;  %s4299_s21 = smov 0  }
   0x2 LB: > { %s4254_s22 = smov [#allocation4]   ;;  %s4305_s24 = sadd.s32 4294967295, %s4252_s21   ;;  %s4252_s21 = sphi %s4299_s21, %s18_s21  }
   0x3   : > { %s211_s23 = sshll.u32 %s4254_s22, 4  ;;  %p3822_p0 = scmp.ge.s32.totalorder %s4252_s21, 1  ;;  %s4314_s23 = int_to_ptr.vmem [resolvable:$true] %s211_s23 }
   0x4   : > { %p180_p1 = scmp.lt.s32.totalorder %s4252_s21, 3  ;;  %p6212_p2 = scmp.eq.s32.totalorder %s4305_s24, 0 }
   0x5   : > { %s4255_s26 = smov [#allocation2]   ;;  %s4256_s29 = smov [#allocation6]  }
   0x6   : > { %p4310_p3 = pnand %p3822_p0, %p180_p1  ;;  %s192_s27 = sshll.u32 %s4255_s26, 4  ;;  %s4318_s27 = int_to_ptr.vmem [resolvable:$true] %s192_s27 }
   0x7   : > { %s4326_s30 = sshll.u32 %s4256_s29, 4  ;;  %s4154_s9 = scalar_lea.hbm %s6209_s4, 3264  ;;  %s225_s30 = int_to_ptr.vmem [resolvable:$true] %s4326_s30 }
   0x8   : > { %s6247_s25 = scalar_select %p4310_p3, 1, 0 }
   0x9   : > { %p4051_p4 = pneg %p4310_p3  ;;  %p4155_p6 = scmp.ne.s32.totalorder %s6209_s4, %s4154_s9 }
   0xa   : > { %p4161_p10 = scmp.lt.u32.totalorder %s4154_s9, %s6209_s4 }
   0xb   : > { %p4322_p5 = pnand %p6212_p2, %p4051_p4 }
   0xd   : > { %p4336_p7 = pneg %p4322_p5 }
   0xf   : > { %p4157_p8 = pnand %p4336_p7, %p4155_p6 }
  0x11   : > { %p4158_p9 = pneg %p4157_p8 }
  0x13   : > { %p4163_p11 = pnand %p4161_p10, %p4158_p9 }
  0x15   : > { %4166 = shalt.err (!%p4163_p11)
}
  0x16   : > { %s4167_s15 = scalar_lea.vmem %s4314_s23, 3264  ;;  %p4175_p1 = scmp.lt.s32.totalorder %s4314_s23, %s4314_s23 }
  0x17   : > { %p4168_p12 = scmp.ne.s32.totalorder %s4314_s23, %s4167_s15  ;;  %p4176_p4 = scmp.lt.s32.totalorder %s4167_s15, %s4167_s15 }
  0x19   : > { %p4170_p13 = pnand %p4168_p12, %p4336_p7  ;;  %p4177_p6 = por %p4176_p4, %p4175_p1 }
  0x1b   : > { %p4171_p0 = pneg %p4170_p13 }
  0x1d   : > { %p4178_p8 = pnand %p4177_p6, %p4171_p0 }
  0x1f   : > { %4181 = shalt.err (!%p4178_p8)
}
  0x20   : > { %s4257_s16 = smov 64   ;;  %s4258_s17 = smov 4  }
  0x21   : > { %4057 = dma.hbm_to_vmem [thread:$0]  (!%p4322_p5), %s6209_s4, 3264, %s4314_s23, [#allocation5], %s4257_s16, %s4257_s16, %s4258_s17  }
  0x22   : > { %s4182_s26 = scalar_lea.hbm %s6206_s1, 3072 }
  0x23   : > { %p4183_p9 = scmp.ne.s32.totalorder %s6206_s1, %s4182_s26  ;;  %p4189_p12 = scmp.lt.u32.totalorder %s4182_s26, %s6206_s1 }
  0x25   : > { %p4185_p10 = pnand %p4183_p9, %p4336_p7 }
  0x27   : > { %p4186_p11 = pneg %p4185_p10 }
  0x29   : > { %p4191_p13 = pnand %p4189_p12, %p4186_p11 }
  0x2b   : > { %4194 = shalt.err (!%p4191_p13)
}
  0x2c   : > { %s4195_s23 = scalar_lea.vmem %s4318_s27, 3072  ;;  %p4203_p6 = scmp.lt.s32.totalorder %s4318_s27, %s4318_s27 }
  0x2d   : > { %p4196_p0 = scmp.ne.s32.totalorder %s4318_s27, %s4195_s23  ;;  %p4204_p8 = scmp.lt.s32.totalorder %s4195_s23, %s4195_s23 }
  0x2f   : > { %p4198_p1 = pnand %p4196_p0, %p4336_p7  ;;  %p4205_p9 = por %p4204_p8, %p4203_p6 }
  0x31   : > { %p4199_p4 = pneg %p4198_p1 }
  0x33   : > { %p4206_p10 = pnand %p4205_p9, %p4199_p4 }
  0x35   : > { %4209 = shalt.err (!%p4206_p10)
}
  0x36   : > { %s4259_s10 = smov 384   ;;  %s4260_s11 = smov 24  }
  0x37   : > { %4054 = dma.hbm_to_vmem [thread:$0]  (!%p4322_p5), %s6206_s1, 3072, %s4318_s27, [#allocation3], %s4259_s10, %s4259_s10, %s4260_s11  }
  0x38   : > { %s4210_s19 = scalar_lea.hbm %s6210_s5, 3264 }
  0x39   : > { %p4211_p11 = scmp.ne.s32.totalorder %s6210_s5, %s4210_s19  ;;  %p4217_p0 = scmp.lt.u32.totalorder %s4210_s19, %s6210_s5 }
  0x3b   : > { %p4213_p12 = pnand %p4211_p11, %p4336_p7 }
  0x3d   : > { %p4214_p13 = pneg %p4213_p12 }
  0x3f   : > { %p4219_p1 = pnand %p4217_p0, %p4214_p13 }
  0x41   : > { %4222 = shalt.err (!%p4219_p1)
}
  0x42   : > { %s4223_s7 = scalar_lea.vmem %s225_s30, 3264  ;;  %p4231_p9 = scmp.lt.s32.totalorder %s225_s30, %s225_s30 }
  0x43   : > { %p4224_p4 = scmp.ne.s32.totalorder %s225_s30, %s4223_s7  ;;  %p4232_p10 = scmp.lt.s32.totalorder %s4223_s7, %s4223_s7 }
  0x45   : > { %p4226_p6 = pnand %p4224_p4, %p4336_p7  ;;  %p4233_p2 = por %p4232_p10, %p4231_p9 }
  0x47   : > { %p4227_p8 = pneg %p4226_p6 }
  0x49   : > { %p4234_p3 = pnand %p4233_p2, %p4227_p8 }
  0x4b   : > { %4237 = shalt.err (!%p4234_p3)
}
  0x4c   : > { %4060 = dma.hbm_to_vmem [thread:$0]  (!%p4322_p5), %s6210_s5, 3264, %s225_s30, [#allocation5], %s4257_s16, %s4257_s16, %s4258_s17  }
  0x4d   : > { %p6250_p11 = scmp.ne.s32.totalorder %s6247_s25, 0 }
  0x4f   : > { %248 = sbr.rel (%p6250_p11) target bundleno = 1615 (0x64f), region = 44 }
  0x56   : > { %p6251_p7 = scmp.eq.s32.totalorder %s4305_s24, 0 }
  0x58   : > { %4243 = dma.done.wait (%p6251_p7), [#allocation3], 3072   ;;  %p6252_p12 = pmov %p6251_p7 }
  0x59   : > { %p6253_p2 = pmov %p6251_p7 }
  0x5a   : > { %4245 = vsyncadd (%p6252_p12), [#allocation3], 4294964224 }
  0x5b   : > { %4247 = dma.done.wait (%p6253_p2), [#allocation5], 6528   ;;  %p6254_p3 = pmov %p6253_p2 }
  0x5c   : > { %v4261_v0 = vmov 0   ;;  %p286_p5 = scmp.lt.s32.totalorder %s4305_s24, 1  ;;  %v4090_v1 = vld [vmem:[#allocation2 + $0x4] ss:$24 sps:$4 sm:$0xff]   ;;  %v4092_v2 = vld [vmem:[#allocation2] ss:$24 sps:$4 sm:$0xff]   ;;  %v618_v32 = vlaneseq }
  0x5d   : > { %4249 = vsyncadd (%p6254_p3), [#allocation5], 4294960768  ;;  %486 = vmatprep.mubr.bf16.mxu0 %v4261_v0  ;;  %537 = vmatprep.mubr.bf16.mxu1 %v4261_v0  ;;  %v4093_v3 = vld [vmem:[#allocation2 + $0x34] ss:$24 sps:$4 sm:$0xff]   ;;  %v4095_v4 = vld [vmem:[#allocation2 + $0x30] ss:$24 sps:$4 sm:$0xff]  }
  0x5e   : > { %s6292_s24 = smov (!%p286_p5, %s4305_s24), 1  ;;  %454 = vmatprep.subr.bf16.mxu0 %v4090_v1  ;;  %v4096_v5 = vld [vmem:[#allocation2 + $0x64] ss:$24 sps:$4 sm:$0xff]   ;;  %v4098_v6 = vld [vmem:[#allocation2 + $0x60] ss:$24 sps:$4 sm:$0xff]   ;;  %vm447_vm0 = vcmask 523264  }
  0x5f   : > { %455 = vmatpush1.bf16.msra.mxu0 %v4092_v2  ;;  %s4038_s25 = smul.u32 24, %s6292_s24  ;;  %v4102_v7 = vld [vmem:[#allocation2 + $0xc] ss:$24 sps:$4 sm:$0xff]   ;;  %v4104_v8 = vld [vmem:[#allocation2 + $0x8] ss:$24 sps:$4 sm:$0xff]   ;;  %v4443_v34 = vshrl.u32 %v618_v32, 7 }
  0x60   : > { %456 = vmatprep.subr.bf16.mxu0 %v4093_v3  ;;  %v4099_v9 = vld [vmem:[#allocation2 + $0x94] ss:$24 sps:$4 sm:$0xff]   ;;  %505 = vmatprep.subr.bf16.mxu1 %v4102_v7  ;;  %v4101_v11 = vld [vmem:[#allocation2 + $0x90] ss:$24 sps:$4 sm:$0xff]   ;;  %v4119_v22 = vld [vmem:[#allocation2 + $0x44] ss:$24 sps:$4 sm:$0xff]  }
  0x61   : > { %s4427_s12 = scalar_lea.vmem %s6205_s0, %s4038_s25  ;;  %v4105_v10 = vld [vmem:[#allocation2 + $0x3c] ss:$24 sps:$4 sm:$0xff]   ;;  %506 = vmatpush1.bf16.msra.mxu1 %v4104_v8  ;;  %v4107_v12 = vld [vmem:[#allocation2 + $0x38] ss:$24 sps:$4 sm:$0xff]   ;;  %v4108_v13 = vld [vmem:[#allocation2 + $0x6c] ss:$24 sps:$4 sm:$0xff]   ;;  %s295_s26 = scalar_lea.vmem %s6211_s6, %s4038_s25 }
  0x62   : > { %507 = vmatprep.subr.bf16.mxu1 %v4105_v10  ;;  %v298_v14 = vld [vmem:[%s4427_s12] sm:$0xff]  ;;  %v299_v15 = vld [vmem:[%s4427_s12 + $0x8] sm:$0xff]  ;;  %v4111_v19 = vld [vmem:[#allocation2 + $0x9c] ss:$24 sps:$4 sm:$0xff]   ;;  %v4262_v30 = vmov 1966171168  }
  0x63   : > { %457 = vmatpush1.bf16.msra.mxu0 %v4095_v4  ;;  %v4116_v16 = vld [vmem:[#allocation2 + $0x14] ss:$24 sps:$4 sm:$0xff]   ;;  %v4110_v17 = vld [vmem:[#allocation2 + $0x68] ss:$24 sps:$4 sm:$0xff]   ;;  %v301_v18 = vpack.c.bf16 %v299_v15, %v298_v14  ;;  %v4113_v21 = vld [vmem:[#allocation2 + $0x98] ss:$24 sps:$4 sm:$0xff]   ;;  %v616_v31 = vunpack.c.l.s4 %v4262_v30 }
  0x64   : > { %458 = vmatprep.subr.bf16.mxu0 %v4096_v5  ;;  %v4114_v20 = vld [vmem:[#allocation2 + $0x10] ss:$24 sps:$4 sm:$0xff]   ;;  %v4117_v23 = vld [vmem:[#allocation2 + $0x40] ss:$24 sps:$4 sm:$0xff]   ;;  %v4122_v24 = vld [vmem:[#allocation2 + $0x74] ss:$24 sps:$4 sm:$0xff]  }
  0x65   : > { %508 = vmatpush1.bf16.msra.mxu1 %v4107_v12  ;;  %v300_v25 = vld [vmem:[%s4427_s12 + $0x10] sm:$0x1]  ;;  %v4125_v28 = vld [vmem:[#allocation2 + $0xa4] ss:$24 sps:$4 sm:$0xff]   ;;  %v4123_v29 = vld [vmem:[#allocation2 + $0xa0] ss:$24 sps:$4 sm:$0xff]   ;;  %v617_v33 = vunpack.c.0.s8 %v616_v31 }
  0x66   : > { %509 = vmatprep.subr.bf16.mxu1 %v4108_v13  ;;  %v4120_v26 = vld [vmem:[#allocation2 + $0x70] ss:$24 sps:$4 sm:$0xff]   ;;  %v302_v27 = vpack.c.bf16 %v300_v25, %v300_v25  ;;  %vm964_vm1 = vcmask 261120   ;;  %v4459_v41 = vsub.s32 0, %v4443_v34  ;;  %v3881_v44 = vld [vmem:[#allocation4] sm:$0xff]   ;;  %vm971_vm2 = vcmask 253952  }
  0x67   : > { %459 = vmatpush1.bf16.msra.mxu0 %v4098_v6  ;;  %v4446_v35 = vsub.s32 %v617_v33, %v4443_v34  ;;  %v3882_v49 = vunpack.c.l.bf16 %v3881_v44  ;;  %v728_v50 = vld [vmem:[#allocation4 + $0x8] sm:$0x1]  ;;  %v3883_v55 = vunpack.c.h.bf16 %v3881_v44  ;;  %v4488_v61 = vld [vmem:[#allocation4 + $0xc] sm:$0xff]   ;;  %vm1181_vm3 = vcmask 130112   ;;  %s4263_s10 = smov 32  }
  0x68   : > { %460 = vmatprep.subr.bf16.mxu0 %v4099_v9  ;;  %6255 = vst [vmem:[#allocation9_spill] sm:$0xff] %v4459_v41  ;;  %v779_v2 = vunpack.c.l.bf16 %v728_v50  ;;  %v780_v10 = vunpack.c.l.bf16 %v4488_v61  ;;  %v4548_v50 = vld [vmem:[#allocation4 + $0x18] sm:$0xff]   ;;  %vm1188_vm4 = vcmask 195712   ;;  %vm1414_vm5 = vcmask 1041409  }
  0x69   : > { %510 = vmatpush1.bf16.msra.mxu1 %v4110_v17  ;;  %vm1416_vm6 = vcmask 1042434   ;;  %vm2172_vm7 = vcmask 1040384   ;;  %vm1418_vm8 = vcmask 1043459   ;;  %vm1420_vm9 = vcmask 1044484  }
  0x6a   : > { %511 = vmatprep.subr.bf16.mxu1 %v4111_v19  ;;  %vm1422_vm10 = vcmask 1045509   ;;  %vm1424_vm11 = vcmask 1046534   ;;  %vm1426_vm12 = vcmask 1047559   ;;  %vm1498_vm13 = vcmask 138240  }
  0x6b   : > { %461 = vmatpush1.bf16.msra.mxu0 %v4101_v11  ;;  %vm1505_vm14 = vcmask 131072   ;;  %vm3732_vm15 = vcmask 516096  }
  0x6c   : > { %556 = vmatprep.subr.bf16.mxu0 %v4116_v16 }
  0x6d   : > { %512 = vmatpush1.bf16.msra.mxu1 %v4113_v21 }
  0x6e   : > { %3857 = vmatmul.mubr.msk.bf16.vlgmr.msra.gmra.mrb[0].mxu0 %vm447_vm0, %v301_v18 }
  0x6f   : > { %496 = vmatprep.mubr.bf16.mxu0 %v4261_v0  ;;  %557 = vmatpush1.bf16.msra.mxu0 %v4114_v20 }
  0x70   : > { %558 = vmatprep.subr.bf16.mxu0 %v4119_v22  ;;  %3859 = vmatmul.mubr.msk.bf16.vlgmr.msra.gmra.mrb[0].mxu1 %vm447_vm0, %v301_v18 }
  0x71   : > { %547 = vmatprep.mubr.bf16.mxu1 %v4261_v0 }
  0x73   : > { %559 = vmatpush1.bf16.msra.mxu0 %v4117_v23  ;;  %v781_v23 = vunpack.c.h.bf16 %v4488_v61 }
  0x74   : > { %560 = vmatprep.subr.bf16.mxu0 %v4122_v24  ;;  %v4530_v24 = vld [vmem:[#allocation4 + $0x60] sm:$0xff]  }
  0x75   : > { %v3898_v31 = vunpack.c.l.bf16 %v4530_v24 }
  0x76   : > { %3858 = vmatmul.mubr.msk.bf16.gmra.mrb[4].mxu0 %vm447_vm0, %v302_v27 }
  0x77   : > { %561 = vmatpush1.bf16.msra.mxu0 %v4120_v26  ;;  %588 = vmatprep.mubr.bf16.mxu0 %v4261_v0 }
  0x78   : > { %562 = vmatprep.subr.bf16.mxu0 %v4125_v28  ;;  %3860 = vmatmul.mubr.msk.bf16.gmra.mrb[4].mxu1 %vm447_vm0, %v302_v27 }
  0x7b   : > { %563 = vmatpush1.bf16.msra.mxu0 %v4123_v29 }
  0x7e   : > { %3861 = vmatmul.mubr.msk.bf16.vlgmr.msra.gmra.mrb[8].mxu0 %vm447_vm0, %v301_v18 }
  0x7f   : > { %598 = vmatprep.mubr.bf16.mxu0 %v4261_v0 }
  0x86   : > { %3862 = vmatmul.mubr.msk.bf16.gmra.mrb[12].mxu0 %vm447_vm0, %v302_v27 }
 0x141   : > { %v4448_v36 = vpop.f32.mrb[0].mxu0 }
 0x142   : > { %v621_v37 = vrot.slane %v4448_v36, %v4446_v35  ;;  %v4452_v38 = vpop.f32.mrb[1].mxu0  ;;  %v614_v33 = vcombine.high %v4448_v36, %v4448_v36 }
 0x143   : > { %v4456_v39 = vrot.slane %v4452_v38, %v4446_v35  ;;  %v492_v40 = vpop.f32.mrb[2].mxu0  ;;  %v4470_v51 = vpop.f32.mrb[0].mxu1 }
 0x144   : > { %v607_v42 = vpack.c.bf16 %v492_v40, %v4448_v36  ;;  %v494_v43 = vpop.f32.mrb[3].mxu0  ;;  %v629_v45 = vcombine.high %v621_v37, %v621_v37  ;;  %v4463_v46 = vrot.slane %v621_v37, %v4446_v35  ;;  %v663_v48 = vcombine.high %v492_v40, %v492_v40  ;;  %v4476_v56 = vpop.f32.mrb[1].mxu1 }
 0x145   : > { %v4467_v47 = vrot.slane %v4456_v39, %v4446_v35  ;;  %v2226_v53 = vpack.c.bf16 %v494_v43, %v4452_v38  ;;  %v2282_v54 = vcombine.high %v494_v43, %v494_v43  ;;  %v4482_v58 = vrot.slane %v494_v43, %v4446_v35  ;;  %v4490_v62 = vpop.f32.mrb[2].mxu1 }
 0x146   : > { %3994 = vmatprep.mubr.msk.bf16.mxu1 %vm964_vm1, %v607_v42  ;;  %v4473_v52 = vrot.slane %v663_v48, %v4446_v35  ;;  %v4479_v57 = vrot.slane %v629_v45, %v4446_v35  ;;  %v831_v59 = vrot.slane %v4463_v46, %v4459_v41  ;;  %v4499_v3 = vpop.f32.mrb[3].mxu1  ;;  %v4510_v12 = vrot.slane %v492_v40, %v4446_v35 }
 0x147   : > { %v2348_v60 = vrot.slane %v4467_v47, %v4459_v41  ;;  %4010 = vmatprep.mubr.msk.bf16.mxu0 %vm964_vm1, %v2226_v53  ;;  %v4504_v5 = vrot.slane %v2282_v54, %v4446_v35  ;;  %v2297_v6 = vcombine.high %v4482_v58, %v4482_v58  ;;  %v659_v37 = vcombine.high %v4463_v46, %v4463_v46  ;;  %v4550_v53 = vld [vmem:[#allocation4 + $0x14] sm:$0x1] }
 0x148   : > { %v4496_v1 = vrot.slane %v4473_v52, %v4446_v35  ;;  %v913_v7 = vmul.f32 %v3882_v49, %v831_v59  ;;  %v835_v15 = vrot.slane %v4479_v57, %v4459_v41  ;;  %v914_v18 = vmul.f32 %v3883_v55, %v831_v59 }
 0x149   : > { %v4492_v63 = vpop.f32.mrb[4].mxu0  ;;  %v2431_v9 = vmul.f32 %v3883_v55, %v2348_v60  ;;  %v4514_v13 = vrot.slane %v4504_v5, %v4446_v35  ;;  %v4517_v14 = vrot.slane %v2297_v6, %v4446_v35  ;;  %v2432_v19 = vmul.f32 %v2348_v60, %v779_v2  ;;  %v4562_v6 = vld [vmem:[#allocation4 + $0x68] sm:$0x1] }
 0x14a   : > { %v4501_v4 = vpop.f32.mrb[5].mxu0  ;;  %v965_v16 = vsel %vm964_vm1, %v913_v7, 0.0  ;;  %v4527_v22 = vrot.slane %v4510_v12, %v4446_v35  ;;  %v968_v26 = vsel %vm964_vm1, %v914_v18, 0.0  ;;  %v915_v28 = vmul.f32 %v831_v59, %v779_v2 }
 0x14b   : > { %v502_v8 = vpop.f32.mrb[6].mxu0  ;;  %v2484_v17 = vsel %vm964_vm1, %v2431_v9, 0.0  ;;  %966 = vadd.xlane.f32.xlu0 %v965_v16  ;;  %v549_v20 = vpop.f32.mrb[4].mxu1  ;;  %v2487_v27 = vsel %vm971_vm2, %v2432_v19, 0.0  ;;  %v916_v29 = vmul.f32 %v835_v15, %v780_v10  ;;  %v2430_v40 = vmul.f32 %v3882_v49, %v2348_v60  ;;  %v4570_v16 = vld [vmem:[#allocation4 + $0x20] sm:$0x1] }
 0x14c   : > { %v503_v11 = vpop.f32.mrb[7].mxu0  ;;  %2485 = vadd.xlane.f32.xlu1 %v2484_v17  ;;  %v4523_v21 = vpop.f32.mrb[5].mxu1  ;;  %v3899_v42 = vunpack.c.h.bf16 %v4530_v24  ;;  %v972_v43 = vsel %vm971_vm2, %v915_v28, 0.0  ;;  %v917_v45 = vmul.f32 %v835_v15, %v781_v23  ;;  %v863_v48 = vrot.slane %v4527_v22, %v4459_v41  ;;  %v4572_v17 = vld [vmem:[#allocation4 + $0x30] sm:$0xff]  }
 0x14d   : > { %v553_v25 = vpop.f32.mrb[6].mxu1  ;;  %v975_v44 = vsel %vm964_vm1, %v916_v29, 0.0  ;;  %v628_v36 = vrot.slane %v614_v33, %v4446_v35  ;;  %v3886_v46 = vunpack.c.l.bf16 %v4548_v50  ;;  %v839_v49 = vrot.slane %v659_v37, %v4459_v41 }
 0x14e   : > { %v554_v30 = vpop.f32.mrb[7].mxu1  ;;  %v782_v54 = vunpack.c.l.bf16 %v4550_v53  ;;  %v2481_v55 = vsel %vm964_vm1, %v2430_v40, 0.0  ;;  %v978_v59 = vsel %vm964_vm1, %v917_v45, 0.0  ;;  %v937_v60 = vmul.f32 %v3898_v31, %v863_v48  ;;  %v4701_v53 = vld [vmem:[#allocation4 + $0x6c] sm:$0xff]  }
 0x14f   : > { %969 = vadd.xlane.f32.xlu0 %v968_v26  ;;  %v938_v2 = vmul.f32 %v3899_v42, %v863_v48  ;;  %v2248_v7 = vcombine.high %v4456_v39, %v4456_v39  ;;  %v803_v9 = vunpack.c.l.bf16 %v4562_v6  ;;  %v3887_v11 = vunpack.c.h.bf16 %v4548_v50 }
 0x150   : > { %2488 = vadd.xlane.f32.xlu1 %v2487_v27  ;;  %v918_v8 = vmul.f32 %v835_v15, %v782_v54  ;;  %v4575_v18 = vrot.slane %v628_v36, %v4446_v35  ;;  %v1038_v19 = vsel %vm964_vm1, %v937_v60, 0.0  ;;  %v919_v39 = vmul.f32 %v3886_v46, %v839_v49 }
 0x151   : > { %v1041_v25 = vsel %vm964_vm1, %v938_v2, 0.0  ;;  %v630_v26 = vcombine.high %v628_v36, %v628_v36  ;;  %v609_v15 = vpack.c.bf16 %v4490_v62, %v4470_v51  ;;  %v4584_v27 = vrot.slane %v2248_v7, %v4446_v35  ;;  %v4619_v2 = vld [vmem:[#allocation4 + $0x38] sm:$0x1] }
 0x152   : > { %v785_v28 = vunpack.c.l.bf16 %v4570_v16  ;;  %v3890_v29 = vunpack.c.l.bf16 %v4572_v17  ;;  %v981_v30 = vsel %vm971_vm2, %v918_v8, 0.0  ;;  %v939_v33 = vmul.f32 %v863_v48, %v803_v9 }
 0x153   : > { %973 = vadd.xlane.f32.xlu0 %v972_v43  ;;  %v1445_v37 = vsel %vm964_vm1, %v609_v15, 0  ;;  %4034 = vmatprep.subr.msk.bf16.mxu1 %vm964_vm1, %v609_v15  ;;  %v2228_v40 = vpack.c.bf16 %v4499_v3, %v4476_v56  ;;  %v984_v51 = vsel %vm964_vm1, %v919_v39, 0.0  ;;  %v920_v62 = vmul.f32 %v3887_v11, %v839_v49 }
 0x154   : > { %976 = vadd.xlane.f32.xlu1 %v975_v44  ;;  %v847_v43 = vrot.slane %v4575_v18, %v4459_v41  ;;  %3991 = vmatpush3.bf16.xpose.msra.mxu1 %v1445_v37  ;;  %v610_v44 = vpack.c.bf16 %v549_v20, %v549_v20  ;;  %v4602_v48 = vrot.slane %v630_v26, %v4446_v35  ;;  %v1044_v3 = vsel %vm971_vm2, %v939_v33, 0.0 }
 0x155   : > { %v2947_v45 = vsel %vm964_vm1, %v2228_v40, 0  ;;  %4036 = vmatprep.subr.msk.bf16.mxu0 %vm964_vm1, %v2228_v40  ;;  %v4608_v56 = vrot.slane %v4482_v58, %v4446_v35  ;;  %v921_v20 = vmul.f32 %v839_v49, %v785_v28  ;;  %v3891_v36 = vunpack.c.h.bf16 %v4572_v17 }
 0x156   : > { %4035 = vmatprep.subr.msk.bf16.mxu1 %vm964_vm1, %v610_v44  ;;  %4007 = vmatpush3.bf16.xpose.msra.mxu0 %v2947_v45  ;;  %v2352_v60 = vrot.slane %v4584_v27, %v4459_v41  ;;  %v718_v58 = vrot.slane %v4492_v63, %v4446_v35  ;;  %v2233_v7 = vcombine.high %v4452_v38, %v4452_v38  ;;  %v1448_v49 = vsel %vm964_vm1, %v610_v44, 0 }
 0x157   : > { %2482 = vadd.xlane.f32.xlu0 %v2481_v55  ;;  %v987_v55 = vsel %vm964_vm1, %v920_v62, 0.0  ;;  %v791_v39 = vunpack.c.l.bf16 %v4619_v2  ;;  %v2229_v26 = vpack.c.bf16 %v4523_v21, %v4523_v21  ;;  %v926_v38 = vmul.f32 %v3891_v36, %v847_v43 }
 0x158   : > { %979 = vadd.xlane.f32.xlu1 %v978_v59  ;;  %v925_v59 = vmul.f32 %v3890_v29, %v847_v43  ;;  %v4627_v8 = vrot.slane %v718_v58, %v4446_v35  ;;  %v2380_v33 = vrot.slane %v4608_v56, %v4459_v41  ;;  %v608_v40 = vpack.c.bf16 %v4492_v63, %v4492_v63 }
 0x159   : > { %v2950_v37 = vsel %vm964_vm1, %v2229_v26, 0  ;;  %4037 = vmatprep.subr.msk.bf16.mxu0 %vm964_vm1, %v2229_v26  ;;  %v927_v21 = vmul.f32 %v847_v43, %v791_v39  ;;  %v2337_v43 = vrot.slane %v4501_v4, %v4446_v35  ;;  %v679_v63 = vcombine.high %v4473_v52, %v4473_v52 }
 0x15a   : > { %v1002_v15 = vsel %vm964_vm1, %v925_v59, 0.0  ;;  %v2455_v62 = vmul.f32 %v3899_v42, %v2380_v33  ;;  %v708_v50 = vcombine.high %v4527_v22, %v4527_v22 }
 0x15b   : > { %1039 = vadd.xlane.f32.xlu0 %v1038_v19  ;;  %v2278_v19 = vcombine.high %v4467_v47, %v4467_v47  ;;  %v2247_v47 = vrot.slane %v2233_v7, %v4446_v35  ;;  %v1008_v42 = vsel %vm971_vm2, %v927_v21, 0.0  ;;  %v4668_v58 = vrot.slane %v2337_v43, %v4446_v35 }
 0x15c   : > { %1042 = vadd.xlane.f32.xlu1 %v1041_v25  ;;  %v990_v25 = vsel %vm971_vm2, %v921_v20, 0.0  ;;  %3993 = vmatpush3.bf16.xpose.msra.mxu1 %v1448_v49  ;;  %v2433_v20 = vmul.f32 %v2352_v60, %v780_v10  ;;  %v2456_v7 = vmul.f32 %v2380_v33, %v803_v9  ;;  %v4684_v49 = vrot.slane %v679_v63, %v4446_v35 }
 0x15d   : > { %v2356_v44 = vrot.slane %v2278_v19, %v4459_v41  ;;  %v2249_v45 = vcombine.high %v2247_v47, %v2247_v47  ;;  %v4675_v52 = vrot.slane %v2247_v47, %v4446_v35  ;;  %v678_v19 = vcombine.high %v4510_v12, %v4510_v12  ;;  %v4721_v47 = vld [vmem:[#allocation4 + $0x78] sm:$0xff]  }
 0x15e   : > { %4009 = vmatpush3.bf16.xpose.msra.mxu0 %v2950_v37  ;;  %v2490_v61 = vsel %vm964_vm1, %v2433_v20, 0.0  ;;  %v4723_v37 = vld [vmem:[#allocation4 + $0x74] sm:$0x1]  ;;  %v3902_v17 = vunpack.c.l.bf16 %v4721_v47  ;;  %v4750_v20 = vld [vmem:[#allocation4 + $0x2c] sm:$0x1] }
 0x15f   : > { %985 = vadd.xlane.f32.xlu0 %v984_v51  ;;  %v2436_v59 = vmul.f32 %v3886_v46, %v2356_v44  ;;  %v2454_v46 = vmul.f32 %v3898_v31, %v2380_v33  ;;  %v2438_v24 = vmul.f32 %v2356_v44, %v785_v28  ;;  %v2364_v31 = vrot.slane %v4675_v52, %v4459_v41 }
 0x160   : > { %982 = vadd.xlane.f32.xlu1 %v981_v30  ;;  %v2434_v30 = vmul.f32 %v2352_v60, %v781_v23  ;;  %v1005_v23 = vsel %vm964_vm1, %v926_v38, 0.0  ;;  %v4697_v6 = vrot.slane %v678_v19, %v4446_v35  ;;  %v2437_v12 = vmul.f32 %v3887_v11, %v2356_v44  ;;  %v4762_v19 = vld [vmem:[#allocation4 + $0x80] sm:$0x1] }
 0x161   : > { %v2499_v10 = vsel %vm964_vm1, %v2436_v59, 0.0  ;;  %v2553_v26 = vsel %vm964_vm1, %v2454_v46, 0.0  ;;  %v2505_v16 = vsel %vm971_vm2, %v2438_v24, 0.0  ;;  %v2443_v28 = vmul.f32 %v3891_v36, %v2364_v31 }
 0x162   : > { %v2493_v51 = vsel %vm964_vm1, %v2434_v30, 0.0  ;;  %v2502_v11 = vsel %vm964_vm1, %v2437_v12, 0.0  ;;  %v867_v38 = vrot.slane %v4697_v6, %v4459_v41  ;;  %v2442_v33 = vmul.f32 %v3890_v29, %v2364_v31 }
 0x163   : > { %1045 = vadd.xlane.f32.xlu0 %v1044_v3  ;;  %v2227_v3 = vpack.c.bf16 %v4501_v4, %v4501_v4  ;;  %3995 = vmatmul.mubr.msk.bf16.vlgmr.msra.gmra.mrb[8].mxu1 %vm964_vm1, %v608_v40  ;;  %v4671_v4 = vrot.slane %v2249_v45, %v4446_v35  ;;  %v2520_v30 = vsel %vm964_vm1, %v2443_v28, 0.0  ;;  %v2444_v36 = vmul.f32 %v2364_v31, %v791_v39 }
 0x164   : > { %988 = vadd.xlane.f32.xlu1 %v987_v55  ;;  %v2556_v55 = vsel %vm964_vm1, %v2455_v62, 0.0  ;;  %v806_v29 = vunpack.c.l.bf16 %v4723_v37  ;;  %v2517_v2 = vsel %vm964_vm1, %v2442_v33, 0.0  ;;  %v3903_v45 = vunpack.c.h.bf16 %v4721_v47 }
 0x165   : > { %4011 = vmatmul.mubr.msk.bf16.vlgmr.msra.gmra.mrb[16].mxu0 %vm964_vm1, %v2227_v3  ;;  %v2523_v39 = vsel %vm971_vm2, %v2444_v36, 0.0  ;;  %v851_v33 = vrot.slane %v4602_v48, %v4459_v41  ;;  %v4786_v36 = vld [vmem:[#allocation4 + $0x44] sm:$0x1] }
 0x166   : > { %v942_v62 = vmul.f32 %v867_v38, %v806_v29 }
 0x167   : > { %991 = vadd.xlane.f32.xlu0 %v990_v25  ;;  %v2435_v25 = vmul.f32 %v2352_v60, %v782_v54  ;;  %v2298_v54 = vcombine.high %v4504_v5, %v4504_v5  ;;  %v804_v60 = vunpack.c.l.bf16 %v4701_v53  ;;  %v805_v5 = vunpack.c.h.bf16 %v4701_v53 }
 0x168   : > { %1003 = vadd.xlane.f32.xlu1 %v1002_v15  ;;  %v2559_v15 = vsel %vm971_vm2, %v2456_v7, 0.0  ;;  %v4760_v7 = vld [vmem:[#allocation4 + $0x90] sm:$0xff]  }
 0x169   : > { %v2496_v9 = vsel %vm971_vm2, %v2435_v25, 0.0  ;;  %v4726_v22 = vrot.slane %v2298_v54, %v4446_v35  ;;  %v940_v21 = vmul.f32 %v867_v38, %v804_v60  ;;  %v941_v40 = vmul.f32 %v867_v38, %v805_v5 }
 0x16a   : > { %v661_v35 = vcombine.high %v4479_v57, %v4479_v57  ;;  %v3906_v25 = vunpack.c.l.bf16 %v4760_v7 }
 0x16b   : > { %1006 = vadd.xlane.f32.xlu0 %v1005_v23  ;;  %v871_v23 = vrot.slane %v708_v50, %v4459_v41  ;;  %v1047_v3 = vsel %vm964_vm1, %v940_v21, 0.0  ;;  %v1050_v43 = vsel %vm964_vm1, %v941_v40, 0.0  ;;  %v3907_v50 = vunpack.c.h.bf16 %v4760_v7 }
 0x16c   : > { %2494 = vadd.xlane.f32.xlu1 %v2493_v51  ;;  %v4739_v51 = vld [vmem:[#allocation4 + $0x24] sm:$0xff]   ;;  %v843_v57 = vrot.slane %v661_v35, %v4459_v41  ;;  %v794_v40 = vunpack.c.l.bf16 %v4786_v36 }
 0x16d   : > { %v787_v44 = vunpack.c.h.bf16 %v4739_v51  ;;  %v943_v63 = vmul.f32 %v3902_v17, %v871_v23  ;;  %v944_v46 = vmul.f32 %v3903_v45, %v871_v23 }
 0x16f   : > { %1009 = vadd.xlane.f32.xlu0 %v1008_v42  ;;  %v788_v42 = vunpack.c.l.bf16 %v4750_v20  ;;  %v1056_v59 = vsel %vm964_vm1, %v943_v63, 0.0  ;;  %v1059_v31 = vsel %vm964_vm1, %v944_v46, 0.0 }
 0x170   : > { %2557 = vadd.xlane.f32.xlu1 %v2556_v55  ;;  %v786_v55 = vunpack.c.l.bf16 %v4739_v51 }
 0x171   : > { %v924_v12 = vmul.f32 %v843_v57, %v788_v42 }
 0x172   : > { %v922_v54 = vmul.f32 %v843_v57, %v786_v55 }
 0x173   : > { %2491 = vadd.xlane.f32.xlu0 %v2490_v61  ;;  %v1053_v61 = vsel %vm971_vm2, %v942_v62, 0.0  ;;  %v660_v62 = vcombine.high %v4575_v18, %v4575_v18 }
 0x174   : > { %2500 = vadd.xlane.f32.xlu1 %v2499_v10  ;;  %v923_v10 = vmul.f32 %v843_v57, %v787_v44  ;;  %v993_v38 = vsel %vm964_vm1, %v922_v54, 0.0 }
 0x175   : > { %v855_v46 = vrot.slane %v660_v62, %v4459_v41 }
 0x176   : > { %v996_v24 = vsel %vm964_vm1, %v923_v10, 0.0  ;;  %v930_v10 = vmul.f32 %v851_v33, %v794_v40 }
 0x177   : > { %2554 = vadd.xlane.f32.xlu0 %v2553_v26  ;;  %v879_v26 = vrot.slane %v4496_v1, %v4459_v41 }
 0x178   : > { %2560 = vadd.xlane.f32.xlu1 %v2559_v15  ;;  %v809_v15 = vunpack.c.l.bf16 %v4762_v19  ;;  %v1017_v54 = vsel %vm971_vm2, %v930_v10, 0.0  ;;  %v2280_v10 = vcombine.high %v4584_v27, %v4584_v27  ;;  %v2279_v19 = vcombine.high %v4675_v52, %v4675_v52 }
 0x179   : > { %v950_v21 = vmul.f32 %v3907_v50, %v879_v26 }
 0x17b   : > { %2497 = vadd.xlane.f32.xlu0 %v2496_v9  ;;  %v4774_v9 = vld [vmem:[#allocation4 + $0x3c] sm:$0xff]   ;;  %v1077_v63 = vsel %vm964_vm1, %v950_v21, 0.0 }
 0x17c   : > { %2506 = vadd.xlane.f32.xlu1 %v2505_v16  ;;  %v945_v16 = vmul.f32 %v871_v23, %v809_v15  ;;  %v793_v28 = vunpack.c.h.bf16 %v4774_v9 }
 0x17e   : > { %v1062_v23 = vsel %vm971_vm2, %v945_v16, 0.0  ;;  %v929_v35 = vmul.f32 %v851_v33, %v793_v28 }
 0x17f   : > { %2503 = vadd.xlane.f32.xlu0 %v2502_v11  ;;  %v999_v11 = vsel %vm971_vm2, %v924_v12, 0.0 }
 0x180   : > { %2521 = vadd.xlane.f32.xlu1 %v2520_v30  ;;  %v949_v30 = vmul.f32 %v3906_v25, %v879_v26 }
 0x183   : > { %2518 = vadd.xlane.f32.xlu0 %v2517_v2  ;;  %v792_v2 = vunpack.c.l.bf16 %v4774_v9  ;;  %v710_v9 = vcombine.high %v4697_v6, %v4697_v6 }
 0x184   : > { %2524 = vadd.xlane.f32.xlu1 %v2523_v39  ;;  %v1074_v39 = vsel %vm964_vm1, %v949_v30, 0.0  ;;  %v2327_v30 = vcombine.high %v4608_v56, %v4608_v56 }
 0x185   : > { %v928_v18 = vmul.f32 %v851_v33, %v792_v2  ;;  %v2384_v33 = vrot.slane %v4517_v14, %v4459_v41  ;;  %v875_v6 = vrot.slane %v710_v9, %v4459_v41 }
 0x187   : > { %1048 = vadd.xlane.f32.xlu0 %v1047_v3  ;;  %v4798_v3 = vld [vmem:[#allocation4 + $0x48] sm:$0xff]   ;;  %v1011_v16 = vsel %vm964_vm1, %v928_v18, 0.0  ;;  %v2458_v56 = vmul.f32 %v2384_v33, %v805_v5  ;;  %v2459_v18 = vmul.f32 %v2384_v33, %v806_v29  ;;  %v2360_v5 = vrot.slane %v2280_v10, %v4459_v41 }
 0x188   : > { %1051 = vadd.xlane.f32.xlu1 %v1050_v43  ;;  %v4800_v43 = vld [vmem:[#allocation4 + $0x98] sm:$0x1]  ;;  %v3895_v57 = vunpack.c.h.bf16 %v4798_v3  ;;  %v3894_v12 = vunpack.c.l.bf16 %v4798_v3  ;;  %v2396_v29 = vrot.slane %v4514_v13, %v4459_v41  ;;  %v709_v3 = vcombine.high %v4496_v1, %v4496_v1 }
 0x189   : > { %v2440_v37 = vmul.f32 %v2360_v5, %v787_v44 }
 0x18a   : > { %v2467_v51 = vmul.f32 %v3907_v50, %v2396_v29  ;;  %v4924_v1 = vrot.slane %v709_v3, %v4459_v41 }
 0x18b   : > { %1057 = vadd.xlane.f32.xlu0 %v1056_v59  ;;  %v815_v59 = vunpack.c.l.bf16 %v4800_v43 }
 0x18c   : > { %1054 = vadd.xlane.f32.xlu1 %v1053_v61  ;;  %v1014_v61 = vsel %vm964_vm1, %v929_v35, 0.0  ;;  %v931_v35 = vmul.f32 %v3894_v12, %v855_v46 }
 0x18f   : > { %997 = vadd.xlane.f32.xlu0 %v996_v24  ;;  %v4811_v24 = vld [vmem:[#allocation4 + $0x50] sm:$0x1] }
 0x190   : > { %1060 = vadd.xlane.f32.xlu1 %v1059_v31  ;;  %v797_v31 = vunpack.c.l.bf16 %v4811_v24 }
 0x193   : > { %1000 = vadd.xlane.f32.xlu0 %v999_v11  ;;  %v932_v11 = vmul.f32 %v3895_v57, %v855_v46 }
 0x194   : > { %994 = vadd.xlane.f32.xlu1 %v993_v38  ;;  %v951_v38 = vmul.f32 %v879_v26, %v815_v59  ;;  %v2457_v26 = vmul.f32 %v2384_v33, %v804_v60  ;;  %v2565_v60 = vsel %vm964_vm1, %v2458_v56, 0.0  ;;  %v2466_v33 = vmul.f32 %v3906_v25, %v2396_v29  ;;  %v4903_v56 = vld [vmem:[#allocation4 + $0x9c] sm:$0xff]  }
 0x195   : > { %v1023_v21 = vsel %vm964_vm1, %v932_v11, 0.0  ;;  %v2511_v11 = vsel %vm964_vm1, %v2440_v37, 0.0  ;;  %v2592_v25 = vsel %vm964_vm1, %v2467_v51, 0.0 }
 0x197   : > { %1075 = vadd.xlane.f32.xlu0 %v1074_v39  ;;  %v1080_v39 = vsel %vm971_vm2, %v951_v38, 0.0  ;;  %v2439_v38 = vmul.f32 %v2360_v5, %v786_v55 }
 0x198   : > { %1063 = vadd.xlane.f32.xlu1 %v1062_v23  ;;  %v933_v23 = vmul.f32 %v855_v46, %v797_v31  ;;  %v2562_v46 = vsel %vm964_vm1, %v2457_v26, 0.0 }
 0x199   : > { %v2508_v44 = vsel %vm964_vm1, %v2439_v38, 0.0 }
 0x19a   : > { %v1026_v62 = vsel %vm971_vm2, %v933_v23, 0.0 }
 0x19b   : > { %1015 = vadd.xlane.f32.xlu0 %v1014_v61  ;;  %v2388_v61 = vrot.slane %v2327_v30, %v4459_v41  ;;  %v2441_v30 = vmul.f32 %v2360_v5, %v788_v42  ;;  %v2589_v42 = vsel %vm964_vm1, %v2466_v33, 0.0  ;;  %v817_v5 = vunpack.c.h.bf16 %v4903_v56 }
 0x19c   : > { %1078 = vadd.xlane.f32.xlu1 %v1077_v63  ;;  %v1020_v63 = vsel %vm964_vm1, %v931_v35, 0.0 }
 0x19d   : > { %v2460_v53 = vmul.f32 %v3902_v17, %v2388_v61  ;;  %v2462_v47 = vmul.f32 %v2388_v61, %v809_v15 }
 0x19f   : > { %1018 = vadd.xlane.f32.xlu0 %v1017_v54  ;;  %v2568_v54 = vsel %vm971_vm2, %v2459_v18, 0.0  ;;  %v2571_v27 = vsel %vm964_vm1, %v2460_v53, 0.0  ;;  %v2577_v20 = vsel %vm971_vm2, %v2462_v47, 0.0 }
 0x1a0   : > { %1012 = vadd.xlane.f32.xlu1 %v1011_v16  ;;  %v2461_v16 = vmul.f32 %v3903_v45, %v2388_v61  ;;  %v2514_v45 = vsel %vm971_vm2, %v2441_v30, 0.0  ;;  %v883_v61 = vrot.slane %v4684_v49, %v4459_v41 }
 0x1a2   : > { %v2574_v17 = vsel %vm964_vm1, %v2461_v16, 0.0  ;;  %v953_v33 = vmul.f32 %v883_v61, %v817_v5 }
 0x1a3   : > { %1024 = vadd.xlane.f32.xlu0 %v1023_v21  ;;  %v2368_v21 = vrot.slane %v4671_v4, %v4459_v41 }
 0x1a4   : > { %1081 = vadd.xlane.f32.xlu1 %v1080_v39  ;;  %v2372_v39 = vrot.slane %v2279_v19, %v4459_v41 }
 0x1a5   : > { %v2446_v55 = vmul.f32 %v2368_v21, %v793_v28  ;;  %v2445_v7 = vmul.f32 %v2368_v21, %v792_v2  ;;  %v2447_v50 = vmul.f32 %v2368_v21, %v794_v40  ;;  %v2468_v28 = vmul.f32 %v2396_v29, %v815_v59  ;;  %v4892_v2 = vld [vmem:[#allocation4 + $0x84] sm:$0xff]   ;;  %v4935_v29 = vld [vmem:[#allocation4 + $0x54] sm:$0xff]   ;;  %v4949_v21 = vld [vmem:[#allocation4 + $0x5c] sm:$0x1] }
 0x1a6   : > { %v2449_v35 = vmul.f32 %v3895_v57, %v2372_v39  ;;  %v810_v40 = vunpack.c.l.bf16 %v4892_v2  ;;  %v811_v43 = vunpack.c.h.bf16 %v4892_v2  ;;  %v2448_v26 = vmul.f32 %v3894_v12, %v2372_v39 }
 0x1a7   : > { %1027 = vadd.xlane.f32.xlu0 %v1026_v62  ;;  %v2529_v15 = vsel %vm964_vm1, %v2446_v55, 0.0  ;;  %v2526_v52 = vsel %vm964_vm1, %v2445_v7, 0.0  ;;  %v2532_v23 = vsel %vm971_vm2, %v2447_v50, 0.0  ;;  %v2595_v36 = vsel %vm971_vm2, %v2468_v28, 0.0  ;;  %v4905_v62 = vld [vmem:[#allocation4 + $0x8c] sm:$0x1] }
 0x1a8   : > { %1021 = vadd.xlane.f32.xlu1 %v1020_v63  ;;  %v2538_v59 = vsel %vm964_vm1, %v2449_v35, 0.0  ;;  %v2450_v57 = vmul.f32 %v2372_v39, %v797_v31  ;;  %v816_v63 = vunpack.c.l.bf16 %v4903_v56  ;;  %v812_v10 = vunpack.c.l.bf16 %v4905_v62 }
 0x1a9   : > { %v2535_v24 = vsel %vm964_vm1, %v2448_v26, 0.0  ;;  %v946_v12 = vmul.f32 %v875_v6, %v810_v40  ;;  %v947_v18 = vmul.f32 %v875_v6, %v811_v43  ;;  %v799_v38 = vunpack.c.h.bf16 %v4935_v29 }
 0x1aa   : > { %v2541_v31 = vsel %vm971_vm2, %v2450_v57, 0.0  ;;  %v952_v37 = vmul.f32 %v883_v61, %v816_v63  ;;  %v800_v19 = vunpack.c.l.bf16 %v4949_v21  ;;  %v1086_v7 = vsel %vm964_vm1, %v953_v33, 0.0 }
 0x1ab   : > { %2563 = vadd.xlane.f32.xlu0 %v2562_v46  ;;  %v4919_v46 = vld [vmem:[#allocation4 + $0xa8] sm:$0xff]   ;;  %v1068_v16 = vsel %vm964_vm1, %v947_v18, 0.0  ;;  %v2329_v39 = vcombine.high %v4517_v14, %v4517_v14  ;;  %v2400_v33 = vrot.slane %v4726_v22, %v4459_v41  ;;  %v2328_v62 = vcombine.high %v4514_v13, %v4514_v13 }
 0x1ac   : > { %2566 = vadd.xlane.f32.xlu1 %v2565_v60  ;;  %v1171_v60 = vand.u32 127, %v618_v32  ;;  %v3910_v53 = vunpack.c.l.bf16 %v4919_v46  ;;  %v948_v32 = vmul.f32 %v875_v6, %v812_v10  ;;  %v1083_v47 = vsel %vm964_vm1, %v952_v37, 0.0 }
 0x1ad   : > { %v2392_v6 = vrot.slane %v2329_v39, %v4459_v41  ;;  %v2470_v39 = vmul.f32 %v2400_v33, %v817_v5 }
 0x1ae   : > { %v4952_v51 = vsub.s32 %v1171_v60, %v4443_v34 }
 0x1af   : > { %2569 = vadd.xlane.f32.xlu0 %v2568_v54  ;;  %v662_v54 = vcombine.high %v4602_v48, %v4602_v48 }
 0x1b0   : > { %2572 = vadd.xlane.f32.xlu1 %v2571_v27  ;;  %v1065_v27 = vsel %vm964_vm1, %v946_v12, 0.0 }
 0x1b1   : > { %v859_v48 = vrot.slane %v662_v54, %v4459_v41 }
 0x1b3   : > { %2575 = vadd.xlane.f32.xlu0 %v2574_v17  ;;  %v4937_v17 = vld [vmem:[#allocation4 + $0xa4] sm:$0x1]  ;;  %v935_v55 = vmul.f32 %v859_v48, %v799_v38 }
 0x1b4   : > { %2512 = vadd.xlane.f32.xlu1 %v2511_v11  ;;  %v1176_v11 = vadd.s32 4294967288, %v1171_v60  ;;  %v818_v30 = vunpack.c.l.bf16 %v4937_v17 }
 0x1b5   : > { %v1032_v26 = vsel %vm964_vm1, %v935_v55, 0.0 }
 0x1b6   : > { %v954_v50 = vmul.f32 %v883_v61, %v818_v30  ;;  %v4981_v61 = vld [vmem:[#allocation4 + $0xb0] sm:$0x1] }
 0x1b7   : > { %2509 = vadd.xlane.f32.xlu0 %v2508_v44  ;;  %v1071_v44 = vsel %vm971_vm2, %v948_v32, 0.0 }
 0x1b8   : > { %2515 = vadd.xlane.f32.xlu1 %v2514_v45  ;;  %v955_v45 = vmul.f32 %v3910_v53, %v4924_v1  ;;  %v1089_v14 = vsel %vm971_vm2, %v954_v50, 0.0  ;;  %v2463_v50 = vmul.f32 %v2392_v6, %v810_v40  ;;  %v2404_v40 = vrot.slane %v2328_v62, %v4459_v41 }
 0x1ba   : > { %v2580_v13 = vsel %vm964_vm1, %v2463_v50, 0.0 }
 0x1bb   : > { %2578 = vadd.xlane.f32.xlu0 %v2577_v20  ;;  %v1183_v20 = vadd.s32 4294967280, %v1171_v60 }
 0x1bc   : > { %2590 = vadd.xlane.f32.xlu1 %v2589_v42  ;;  %v4955_v42 = vsub.s32 %v1176_v11, %v4443_v34 }
 0x1bd   : > { %v4968_v28 = vsub.s32 %v1183_v20, %v4443_v34 }
 0x1bf   : > { %2593 = vadd.xlane.f32.xlu0 %v2592_v25  ;;  %v3911_v25 = vunpack.c.h.bf16 %v4919_v46 }
 0x1c0   : > { %2530 = vadd.xlane.f32.xlu1 %v2529_v15  ;;  %v1092_v15 = vsel %vm964_vm1, %v955_v45, 0.0  ;;  %v2465_v45 = vmul.f32 %v2392_v6, %v812_v10 }
 0x1c1   : > { %v956_v57 = vmul.f32 %v3911_v25, %v4924_v1 }
 0x1c2   : > { %v2586_v10 = vsel %vm971_vm2, %v2465_v45, 0.0 }
 0x1c3   : > { %2527 = vadd.xlane.f32.xlu0 %v2526_v52  ;;  %v1095_v54 = vsel %vm964_vm1, %v956_v57, 0.0 }
 0x1c4   : > { %2533 = vadd.xlane.f32.xlu1 %v2532_v23 }
 0x1c7   : > { %2596 = vadd.xlane.f32.xlu0 %v2595_v36  ;;  %v936_v36 = vmul.f32 %v859_v48, %v800_v19 }
 0x1c8   : > { %2539 = vadd.xlane.f32.xlu1 %v2538_v59  ;;  %v798_v59 = vunpack.c.l.bf16 %v4935_v29 }
 0x1c9   : > { %v1035_v60 = vsel %vm971_vm2, %v936_v36, 0.0  ;;  %v2281_v36 = vcombine.high %v4671_v4, %v4671_v4  ;;  %v2473_v4 = vmul.f32 %v3911_v25, %v2404_v40 }
 0x1ca   : > { %v934_v18 = vmul.f32 %v859_v48, %v798_v59 }
 0x1cb   : > { %2536 = vadd.xlane.f32.xlu0 %v2535_v24 }
 0x1cc   : > { %2542 = vadd.xlane.f32.xlu1 %v2541_v31  ;;  %v1029_v48 = vsel %vm964_vm1, %v934_v18, 0.0 }
 0x1cf   : > { %1066 = vadd.xlane.f32.xlu0 %v1065_v27  ;;  %v2464_v27 = vmul.f32 %v2392_v6, %v811_v43 }
 0x1d0   : > { %1069 = vadd.xlane.f32.xlu1 %v1068_v16  ;;  %v821_v16 = vunpack.c.l.bf16 %v4981_v61  ;;  %v895_v61 = vrot.slane %v4627_v8, %v4459_v41 }
 0x1d2   : > { %v957_v43 = vmul.f32 %v4924_v1, %v821_v16 }
 0x1d3   : > { %1084 = vadd.xlane.f32.xlu0 %v1083_v47 }
 0x1d4   : > { %1072 = vadd.xlane.f32.xlu1 %v1071_v44  ;;  %v2583_v44 = vsel %vm964_vm1, %v2464_v27, 0.0  ;;  %v1098_v1 = vsel %vm971_vm2, %v957_v43, 0.0 }
 0x1d7   : > { %1093 = vadd.xlane.f32.xlu0 %v1092_v15 }
 0x1d8   : > { %1087 = vadd.xlane.f32.xlu1 %v1086_v7  ;;  %v967_v52 = vpop.xlane.xlu0 %966 }
 0x1d9   : > { %v2486_v23 = vpop.xlane.xlu1 %2485  ;;  %v1175_v35 = vrot.slane %v967_v52, %v4952_v51 }
 0x1da   : > { %v2692_v9 = vrot.slane %v2486_v23, %v4955_v42 }
 0x1db   : > { %1033 = vadd.xlane.f32.xlu0 %v1032_v26  ;;  %v2471_v26 = vmul.f32 %v2400_v33, %v818_v30 }
 0x1dc   : > { %1090 = vadd.xlane.f32.xlu1 %v1089_v14  ;;  %v970_v3 = vpop.xlane.xlu0 %969  ;;  %v2469_v14 = vmul.f32 %v2400_v33, %v816_v63  ;;  %v2472_v63 = vmul.f32 %v3910_v53, %v2404_v40  ;;  %v2610_v53 = vsel %vm964_vm1, %v2473_v4, 0.0  ;;  %v2474_v33 = vmul.f32 %v2404_v40, %v821_v16  ;;  %v5083_v40 = vld [vmem:[#allocation4 + $0xc8] sm:$0x1] }
 0x1dd   : > { %v2489_v24 = vpop.xlane.xlu1 %2488  ;;  %v1180_v31 = vrot.slane %v970_v3, %v4955_v42  ;;  %v2604_v30 = vsel %vm971_vm2, %v2471_v26, 0.0  ;;  %v827_v8 = vunpack.c.l.bf16 %v5083_v40 }
 0x1de   : > { %v2697_v12 = vrot.slane %v2489_v24, %v4968_v28  ;;  %v2598_v56 = vsel %vm964_vm1, %v2469_v14, 0.0  ;;  %v2613_v16 = vsel %vm971_vm2, %v2474_v33, 0.0 }
 0x1df   : > { %v1182_v37 = vsel %vm1181_vm3, %v1180_v31, %v1175_v35  ;;  %1036 = vadd.xlane.f32.xlu0 %v1035_v60  ;;  %v2376_v31 = vrot.slane %v2281_v36, %v4459_v41 }
 0x1e0   : > { %1096 = vadd.xlane.f32.xlu1 %v1095_v54  ;;  %v974_v32 = vpop.xlane.xlu0 %973 }
 0x1e1   : > { %v977_v11 = vpop.xlane.xlu1 %976  ;;  %v1187_v47 = vrot.slane %v974_v32, %v4968_v28  ;;  %v2451_v54 = vmul.f32 %v2376_v31, %v798_v59  ;;  %v2452_v27 = vmul.f32 %v2376_v31, %v799_v38  ;;  %v2607_v32 = vsel %vm964_vm1, %v2472_v63, 0.0 }
 0x1e2   : > { %v1193_v57 = vrot.slane %v977_v11, %v4952_v51  ;;  %v711_v11 = vcombine.high %v4684_v49, %v4684_v49 }
 0x1e3   : > { %v1189_v20 = vsel %vm1188_vm4, %v1187_v47, %v1182_v37  ;;  %2584 = vadd.xlane.f32.xlu0 %v2583_v44  ;;  %v5049_v37 = vld [vmem:[#allocation4 + $0xb4] sm:$0xff]   ;;  %v2544_v45 = vsel %vm964_vm1, %v2451_v54, 0.0  ;;  %v2547_v43 = vsel %vm964_vm1, %v2452_v27, 0.0  ;;  %v590_v54 = vpop.f32.mrb[8].mxu0 }
 0x1e4   : > { %1030 = vadd.xlane.f32.xlu1 %v1029_v48  ;;  %v2483_v55 = vpop.xlane.xlu0 %2482  ;;  %v822_v29 = vunpack.c.l.bf16 %v5049_v37  ;;  %v823_v38 = vunpack.c.h.bf16 %v5049_v37 }
 0x1e5   : > { %v980_v15 = vpop.xlane.xlu1 %979  ;;  %v2688_v7 = vrot.slane %v2483_v55, %v4952_v51  ;;  %v891_v55 = vrot.slane %v711_v11, %v4459_v41 }
 0x1e6   : > { %v1197_v5 = vrot.slane %v980_v15, %v4955_v42  ;;  %v5070_v15 = vld [vmem:[#allocation4 + $0xc0] sm:$0xff]  }
 0x1e7   : > { %v2693_v52 = vsel %vm1181_vm3, %v2692_v9, %v2688_v7  ;;  %2587 = vadd.xlane.f32.xlu0 %v2586_v10  ;;  %v2601_v9 = vsel %vm964_vm1, %v2470_v39, 0.0  ;;  %v773_v7 = vld [vmem:[#allocation4 + $0xbc] sm:$0x1]  ;;  %v3914_v21 = vunpack.c.l.bf16 %v5070_v15  ;;  %v3915_v26 = vunpack.c.h.bf16 %v5070_v15 }
 0x1e8   : > { %1099 = vadd.xlane.f32.xlu1 %v1098_v1  ;;  %v5015_v23 = vsel %vm1188_vm4, %v2697_v12, %v2693_v52  ;;  %v5017_v35 = vpop.xlane.xlu0 %1039  ;;  %v1198_v17 = vsel %vm1181_vm3, %v1197_v5, %v1193_v57  ;;  %v958_v52 = vmul.f32 %v891_v55, %v822_v29 }
 0x1e9   : > { %v5019_v2 = vpop.xlane.xlu1 %1042 }
 0x1ea   : > { %v1101_v14 = vsel %vm964_vm1, %v958_v52, 0.0 }
 0x1eb   : > { %2602 = vadd.xlane.f32.xlu0 %v2601_v9  ;;  %v961_v9 = vmul.f32 %v3914_v21, %v895_v61 }
 0x1ec   : > { %2581 = vadd.xlane.f32.xlu1 %v2580_v13  ;;  %v986_v6 = vpop.xlane.xlu0 %985  ;;  %v959_v13 = vmul.f32 %v891_v55, %v823_v38 }
 0x1ed   : > { %v983_v3 = vpop.xlane.xlu1 %982  ;;  %v1207_v47 = vrot.slane %v986_v6, %v4952_v51 }
 0x1ee   : > { %v1202_v24 = vrot.slane %v983_v3, %v4968_v28  ;;  %v1104_v57 = vsel %vm964_vm1, %v959_v13, 0.0  ;;  %v2330_v3 = vcombine.high %v4726_v22, %v4726_v22 }
 0x1ef   : > { %2605 = vadd.xlane.f32.xlu0 %v2604_v30 }
 0x1f0   : > { %v1203_v12 = vsel %vm1188_vm4, %v1202_v24, %v1198_v17  ;;  %2599 = vadd.xlane.f32.xlu1 %v2598_v56  ;;  %v5043_v60 = vpop.xlane.xlu0 %1045  ;;  %v1110_v17 = vsel %vm964_vm1, %v961_v9, 0.0  ;;  %v962_v56 = vmul.f32 %v3915_v26, %v895_v61  ;;  %v2408_v63 = vrot.slane %v2330_v3, %v4459_v41 }
 0x1f1   : > { %v1415_v18 = vsel %vm1414_vm5, %v1203_v12, %v1189_v20  ;;  %v989_v25 = vpop.xlane.xlu1 %988  ;;  %v2453_v20 = vmul.f32 %v2376_v31, %v800_v19  ;;  %v824_v19 = vunpack.c.l.bf16 %v773_v7  ;;  %v963_v31 = vmul.f32 %v895_v61, %v827_v8 }
 0x1f2   : > { %v1211_v46 = vrot.slane %v989_v25, %v4955_v42  ;;  %v2412_v12 = vrot.slane %v4668_v58, %v4459_v41  ;;  %v1113_v37 = vsel %vm964_vm1, %v962_v56, 0.0 }
 0x1f3   : > { %2611 = vadd.xlane.f32.xlu0 %v2610_v53  ;;  %v2550_v39 = vsel %vm971_vm2, %v2453_v20, 0.0  ;;  %v960_v6 = vmul.f32 %v891_v55, %v824_v19  ;;  %v1116_v25 = vsel %vm971_vm2, %v963_v31, 0.0  ;;  %v2475_v53 = vmul.f32 %v2408_v63, %v822_v29 }
 0x1f4   : > { %2608 = vadd.xlane.f32.xlu1 %v2607_v32  ;;  %v992_v48 = vpop.xlane.xlu0 %991  ;;  %v1212_v49 = vsel %vm1181_vm3, %v1211_v46, %v1207_v47  ;;  %v2476_v46 = vmul.f32 %v2408_v63, %v823_v38  ;;  %v592_v32 = vpop.f32.mrb[9].mxu0  ;;  %v2479_v13 = vmul.f32 %v3915_v26, %v2412_v12  ;;  %v2480_v40 = vmul.f32 %v2412_v12, %v827_v8 }
 0x1f5   : > { %v5057_v59 = vpop.xlane.xlu1 %1003  ;;  %v1216_v44 = vrot.slane %v992_v48, %v4968_v28  ;;  %v1107_v30 = vsel %vm971_vm2, %v960_v6, 0.0  ;;  %v594_v11 = vpop.f32.mrb[10].mxu0  ;;  %v2616_v29 = vsel %vm964_vm1, %v2475_v53, 0.0 }
 0x1f6   : > { %v596_v33 = vpop.f32.mrb[11].mxu0  ;;  %v2619_v55 = vsel %vm964_vm1, %v2476_v46, 0.0  ;;  %v2631_v56 = vsel %vm971_vm2, %v2480_v40, 0.0 }
 0x1f7   : > { %v1217_v50 = vsel %vm1188_vm4, %v1216_v44, %v1212_v49  ;;  %2545 = vadd.xlane.f32.xlu0 %v2544_v45  ;;  %v2478_v44 = vmul.f32 %v3914_v21, %v2412_v12  ;;  %v1535_v45 = vpack.c.bf16 %v594_v11, %v590_v54  ;;  %v2477_v49 = vmul.f32 %v2408_v63, %v824_v19  ;;  %v600_v7 = vpop.f32.mrb[12].mxu0 }
 0x1f8   : > { %2548 = vadd.xlane.f32.xlu1 %v2547_v43  ;;  %v5074_v62 = vsel %vm1416_vm6, %v1217_v50, %v1415_v18  ;;  %v5076_v10 = vpop.xlane.xlu0 %1006  ;;  %v5112_v38 = vpack.c.bf16 %v596_v33, %v592_v32  ;;  %v1536_v19 = vpack.c.bf16 %v600_v7, %v600_v7  ;;  %v602_v9 = vpop.f32.mrb[13].mxu0 }
 0x1f9   : > { %v2495_v1 = vpop.xlane.xlu1 %2494  ;;  %3998 = vmatprep.subr.bf16.mxu1 %v1535_v45  ;;  %v2625_v21 = vsel %vm964_vm1, %v2478_v44, 0.0  ;;  %v3036_v6 = vpack.c.bf16 %v602_v9, %v602_v9  ;;  %v604_v3 = vpop.f32.mrb[14].mxu0  ;;  %v1239_v46 = vrot.slane %v5076_v10, %v4955_v42 }
 0x1fa   : > { %v2706_v47 = vrot.slane %v2495_v1, %v4955_v42  ;;  %3999 = vmatpush3.bf16.msra.mxu1 %v1535_v45 }
 0x1fb   : > { %2614 = vadd.xlane.f32.xlu0 %v2613_v16  ;;  %v2174_v16 = vsel %vm2172_vm7, 65535, %v4261_v0  ;;  %v605_v0 = vpop.f32.mrb[15].mxu0 }
 0x1fc   : > { %2551 = vadd.xlane.f32.xlu1 %v2550_v39  ;;  %v5085_v36 = vpop.xlane.xlu0 %1009  ;;  %v5131_v8 = vand.u32 %v3036_v6, %v2174_v16 }
 0x1fd   : > { %v5087_v5 = vpop.xlane.xlu1 %2557  ;;  %v1244_v11 = vrot.slane %v5085_v36, %v4968_v28 }
 0x1ff   : > { %1102 = vadd.xlane.f32.xlu0 %v1101_v14 }
 0x200   : > { %1105 = vadd.xlane.f32.xlu1 %v1104_v57  ;;  %v2492_v24 = vpop.xlane.xlu0 %2491  ;;  %v2176_v57 = vand.u32 %v2174_v16, %v1536_v19 }
 0x201   : > { %v2501_v4 = vpop.xlane.xlu1 %2500  ;;  %v2702_v27 = vrot.slane %v2492_v24, %v4952_v51 }
 0x202   : > { %v2716_v39 = vrot.slane %v2501_v4, %v4952_v51  ;;  %4000 = vmatprep.subr.bf16.mxu1 %v2176_v57 }
 0x203   : > { %1111 = vadd.xlane.f32.xlu0 %v1110_v17  ;;  %v2707_v20 = vsel %vm1181_vm3, %v2706_v47, %v2702_v27  ;;  %4001 = vmatpush3.bf16.msra.mxu1 %v2176_v57 }
 0x204   : > { %1108 = vadd.xlane.f32.xlu1 %v1107_v30  ;;  %v5100_v18 = vpop.xlane.xlu0 %2554  ;;  %v2628_v30 = vsel %vm964_vm1, %v2479_v13, 0.0  ;;  %4014 = vmatprep.subr.bf16.mxu1 %v5112_v38 }
 0x205   : > { %v5102_v22 = vpop.xlane.xlu1 %2560 }
 0x207   : > { %1117 = vadd.xlane.f32.xlu0 %v1116_v25 }
 0x208   : > { %1114 = vadd.xlane.f32.xlu1 %v1113_v37  ;;  %v2498_v58 = vpop.xlane.xlu0 %2497 }
 0x209   : > { %v2507_v48 = vpop.xlane.xlu1 %2506  ;;  %v2711_v43 = vrot.slane %v2498_v58, %v4968_v28 }
 0x20a   : > { %v2725_v14 = vrot.slane %v2507_v48, %v4968_v28  ;;  %v1235_v48 = vrot.slane %v5057_v59, %v4952_v51 }
 0x20b   : > { %v2712_v15 = vsel %vm1188_vm4, %v2711_v43, %v2707_v20  ;;  %2620 = vadd.xlane.f32.xlu0 %v2619_v55 }
 0x20c   : > { %2617 = vadd.xlane.f32.xlu1 %v2616_v29  ;;  %v2923_v50 = vsel %vm1414_vm5, %v2712_v15, %v5015_v23  ;;  %v2504_v1 = vpop.xlane.xlu0 %2503  ;;  %v2622_v23 = vsel %vm971_vm2, %v2477_v49, 0.0  ;;  %v1240_v10 = vsel %vm1181_vm3, %v1239_v46, %v1235_v48 }
 0x20d   : > { %v5117_v61 = vpop.xlane.xlu1 %2521  ;;  %v2720_v52 = vrot.slane %v2504_v1, %v4955_v42  ;;  %v1245_v33 = vsel %vm1188_vm4, %v1244_v11, %v1240_v10 }
 0x20f   : > { %v2721_v24 = vsel %vm1181_vm3, %v2720_v52, %v2716_v39  ;;  %2623 = vadd.xlane.f32.xlu0 %v2622_v23 }
 0x210   : > { %2626 = vadd.xlane.f32.xlu1 %v2625_v21  ;;  %v2726_v31 = vsel %vm1188_vm4, %v2725_v14, %v2721_v24  ;;  %v5127_v4 = vpop.xlane.xlu0 %2518 }
 0x211   : > { %v5129_v17 = vpop.xlane.xlu1 %2524  ;;  %v5134_v26 = vsel %vm1416_vm6, %v2726_v31, %v2923_v50 }
 0x213   : > { %2629 = vadd.xlane.f32.xlu0 %v2628_v30 }
 0x214   : > { %2632 = vadd.xlane.f32.xlu1 %v2631_v56  ;;  %v5139_v63 = vpop.xlane.xlu0 %1048 }
 0x215   : > { %v5141_v12 = vpop.xlane.xlu1 %1051 }
 0x218   : > { %v5143_v25 = vpop.xlane.xlu0 %1057 }
 0x219   : > { %v5145_v54 = vpop.xlane.xlu1 %1054 }
 0x21c   : > { %v998_v27 = vpop.xlane.xlu0 %997 }
 0x21d   : > { %v5147_v37 = vpop.xlane.xlu1 %1060  ;;  %v1225_v47 = vrot.slane %v998_v27, %v4955_v42 }
 0x220   : > { %v1001_v53 = vpop.xlane.xlu0 %1000 }
 0x221   : > { %v995_v32 = vpop.xlane.xlu1 %994  ;;  %v1230_v44 = vrot.slane %v1001_v53, %v4968_v28  ;;  %v2744_v53 = vrot.slane %v5127_v4, %v4952_v51 }
 0x222   : > { %v1221_v58 = vrot.slane %v995_v32, %v4952_v51 }
 0x224   : > { %v1226_v45 = vsel %vm1181_vm3, %v1225_v47, %v1221_v58  ;;  %v5161_v49 = vpop.xlane.xlu0 %1075  ;;  %v2748_v58 = vrot.slane %v5117_v61, %v4955_v42 }
 0x225   : > { %v1231_v43 = vsel %vm1188_vm4, %v1230_v44, %v1226_v45  ;;  %v5163_v36 = vpop.xlane.xlu1 %1063  ;;  %v2753_v45 = vrot.slane %v5129_v17, %v4968_v28 }
 0x226   : > { %v1419_v20 = vsel %vm1418_vm8, %v1231_v43, %v5074_v62 }
 0x227   : > { %v1421_v59 = vsel %vm1420_vm9, %v1245_v33, %v1419_v20 }
 0x228   : > { %v1016_v55 = vpop.xlane.xlu0 %1015 }
 0x229   : > { %v5169_v29 = vpop.xlane.xlu1 %1078  ;;  %v1253_v50 = vrot.slane %v1016_v55, %v4955_v42 }
 0x22c   : > { %v1019_v15 = vpop.xlane.xlu0 %1018 }
 0x22d   : > { %v1013_v7 = vpop.xlane.xlu1 %1012  ;;  %v1258_v21 = vrot.slane %v1019_v15, %v4968_v28 }
 0x22e   : > { %v1249_v1 = vrot.slane %v1013_v7, %v4952_v51 }
 0x230   : > { %v1254_v19 = vsel %vm1181_vm3, %v1253_v50, %v1249_v1  ;;  %v1025_v16 = vpop.xlane.xlu0 %1024 }
 0x231   : > { %v5175_v39 = vpop.xlane.xlu1 %1081  ;;  %v1259_v62 = vsel %vm1188_vm4, %v1258_v21, %v1254_v19  ;;  %v1267_v9 = vrot.slane %v1025_v16, %v4955_v42 }
 0x232   : > { %v1423_v52 = vsel %vm1422_vm10, %v1259_v62, %v1421_v59  ;;  %v2749_v59 = vsel %vm1181_vm3, %v2748_v58, %v2744_v53 }
 0x233   : > { %v2754_v1 = vsel %vm1188_vm4, %v2753_v45, %v2749_v59 }
 0x234   : > { %v1028_v13 = vpop.xlane.xlu0 %1027 }
 0x235   : > { %v1022_v40 = vpop.xlane.xlu1 %1021  ;;  %v1272_v23 = vrot.slane %v1028_v13, %v4968_v28 }
 0x236   : > { %v1263_v14 = vrot.slane %v1022_v40, %v4952_v51  ;;  %v5197_v46 = vpop.f32.mrb[8].mxu1 }
 0x237   : > { %v5201_v32 = vpop.f32.mrb[9].mxu1 }
 0x238   : > { %v1268_v57 = vsel %vm1181_vm3, %v1267_v9, %v1263_v14  ;;  %v5183_v6 = vpop.xlane.xlu0 %2563  ;;  %v5203_v11 = vpop.f32.mrb[16].mxu0 }
 0x239   : > { %v5185_v3 = vpop.xlane.xlu1 %2566  ;;  %v1273_v24 = vsel %vm1188_vm4, %v1272_v23, %v1268_v57  ;;  %v3997_v47 = vpop.f32.mrb[10].mxu1 }
 0x23a   : > { %v5189_v0 = vsel %vm1424_vm11, %v1273_v24, %v1423_v52  ;;  %v5212_v4 = vpop.f32.mrb[17].mxu0  ;;  %v5214_v20 = vpop.f32.mrb[11].mxu1 }
 0x23b   : > { %v4013_v55 = vpop.f32.mrb[18].mxu0 }
 0x23c   : > { %v5191_v31 = vpop.xlane.xlu0 %2569  ;;  %v5218_v15 = vpop.f32.mrb[19].mxu0 }
 0x23d   : > { %v5193_v30 = vpop.xlane.xlu1 %2572 }
 0x240   : > { %v5195_v56 = vpop.xlane.xlu0 %2575 }
 0x241   : > { %v2513_v27 = vpop.xlane.xlu1 %2512 }
 0x242   : > { %v2734_v10 = vrot.slane %v2513_v27, %v4955_v42 }
 0x244   : > { %v2510_v48 = vpop.xlane.xlu0 %2509 }
 0x245   : > { %v2516_v44 = vpop.xlane.xlu1 %2515  ;;  %v2730_v43 = vrot.slane %v2510_v48, %v4952_v51 }
 0x246   : > { %v2739_v33 = vrot.slane %v2516_v44, %v4968_v28 }
 0x247   : > { %v2735_v61 = vsel %vm1181_vm3, %v2734_v10, %v2730_v43 }
 0x248   : > { %v2740_v7 = vsel %vm1188_vm4, %v2739_v33, %v2735_v61  ;;  %v5221_v17 = vpop.xlane.xlu0 %2578 }
 0x249   : > { %v5223_v50 = vpop.xlane.xlu1 %2590  ;;  %v2925_v21 = vsel %vm1418_vm8, %v2740_v7, %v5134_v26 }
 0x24a   : > { %v2926_v19 = vsel %vm1420_vm9, %v2754_v1, %v2925_v21 }
 0x24c   : > { %v5229_v16 = vpop.xlane.xlu0 %2593 }
 0x24d   : > { %v2531_v62 = vpop.xlane.xlu1 %2530 }
 0x24e   : > { %v2762_v40 = vrot.slane %v2531_v62, %v4955_v42 }
 0x250   : > { %v2528_v52 = vpop.xlane.xlu0 %2527 }
 0x251   : > { %v2534_v13 = vpop.xlane.xlu1 %2533  ;;  %v2758_v9 = vrot.slane %v2528_v52, %v4952_v51 }
 0x252   : > { %v2767_v14 = vrot.slane %v2534_v13, %v4968_v28 }
 0x253   : > { %v2763_v23 = vsel %vm1181_vm3, %v2762_v40, %v2758_v9 }
 0x254   : > { %v2768_v57 = vsel %vm1188_vm4, %v2767_v14, %v2763_v23  ;;  %v5236_v24 = vpop.xlane.xlu0 %2596 }
 0x255   : > { %v2540_v26 = vpop.xlane.xlu1 %2539  ;;  %v2927_v27 = vsel %vm1422_vm10, %v2768_v57, %v2926_v19 }
 0x256   : > { %v2776_v58 = vrot.slane %v2540_v26, %v4955_v42 }
 0x258   : > { %v2537_v53 = vpop.xlane.xlu0 %2536 }
 0x259   : > { %v2543_v47 = vpop.xlane.xlu1 %2542  ;;  %v2772_v48 = vrot.slane %v2537_v53, %v4952_v51 }
 0x25a   : > { %v2781_v44 = vrot.slane %v2543_v47, %v4968_v28 }
 0x25b   : > { %v2777_v45 = vsel %vm1181_vm3, %v2776_v58, %v2772_v48 }
 0x25c   : > { %v5243_v10 = vpop.xlane.xlu0 %1066  ;;  %v2782_v33 = vsel %vm1188_vm4, %v2781_v44, %v2777_v45 }
 0x25d   : > { %v5245_v43 = vpop.xlane.xlu1 %1069  ;;  %v5249_v59 = vsel %vm1424_vm11, %v2782_v33, %v2927_v27 }
 0x260   : > { %v5251_v55 = vpop.xlane.xlu0 %1084 }
 0x261   : > { %v5253_v61 = vpop.xlane.xlu1 %1072 }
 0x264   : > { %v5255_v7 = vpop.xlane.xlu0 %1093 }
 0x265   : > { %v5257_v1 = vpop.xlane.xlu1 %1087 }
 0x268   : > { %v1034_v21 = vpop.xlane.xlu0 %1033 }
 0x269   : > { %v5259_v19 = vpop.xlane.xlu1 %1090  ;;  %v1281_v9 = vrot.slane %v1034_v21, %v4955_v42 }
 0x26c   : > { %v1037_v62 = vpop.xlane.xlu0 %1036 }
 0x26d   : > { %v5261_v52 = vpop.xlane.xlu1 %1096  ;;  %v1286_v23 = vrot.slane %v1037_v62, %v4968_v28  ;;  %v1305_v62 = vrot.slane %v5139_v63, %v4952_v51  ;;  %v1328_v63 = vrot.slane %v5163_v36, %v4968_v28  ;;  %v2804_v36 = vrot.slane %v5087_v5, %v4955_v42 }
 0x26e   : > { %v2809_v5 = vrot.slane %v5102_v22, %v4968_v28  ;;  %v1351_v22 = vrot.slane %v5169_v29, %v4955_v42  ;;  %v1370_v29 = vrot.slane %v5259_v19, %v4968_v28 }
 0x270   : > { %v5263_v13 = vpop.xlane.xlu0 %2584 }
 0x271   : > { %v1031_v40 = vpop.xlane.xlu1 %1030 }
 0x272   : > { %v1277_v14 = vrot.slane %v1031_v40, %v4952_v51 }
 0x274   : > { %v1282_v57 = vsel %vm1181_vm3, %v1281_v9, %v1277_v14  ;;  %v5269_v26 = vpop.xlane.xlu0 %2587  ;;  %v1291_v14 = vrot.slane %v5017_v35, %v4952_v51 }
 0x275   : > { %v5271_v27 = vpop.xlane.xlu1 %1099  ;;  %v1287_v53 = vsel %vm1188_vm4, %v1286_v23, %v1282_v57  ;;  %v1295_v23 = vrot.slane %v5019_v2, %v4955_v42  ;;  %v1314_v57 = vrot.slane %v5145_v54, %v4968_v28 }
 0x276   : > { %v1427_v47 = vsel %vm1426_vm12, %v1287_v53, %v5189_v0  ;;  %v1309_v0 = vrot.slane %v5141_v12, %v4955_v42  ;;  %v1319_v12 = vrot.slane %v5143_v25, %v4952_v51  ;;  %v2800_v53 = vrot.slane %v5100_v18, %v4952_v51 }
 0x277   : > { %v5277_v58 = vadd.f32 %v5201_v32, %v1427_v47  ;;  %v1323_v32 = vrot.slane %v5147_v37, %v4955_v42  ;;  %v1300_v37 = vrot.slane %v5043_v60, %v4968_v28  ;;  %v1296_v54 = vsel %vm1181_vm3, %v1295_v23, %v1291_v14 }
 0x278   : > { %v5279_v48 = vpop.xlane.xlu0 %2602  ;;  %v1310_v35 = vsel %vm1181_vm3, %v1309_v0, %v1305_v62  ;;  %v1333_v60 = vrot.slane %v5243_v10, %v4952_v51  ;;  %v1337_v18 = vrot.slane %v5245_v43, %v4955_v42  ;;  %v2805_v14 = vsel %vm1181_vm3, %v2804_v36, %v2800_v53 }
 0x279   : > { %v5281_v44 = vpop.xlane.xlu1 %2581  ;;  %v1499_v45 = vsel %vm1498_vm13, %v5277_v58, -inf  ;;  %v1324_v47 = vsel %vm1181_vm3, %v1323_v32, %v1319_v12  ;;  %v1315_v41 = vsel %vm1188_vm4, %v1314_v57, %v1310_v35  ;;  %v1301_v32 = vsel %vm1188_vm4, %v1300_v37, %v1296_v54 }
 0x27a   : > { %1500 = vmax.xlane.f32.xlu0 %v1499_v45  ;;  %v1329_v25 = vsel %vm1188_vm4, %v1328_v63, %v1324_v47  ;;  %v1342_v23 = vrot.slane %v5253_v61, %v4968_v28  ;;  %v1428_v57 = vsel %vm1414_vm5, %v1315_v41, %v1301_v32  ;;  %v1347_v10 = vrot.slane %v5161_v49, %v4952_v51 }
 0x27b   : > { %v2814_v43 = vrot.slane %v5183_v6, %v4952_v51  ;;  %v2818_v63 = vrot.slane %v5185_v3, %v4955_v42  ;;  %v1429_v53 = vsel %vm1416_vm6, %v1329_v25, %v1428_v57  ;;  %v2823_v41 = vrot.slane %v5191_v31, %v4968_v28 }
 0x27c   : > { %v5285_v33 = vpop.xlane.xlu0 %2605  ;;  %v1356_v49 = vrot.slane %v5175_v39, %v4968_v28  ;;  %v1338_v6 = vsel %vm1181_vm3, %v1337_v18, %v1333_v60  ;;  %v1365_v3 = vrot.slane %v5257_v1, %v4955_v42  ;;  %v1379_v31 = vrot.slane %v5261_v52, %v4955_v42 }
 0x27d   : > { %v5287_v21 = vpop.xlane.xlu1 %2599  ;;  %v1343_v47 = vsel %vm1188_vm4, %v1342_v23, %v1338_v6  ;;  %v1361_v39 = vrot.slane %v5251_v55, %v4952_v51  ;;  %v1384_v1 = vrot.slane %v5271_v27, %v4968_v28  ;;  %v1352_v19 = vsel %vm1181_vm3, %v1351_v22, %v1347_v10 }
 0x27e   : > { %v1375_v52 = vrot.slane %v5255_v7, %v4952_v51  ;;  %v1430_v55 = vsel %vm1418_vm8, %v1343_v47, %v1429_v53  ;;  %v2842_v7 = vrot.slane %v5281_v44, %v4952_v51  ;;  %v1357_v57 = vsel %vm1188_vm4, %v1356_v49, %v1352_v19 }
 0x27f   : > { %v2828_v10 = vrot.slane %v5193_v30, %v4952_v51  ;;  %v2846_v53 = vrot.slane %v5263_v13, %v4955_v42  ;;  %v1431_v44 = vsel %vm1420_vm9, %v1357_v57, %v1430_v55  ;;  %v2856_v13 = vrot.slane %v5223_v50, %v4952_v51 }
 0x280   : > { %v5295_v40 = vpop.xlane.xlu0 %2611  ;;  %v1380_v23 = vsel %vm1181_vm3, %v1379_v31, %v1375_v52  ;;  %v2851_v6 = vrot.slane %v5269_v26, %v4968_v28  ;;  %v2860_v50 = vrot.slane %v5229_v16, %v4955_v42  ;;  %v2874_v26 = vrot.slane %v5279_v48, %v4955_v42 }
 0x281   : > { %v5297_v9 = vpop.xlane.xlu1 %2608  ;;  %v2865_v16 = vrot.slane %v5236_v24, %v4968_v28 }
 0x284   : > { %v2546_v2 = vpop.xlane.xlu0 %2545 }
 0x285   : > { %v2549_v45 = vpop.xlane.xlu1 %2548  ;;  %v2786_v62 = vrot.slane %v2546_v2, %v4952_v51 }
 0x286   : > { %v2790_v0 = vrot.slane %v2549_v45, %v4955_v42  ;;  %v2819_v45 = vsel %vm1181_vm3, %v2818_v63, %v2814_v43 }
 0x287   : > { %v2824_v60 = vsel %vm1188_vm4, %v2823_v41, %v2819_v45 }
 0x288   : > { %v5339_v12 = vpop.xlane.xlu0 %2614  ;;  %v2791_v35 = vsel %vm1181_vm3, %v2790_v0, %v2786_v62  ;;  %v1366_v62 = vsel %vm1181_vm3, %v1365_v3, %v1361_v39  ;;  %v2870_v3 = vrot.slane %v5287_v21, %v4952_v51 }
 0x289   : > { %v2552_v37 = vpop.xlane.xlu1 %2551  ;;  %v1371_v32 = vsel %vm1188_vm4, %v1370_v29, %v1366_v62  ;;  %v2893_v48 = vrot.slane %v5339_v12, %v4968_v28 }
 0x28a   : > { %v2795_v61 = vrot.slane %v2552_v37, %v4968_v28  ;;  %v1385_v37 = vsel %vm1188_vm4, %v1384_v1, %v1380_v23  ;;  %v1432_v30 = vsel %vm1422_vm10, %v1371_v32, %v1431_v44  ;;  %v2875_v19 = vsel %vm1181_vm3, %v2874_v26, %v2870_v3 }
 0x28b   : > { %v1433_v49 = vsel %vm1424_vm11, %v1385_v37, %v1432_v30 }
 0x28c   : > { %v2796_v2 = vsel %vm1188_vm4, %v2795_v61, %v2791_v35  ;;  %v1103_v54 = vpop.xlane.xlu0 %1102  ;;  %v2847_v61 = vsel %vm1181_vm3, %v2846_v53, %v2842_v7 }
 0x28d   : > { %v1106_v36 = vpop.xlane.xlu1 %1105  ;;  %v2929_v25 = vsel %vm1426_vm12, %v2796_v2, %v5249_v59  ;;  %v1389_v27 = vrot.slane %v1103_v54, %v4952_v51  ;;  %v2832_v59 = vrot.slane %v5195_v56, %v4955_v42  ;;  %v2837_v56 = vrot.slane %v5221_v17, %v4968_v28 }
 0x28e   : > { %v5371_v18 = vadd.f32 %v5212_v4, %v2929_v25  ;;  %v1393_v0 = vrot.slane %v1106_v36, %v4955_v42  ;;  %v2810_v4 = vsel %vm1188_vm4, %v2809_v5, %v2805_v14  ;;  %v2852_v21 = vsel %vm1188_vm4, %v2851_v6, %v2847_v61 }
 0x28f   : > { %v2930_v14 = vsel %vm1414_vm5, %v2824_v60, %v2810_v4  ;;  %v2833_v41 = vsel %vm1181_vm3, %v2832_v59, %v2828_v10  ;;  %v2888_v54 = vrot.slane %v5295_v40, %v4955_v42  ;;  %v2884_v36 = vrot.slane %v5297_v9, %v4952_v51 }
 0x290   : > { %v1112_v43 = vpop.xlane.xlu0 %1111  ;;  %v1394_v5 = vsel %vm1181_vm3, %v1393_v0, %v1389_v27  ;;  %v2838_v31 = vsel %vm1188_vm4, %v2837_v56, %v2833_v41  ;;  %v2879_v9 = vrot.slane %v5285_v33, %v4968_v28  ;;  %v2861_v27 = vsel %vm1181_vm3, %v2860_v50, %v2856_v13 }
 0x291   : > { %v1109_v63 = vpop.xlane.xlu1 %1108  ;;  %v1403_v2 = vrot.slane %v1112_v43, %v4952_v51  ;;  %v2931_v55 = vsel %vm1416_vm6, %v2838_v31, %v2930_v14  ;;  %v2889_v32 = vsel %vm1181_vm3, %v2888_v54, %v2884_v36  ;;  %v3000_v7 = vsel %vm1498_vm13, %v5371_v18, -inf }
 0x292   : > { %v1398_v22 = vrot.slane %v1109_v63, %v4968_v28  ;;  %v2932_v24 = vsel %vm1418_vm8, %v2852_v21, %v2931_v55  ;;  %v2880_v59 = vsel %vm1188_vm4, %v2879_v9, %v2875_v19  ;;  %v2866_v33 = vsel %vm1188_vm4, %v2865_v16, %v2861_v27 }
 0x293   : > { %v2933_v43 = vsel %vm1420_vm9, %v2866_v33, %v2932_v24  ;;  %v5470_v24 = vsub.s32 4, %v4443_v34 }
 0x294   : > { %v1399_v17 = vsel %vm1188_vm4, %v1398_v22, %v1394_v5  ;;  %v1118_v35 = vpop.xlane.xlu0 %1117  ;;  %v2934_v37 = vsel %vm1422_vm10, %v2880_v59, %v2933_v43  ;;  %v5479_v59 = vsub.s32 7, %v4443_v34 }
 0x295   : > { %v1115_v47 = vpop.xlane.xlu1 %1114  ;;  %v1434_v29 = vsel %vm1426_vm12, %v1399_v17, %v1433_v49  ;;  %v1412_v1 = vrot.slane %v1118_v35, %v4968_v28 }
 0x296   : > { %v1407_v45 = vrot.slane %v1115_v47, %v4955_v42  ;;  %v1488_v39 = vadd.f32 %v5214_v20, %v1434_v29 }
 0x298   : > { %v1408_v25 = vsel %vm1181_vm3, %v1407_v45, %v1403_v2  ;;  %v1502_v20 = vsel %vm1498_vm13, %v1488_v39, -inf  ;;  %v2621_v60 = vpop.xlane.xlu0 %2620 }
 0x299   : > { %v2618_v52 = vpop.xlane.xlu1 %2617  ;;  %1503 = vmax.xlane.f32.xlu1 %v1502_v20  ;;  %v1413_v40 = vsel %vm1188_vm4, %v1412_v1, %v1408_v25  ;;  %v2902_v0 = vrot.slane %v2621_v60, %v4955_v42 }
 0x29a   : > { %v1493_v62 = vadd.f32 %v5197_v46, %v1413_v40  ;;  %v2898_v12 = vrot.slane %v2618_v52, %v4952_v51  ;;  %v2894_v46 = vsel %vm1188_vm4, %v2893_v48, %v2889_v32 }
 0x29b   : > { %v2935_v53 = vsel %vm1424_vm11, %v2894_v46, %v2934_v37 }
 0x29c   : > { %v1506_v23 = vsel %vm1505_vm14, %v1493_v62, -inf  ;;  %v2624_v4 = vpop.xlane.xlu0 %2623  ;;  %v2903_v63 = vsel %vm1181_vm3, %v2902_v0, %v2898_v12  ;;  %v5473_v0 = vsub.s32 5, %v4443_v34  ;;  %v5476_v12 = vsub.s32 6, %v4443_v34 }
 0x29d   : > { %1507 = vmax.xlane.f32.xlu0 %v1506_v23  ;;  %v2627_v57 = vpop.xlane.xlu1 %2626  ;;  %3001 = vmax.xlane.f32.xlu1 %v3000_v7  ;;  %v2907_v10 = vrot.slane %v2624_v4, %v4968_v28 }
 0x29e   : > { %v2912_v5 = vrot.slane %v2627_v57, %v4952_v51 }
 0x29f   : > { %v2908_v56 = vsel %vm1188_vm4, %v2907_v10, %v2903_v63 }
 0x2a0   : > { %v2630_v22 = vpop.xlane.xlu0 %2629  ;;  %v2936_v14 = vsel %vm1426_vm12, %v2908_v56, %v2935_v53  ;;  %v1554_v56 = vsub.s32 1, %v4443_v34  ;;  %v1569_v53 = vsub.s32 2, %v4443_v34 }
 0x2a1   : > { %v2633_v44 = vpop.xlane.xlu1 %2632  ;;  %v2916_v30 = vrot.slane %v2630_v22, %v4955_v42  ;;  %v2990_v61 = vadd.f32 %v5218_v15, %v2936_v14  ;;  %v5504_v22 = vsub.s32 3, %v4443_v34 }
 0x2a2   : > { %v2921_v41 = vrot.slane %v2633_v44, %v4968_v28 }
 0x2a3   : > { %v2917_v17 = vsel %vm1181_vm3, %v2916_v30, %v2912_v5  ;;  %v3003_v49 = vsel %vm1498_vm13, %v2990_v61, -inf }
 0x2a4   : > { %3004 = vmax.xlane.f32.xlu0 %v3003_v49  ;;  %v2922_v13 = vsel %vm1188_vm4, %v2921_v41, %v2917_v17 }
 0x2a5   : > { %v2995_v6 = vadd.f32 %v5203_v11, %v2922_v13 }
 0x2a7   : > { %v3006_v3 = vsel %vm1505_vm14, %v2995_v6, -inf }
 0x2a8   : > { %3007 = vmax.xlane.f32.xlu1 %v3006_v3 }
 0x307   : > { %v1501_v35 = vpop.xlane.xlu0 %1500 }
 0x308   : > { %v1509_v51 = vsub.f32 %v5277_v58, %v1501_v35 }
 0x30a   : > { %v1512_v42 = vmul.f32 1.442695, %v1509_v51 }
 0x30c   : > { %4130 = vpow2.f32 %v1512_v42 }
 0x316   : > { %v4131_v28 = vpop.eup %4130 }
 0x317   : > { %v1518_v15 = vsel %vm1498_vm13, %v4131_v28, 0.0 }
 0x318   : > { %1519 = vadd.xlane.f32.xlu0 %v1518_v15 }
 0x326   : > { %v1504_v47 = vpop.xlane.xlu1 %1503 }
 0x327   : > { %v1510_v29 = vsub.f32 %v1488_v39, %v1504_v47 }
 0x329   : > { %v1514_v31 = vmul.f32 1.442695, %v1510_v29 }
 0x32a   : > { %v1508_v2 = vpop.xlane.xlu0 %1507  ;;  %v3002_v45 = vpop.xlane.xlu1 %3001 }
 0x32b   : > { %4132 = vpow2.f32 %v1514_v31  ;;  %v1511_v50 = vsub.f32 %v1493_v62, %v1508_v2  ;;  %v3009_v11 = vsub.f32 %v5371_v18, %v3002_v45 }
 0x32d   : > { %v1516_v26 = vmul.f32 1.442695, %v1511_v50  ;;  %v3012_v21 = vmul.f32 1.442695, %v3009_v11 }
 0x32f   : > { %4134 = vpow2.f32 %v1516_v26  ;;  %v6256_v26 = vld [vmem:[#allocation9_spill] sm:$0xff] }
 0x330   : > { %4136 = vpow2.f32 %v3012_v21 }
 0x331   : > { %v3005_v58 = vpop.xlane.xlu0 %3004 }
 0x332   : > { %v3010_v1 = vsub.f32 %v2990_v61, %v3005_v58 }
 0x334   : > { %v3014_v36 = vmul.f32 1.442695, %v3010_v1 }
 0x335   : > { %v4133_v54 = vpop.eup %4132  ;;  %v3008_v25 = vpop.xlane.xlu1 %3007 }
 0x336   : > { %v1521_v20 = vsel %vm1498_vm13, %v4133_v54, 0.0  ;;  %4138 = vpow2.f32 %v3014_v36  ;;  %v3011_v39 = vsub.f32 %v2995_v6, %v3008_v25 }
 0x337   : > { %1522 = vadd.xlane.f32.xlu1 %v1521_v20 }
 0x338   : > { %v3016_v19 = vmul.f32 1.442695, %v3011_v39 }
 0x339   : > { %v4135_v16 = vpop.eup %4134 }
 0x33a   : > { %v4137_v48 = vpop.eup %4136  ;;  %v1524_v60 = vsel %vm1505_vm14, %v4135_v16, 0.0  ;;  %4140 = vpow2.f32 %v3016_v19 }
 0x33b   : > { %1525 = vadd.xlane.f32.xlu0 %v1524_v60  ;;  %v3018_v18 = vsel %vm1498_vm13, %v4137_v48, 0.0 }
 0x33c   : > { %3019 = vadd.xlane.f32.xlu1 %v3018_v18 }
 0x340   : > { %v4139_v52 = vpop.eup %4138 }
 0x341   : > { %v3021_v40 = vsel %vm1498_vm13, %v4139_v52, 0.0 }
 0x342   : > { %3022 = vadd.xlane.f32.xlu0 %v3021_v40 }
 0x344   : > { %v4141_v55 = vpop.eup %4140 }
 0x345   : > { %v3024_v9 = vsel %vm1505_vm14, %v4141_v55, 0.0 }
 0x346   : > { %3025 = vadd.xlane.f32.xlu1 %v3024_v9 }
 0x3a5   : > { %v1520_v62 = vpop.xlane.xlu0 %1519 }
 0x3a6   : > { %4142 = vrcp.f32 %v1520_v62 }
 0x3b0   : > { %v4143_v27 = vpop.eup %4142 }
 0x3b1   : > { %v5481_v32 = vmul.f32 %v4143_v27, %v4131_v28  ;;  %v5614_v27 = vld [vmem:[#allocation6] sm:$0xff]  }
 0x3b3   : > { %v5485_v23 = vrot.slane %v5481_v32, %v5470_v24  ;;  %v5489_v7 = vrot.slane %v5481_v32, %v5473_v0  ;;  %v5493_v33 = vrot.slane %v5481_v32, %v5476_v12  ;;  %v5497_v46 = vrot.slane %v5481_v32, %v5479_v59 }
 0x3b4   : > { %v1540_v1 = vrot.slane %v5481_v32, %v6256_v26  ;;  %v1570_v36 = vrot.slane %v5481_v32, %v1569_v53  ;;  %v5581_v25 = vrot.slane %v5481_v32, %v5504_v22 }
 0x3c4   : > { %v1523_v4 = vpop.xlane.xlu1 %1522 }
 0x3c5   : > { %4144 = vrcp.f32 %v1523_v4 }
 0x3c8   : > { %v1526_v57 = vpop.xlane.xlu0 %1525 }
 0x3c9   : > { %4146 = vrcp.f32 %v1526_v57  ;;  %v3020_v10 = vpop.xlane.xlu1 %3019 }
 0x3ca   : > { %4148 = vrcp.f32 %v3020_v10 }
 0x3cf   : > { %v4145_v43 = vpop.eup %4144  ;;  %v3023_v37 = vpop.xlane.xlu0 %3022 }
 0x3d0   : > { %v5499_v63 = vmul.f32 %v4145_v43, %v4133_v54  ;;  %4150 = vrcp.f32 %v3023_v37  ;;  %v1555_v54 = vrot.slane %v5481_v32, %v1554_v56 }
 0x3d2   : > { %v1533_v44 = vpack.c.bf16 %v5499_v63, %v5481_v32  ;;  %v5509_v14 = vrot.slane %v5499_v63, %v1554_v56  ;;  %v5512_v5 = vrot.slane %v5499_v63, %v1569_v53  ;;  %v5516_v41 = vrot.slane %v5499_v63, %v5504_v22 }
 0x3d3   : > { %v4147_v30 = vpop.eup %4146  ;;  %v5520_v61 = vrot.slane %v5499_v63, %v5470_v24  ;;  %v5524_v34 = vrot.slane %v5499_v63, %v5473_v0  ;;  %v5528_v17 = vrot.slane %v5499_v63, %v5476_v12  ;;  %v3026_v13 = vpop.xlane.xlu1 %3025  ;;  %v5535_v6 = vrot.slane %v5499_v63, %v5479_v59 }
 0x3d4   : > { %v5530_v49 = vmul.f32 %v4147_v30, %v4135_v16  ;;  %4002 = vmatprep.mubr.msk.bf16.mxu1 %vm1498_vm13, %v1533_v44  ;;  %4152 = vrcp.f32 %v3026_v13  ;;  %v4149_v35 = vpop.eup %4148  ;;  %v1660_v40 = vrot.slane %v5499_v63, %v6256_v26  ;;  %v3919_v32 = vunpack.c.h.bf16 %v5614_v27  ;;  %v5628_v63 = vld [vmem:[#allocation6 + $0x18] sm:$0xff]  }
 0x3d5   : > { %v3030_v42 = vmul.f32 %v4149_v35, %v4137_v48  ;;  %v3922_v30 = vunpack.c.l.bf16 %v5628_v63 }
 0x3d6   : > { %v1534_v3 = vpack.c.bf16 %v5530_v49, %v5530_v49 }
 0x3d7   : > { %v3040_v20 = vrot.slane %v3030_v42, %v6256_v26  ;;  %v3055_v39 = vrot.slane %v3030_v42, %v1554_v56  ;;  %v3070_v16 = vrot.slane %v3030_v42, %v1569_v53  ;;  %v3085_v19 = vrot.slane %v3030_v42, %v5504_v22 }
 0x3d8   : > { %4003 = vmatmul.mubr.msk.bf16.vlgmr.msra.gmra.mrb[12].mxu1 %vm1498_vm13, %v1534_v3  ;;  %v3100_v48 = vrot.slane %v3030_v42, %v5470_v24  ;;  %v3115_v60 = vrot.slane %v3030_v42, %v5473_v0  ;;  %v3130_v18 = vrot.slane %v3030_v42, %v5476_v12 }
 0x3d9   : > { %4015 = vmatpush3.bf16.msra.mxu1 %v5112_v38 }
 0x3da   : > { %4016 = vmatprep.subr.bf16.mxu1 %v5131_v8  ;;  %v4151_v51 = vpop.eup %4150 }
 0x3db   : > { %v5542_v28 = vmul.f32 %v4151_v51, %v4139_v52  ;;  %v3145_v52 = vrot.slane %v3030_v42, %v5479_v59 }
 0x3dd   : > { %4017 = vmatpush3.bf16.msra.mxu1 %v5131_v8  ;;  %v3033_v15 = vpack.c.bf16 %v5542_v28, %v3030_v42  ;;  %v5547_v47 = vrot.slane %v5542_v28, %v1554_v56  ;;  %v5550_v29 = vrot.slane %v5542_v28, %v1569_v53  ;;  %v5554_v38 = vrot.slane %v5542_v28, %v5504_v22  ;;  %v5635_v53 = vld [vmem:[#allocation6 + $0x8] sm:$0x1] }
 0x3de   : > { %v4153_v31 = vpop.eup %4152  ;;  %v5558_v2 = vrot.slane %v5542_v28, %v5470_v24  ;;  %v5562_v8 = vrot.slane %v5542_v28, %v5473_v0  ;;  %v5567_v50 = vrot.slane %v5542_v28, %v5476_v12  ;;  %v5571_v11 = vrot.slane %v5542_v28, %v5479_v59  ;;  %v5620_v59 = vld [vmem:[#allocation6 + $0xc] sm:$0xff]  }
 0x3df   : > { %4018 = vmatprep.mubr.msk.bf16.mxu1 %vm1498_vm13, %v3033_v15  ;;  %v3032_v45 = vmul.f32 %v4153_v31, %v4141_v55  ;;  %v3160_v55 = vrot.slane %v5542_v28, %v6256_v26  ;;  %v3918_v24 = vunpack.c.l.bf16 %v5614_v27  ;;  %v1846_v57 = vunpack.c.l.bf16 %v5620_v59  ;;  %v5648_v15 = vld [vmem:[#allocation6 + $0x24] sm:$0xff]  }
 0x3e0   : > { %v1847_v56 = vunpack.c.h.bf16 %v5620_v59  ;;  %v1845_v42 = vunpack.c.l.bf16 %v5635_v53  ;;  %v3923_v28 = vunpack.c.h.bf16 %v5628_v63 }
 0x3e1   : > { %v3280_v21 = vrot.slane %v3032_v45, %v6256_v26  ;;  %v3034_v58 = vpack.c.bf16 %v3032_v45, %v3032_v45 }
 0x3e3   : > { %3286 = vbcast.lane.b32.xlu1 %v3280_v21, 264  ;;  %3282 = vbcast.lane.b32.xlu0 %v3280_v21, 256 }
 0x3e4   : > { %4019 = vmatmul.mubr.msk.bf16.vlgmr.msra.gmra.mrb[16].mxu1 %vm1498_vm13, %v3034_v58 }
 0x3e7   : > { %1542 = vbcast.lane.b32.xlu1 %v1540_v1, 256  ;;  %3290 = vbcast.lane.b32.xlu0 %v3280_v21, 272 }
 0x3eb   : > { %1557 = vbcast.lane.b32.xlu1 %v1555_v54, 256  ;;  %1546 = vbcast.lane.b32.xlu0 %v1540_v1, 264 }
 0x3ef   : > { %1572 = vbcast.lane.b32.xlu1 %v1570_v36, 256  ;;  %1561 = vbcast.lane.b32.xlu0 %v1555_v54, 264 }
 0x3f3   : > { %1550 = vbcast.lane.b32.xlu1 %v1540_v1, 272  ;;  %1576 = vbcast.lane.b32.xlu0 %v1570_v36, 264 }
 0x3f7   : > { %1587 = vbcast.lane.b32.xlu1 %v5581_v25, 256  ;;  %1565 = vbcast.lane.b32.xlu0 %v1555_v54, 272  ;;  %v1852_v54 = vunpack.c.l.bf16 %v5648_v15 }
 0x3fb   : > { %1580 = vbcast.lane.b32.xlu1 %v1570_v36, 272  ;;  %1591 = vbcast.lane.b32.xlu0 %v5581_v25, 264 }
 0x3ff   : > { %3046 = vbcast.lane.b32.xlu1 %v3040_v20, 264  ;;  %3042 = vbcast.lane.b32.xlu0 %v3040_v20, 256 }
 0x403   : > { %3057 = vbcast.lane.b32.xlu1 %v3055_v39, 256  ;;  %3072 = vbcast.lane.b32.xlu0 %v3070_v16, 256 }
 0x407   : > { %3061 = vbcast.lane.b32.xlu1 %v3055_v39, 264  ;;  %3050 = vbcast.lane.b32.xlu0 %v3040_v20, 272  ;;  %v5664_v20 = vld [vmem:[#allocation6 + $0x20] sm:$0x1] }
 0x40b   : > { %3076 = vbcast.lane.b32.xlu1 %v3070_v16, 264  ;;  %3087 = vbcast.lane.b32.xlu0 %v3085_v19, 256 }
 0x40f   : > { %3065 = vbcast.lane.b32.xlu1 %v3055_v39, 272  ;;  %3080 = vbcast.lane.b32.xlu0 %v3070_v16, 272 }
 0x413   : > { %3091 = vbcast.lane.b32.xlu1 %v3085_v19, 264  ;;  %3106 = vbcast.lane.b32.xlu0 %v3100_v48, 264 }
 0x417   : > { %3102 = vbcast.lane.b32.xlu1 %v3100_v48, 256  ;;  %3095 = vbcast.lane.b32.xlu0 %v3085_v19, 272 }
 0x41b   : > { %3117 = vbcast.lane.b32.xlu1 %v3115_v60, 256  ;;  %3121 = vbcast.lane.b32.xlu0 %v3115_v60, 264 }
 0x41f   : > { %3132 = vbcast.lane.b32.xlu1 %v3130_v18, 256  ;;  %3110 = vbcast.lane.b32.xlu0 %v3100_v48, 272 }
 0x423   : > { %3147 = vbcast.lane.b32.xlu1 %v3145_v52, 256  ;;  %3136 = vbcast.lane.b32.xlu0 %v3130_v18, 264 }
 0x427   : > { %1662 = vbcast.lane.b32.xlu1 %v1660_v40, 256  ;;  %3125 = vbcast.lane.b32.xlu0 %v3115_v60, 272 }
 0x42b   : > { %1677 = vbcast.lane.b32.xlu1 %v5509_v14, 256  ;;  %3151 = vbcast.lane.b32.xlu0 %v3145_v52, 264 }
 0x42f   : > { %1692 = vbcast.lane.b32.xlu1 %v5512_v5, 256  ;;  %3140 = vbcast.lane.b32.xlu0 %v3130_v18, 272 }
 0x433   : > { %1670 = vbcast.lane.b32.xlu1 %v1660_v40, 272  ;;  %3155 = vbcast.lane.b32.xlu0 %v3145_v52, 272 }
 0x437   : > { %1707 = vbcast.lane.b32.xlu1 %v5516_v41, 256  ;;  %1666 = vbcast.lane.b32.xlu0 %v1660_v40, 264 }
 0x43b   : > { %3166 = vbcast.lane.b32.xlu1 %v3160_v55, 264  ;;  %1681 = vbcast.lane.b32.xlu0 %v5509_v14, 264 }
 0x43f   : > { %3181 = vbcast.lane.b32.xlu1 %v5547_v47, 264  ;;  %1696 = vbcast.lane.b32.xlu0 %v5512_v5, 264 }
 0x443   : > { %3196 = vbcast.lane.b32.xlu1 %v5550_v29, 264  ;;  %1685 = vbcast.lane.b32.xlu0 %v5509_v14, 272 }
 0x447   : > { %3185 = vbcast.lane.b32.xlu1 %v5547_v47, 272  ;;  %1711 = vbcast.lane.b32.xlu0 %v5516_v41, 264 }
 0x44b   : > { %3211 = vbcast.lane.b32.xlu1 %v5554_v38, 264  ;;  %3162 = vbcast.lane.b32.xlu0 %v3160_v55, 256 }
 0x44f   : > { %3200 = vbcast.lane.b32.xlu1 %v5550_v29, 272  ;;  %3177 = vbcast.lane.b32.xlu0 %v5547_v47, 256  ;;  %v5650_v47 = vld [vmem:[#allocation6 + $0x14] sm:$0x1] }
 0x450   : > { %v1848_v36 = vunpack.c.l.bf16 %v5650_v47 }
 0x453   : > { %3226 = vbcast.lane.b32.xlu1 %v5558_v2, 264  ;;  %3192 = vbcast.lane.b32.xlu0 %v5550_v29, 256 }
 0x455   : > { %v5610_v9 = vpop.permute.xlu1 %3286  ;;  %v5612_v62 = vpop.permute.xlu0 %3282 }
 0x457   : > { %3215 = vbcast.lane.b32.xlu1 %v5554_v38, 272  ;;  %3170 = vbcast.lane.b32.xlu0 %v3160_v55, 272  ;;  %v1851_v55 = vunpack.c.l.bf16 %v5664_v20 }
 0x459   : > { %v1543_v0 = vpop.permute.xlu1 %1542  ;;  %v5618_v12 = vpop.permute.xlu0 %3290 }
 0x45a   : > { %v1894_v4 = vmul.f32 %v3918_v24, %v1543_v0  ;;  %v1853_v0 = vunpack.c.h.bf16 %v5648_v15 }
 0x45b   : > { %3241 = vbcast.lane.b32.xlu1 %v5562_v8, 264  ;;  %3207 = vbcast.lane.b32.xlu0 %v5554_v38, 256 }
 0x45c   : > { %v1945_v22 = vsel %vm964_vm1, %v1894_v4, 0.0 }
 0x45d   : > { %v1558_v10 = vpop.permute.xlu1 %1557  ;;  %v1547_v43 = vpop.permute.xlu0 %1546 }
 0x45e   : > { %v1895_v37 = vmul.f32 %v3919_v32, %v1547_v43  ;;  %v1897_v44 = vmul.f32 %v1846_v57, %v1558_v10 }
 0x45f   : > { %3230 = vbcast.lane.b32.xlu1 %v5558_v2, 272  ;;  %3222 = vbcast.lane.b32.xlu0 %v5558_v2, 256 }
 0x460   : > { %v1946_v14 = vsel %vm964_vm1, %v1895_v37, 0.0  ;;  %v1956_v29 = vsel %vm964_vm1, %v1897_v44, 0.0 }
 0x461   : > { %v1947_v13 = vadd.f32 %v1946_v14, %v1945_v22  ;;  %v1573_v3 = vpop.permute.xlu1 %1572  ;;  %v1562_v35 = vpop.permute.xlu0 %1561 }
 0x462   : > { %v1898_v51 = vmul.f32 %v1847_v56, %v1562_v35  ;;  %v1900_v31 = vmul.f32 %v3922_v30, %v1573_v3 }
 0x463   : > { %3256 = vbcast.lane.b32.xlu1 %v5567_v50, 264  ;;  %3237 = vbcast.lane.b32.xlu0 %v5562_v8, 256 }
 0x464   : > { %v1957_v38 = vsel %vm964_vm1, %v1898_v51, 0.0  ;;  %v1967_v39 = vsel %vm964_vm1, %v1900_v31, 0.0 }
 0x465   : > { %v1958_v2 = vadd.f32 %v1957_v38, %v1956_v29  ;;  %v1551_v45 = vpop.permute.xlu1 %1550  ;;  %v1577_v21 = vpop.permute.xlu0 %1576 }
 0x466   : > { %v1896_v58 = vmul.f32 %v1845_v42, %v1551_v45  ;;  %v1901_v1 = vmul.f32 %v3923_v28, %v1577_v21 }
 0x467   : > { %3245 = vbcast.lane.b32.xlu1 %v5562_v8, 272  ;;  %3252 = vbcast.lane.b32.xlu0 %v5567_v50, 256 }
 0x468   : > { %v1948_v16 = vsel %vm971_vm2, %v1896_v58, 0.0  ;;  %v1968_v19 = vsel %vm964_vm1, %v1901_v1, 0.0 }
 0x469   : > { %v1949_v48 = vadd.f32 %v1948_v16, %v1947_v13  ;;  %v1969_v60 = vadd.f32 %v1968_v19, %v1967_v39  ;;  %v1588_v18 = vpop.permute.xlu1 %1587  ;;  %v1566_v52 = vpop.permute.xlu0 %1565 }
 0x46a   : > { %v1903_v40 = vmul.f32 %v1852_v54, %v1588_v18  ;;  %v1899_v8 = vmul.f32 %v1848_v36, %v1566_v52 }
 0x46b   : > { %v1950_v4 = vrot.slane %v1949_v48, 4  ;;  %3271 = vbcast.lane.b32.xlu1 %v5571_v11, 264  ;;  %3267 = vbcast.lane.b32.xlu0 %v5571_v11, 256 }
 0x46c   : > { %v1959_v10 = vsel %vm971_vm2, %v1899_v8, 0.0  ;;  %v1978_v51 = vsel %vm964_vm1, %v1903_v40, 0.0 }
 0x46d   : > { %v1951_v43 = vadd.f32 %v1950_v4, %v1949_v48  ;;  %v1960_v37 = vadd.f32 %v1959_v10, %v1958_v2  ;;  %v1581_v22 = vpop.permute.xlu1 %1580  ;;  %v1592_v44 = vpop.permute.xlu0 %1591 }
 0x46e   : > { %v1902_v14 = vmul.f32 %v1851_v55, %v1581_v22  ;;  %v1904_v13 = vmul.f32 %v1853_v0, %v1592_v44 }
 0x46f   : > { %v1952_v3 = vrot.slane %v1951_v43, 2  ;;  %v1961_v35 = vrot.slane %v1960_v37, 4  ;;  %3260 = vbcast.lane.b32.xlu1 %v5567_v50, 272  ;;  %1602 = vbcast.lane.b32.xlu0 %v5485_v23, 256 }
 0x470   : > { %v1970_v29 = vsel %vm971_vm2, %v1902_v14, 0.0  ;;  %v1979_v31 = vsel %vm964_vm1, %v1904_v13, 0.0 }
 0x471   : > { %v1953_v38 = vadd.f32 %v1952_v3, %v1951_v43  ;;  %v1962_v2 = vadd.f32 %v1961_v35, %v1960_v37  ;;  %v1971_v45 = vadd.f32 %v1970_v29, %v1969_v60  ;;  %v5687_v21 = vadd.f32 %v1979_v31, %v1978_v51  ;;  %v3047_v58 = vpop.permute.xlu1 %3046  ;;  %v3043_v1 = vpop.permute.xlu0 %3042 }
 0x472   : > { %v3293_v39 = vmul.f32 %v3919_v32, %v3047_v58  ;;  %v3292_v50 = vmul.f32 %v3918_v24, %v3043_v1  ;;  %v5722_v1 = vld [vmem:[#allocation6 + $0x30] sm:$0xff]  }
 0x473   : > { %v1963_v16 = vrot.slane %v1962_v2, 2  ;;  %v1972_v19 = vrot.slane %v1971_v45, 4  ;;  %3275 = vbcast.lane.b32.xlu1 %v5571_v11, 272  ;;  %1700 = vbcast.lane.b32.xlu0 %v5512_v5, 272  ;;  %v1954_v18 = vrot.slane %v1953_v38, 1 }
 0x474   : > { %v3344_v48 = vsel %vm964_vm1, %v3293_v39, 0.0  ;;  %v3343_v60 = vsel %vm964_vm1, %v3292_v50, 0.0 }
 0x475   : > { %v1964_v52 = vadd.f32 %v1963_v16, %v1962_v2  ;;  %v1973_v40 = vadd.f32 %v1972_v19, %v1971_v45  ;;  %v3345_v8 = vadd.f32 %v3344_v48, %v3343_v60  ;;  %v3058_v4 = vpop.permute.xlu1 %3057  ;;  %v3073_v10 = vpop.permute.xlu0 %3072  ;;  %v1955_v5 = vadd.f32 %v1954_v18, %v1953_v38 }
 0x476   : > { %v3295_v11 = vmul.f32 %v3058_v4, %v1846_v57  ;;  %v3298_v35 = vmul.f32 %v3922_v30, %v3073_v10 }
 0x477   : > { %v1965_v32 = vrot.slane %v1964_v52, 1  ;;  %v1974_v43 = vrot.slane %v1973_v40, 2  ;;  %1606 = vbcast.lane.b32.xlu1 %v5485_v23, 264  ;;  %1726 = vbcast.lane.b32.xlu0 %v5520_v61, 264 }
 0x478   : > { %v3354_v57 = vsel %vm964_vm1, %v3295_v11, 0.0  ;;  %v3365_v30 = vsel %vm964_vm1, %v3298_v35, 0.0 }
 0x479   : > { %v1966_v27 = vadd.f32 %v1965_v32, %v1964_v52  ;;  %v1975_v24 = vadd.f32 %v1974_v43, %v1973_v40  ;;  %v3062_v37 = vpop.permute.xlu1 %3061  ;;  %v3051_v22 = vpop.permute.xlu0 %3050 }
 0x47a   : > { %v3296_v44 = vmul.f32 %v3062_v37, %v1847_v56  ;;  %v3294_v14 = vmul.f32 %v3051_v22, %v1845_v42 }
 0x47b   : > { %v2149_v13 = vsel %vm1414_vm5, %v1966_v27, %v1955_v5  ;;  %v1976_v3 = vrot.slane %v1975_v24, 1  ;;  %1722 = vbcast.lane.b32.xlu1 %v5520_v61, 256  ;;  %1617 = vbcast.lane.b32.xlu0 %v5489_v7, 256 }
 0x47c   : > { %v3355_v51 = vsel %vm964_vm1, %v3296_v44, 0.0  ;;  %v3346_v59 = vsel %vm971_vm2, %v3294_v14, 0.0  ;;  %v5749_v44 = vld [vmem:[#allocation6 + $0xc0] sm:$0xff]  }
 0x47d   : > { %v1977_v56 = vadd.f32 %v1976_v3, %v1975_v24  ;;  %v3356_v29 = vadd.f32 %v3355_v51, %v3354_v57  ;;  %v3347_v53 = vadd.f32 %v3346_v59, %v3345_v8  ;;  %v3077_v42 = vpop.permute.xlu1 %3076  ;;  %v3088_v31 = vpop.permute.xlu0 %3087  ;;  %v6229_v8 = vunpack.c.l.bf16 %v5722_v1  ;;  %v5759_v59 = vld [vmem:[#allocation6 + $0x38] sm:$0x1] }
 0x47e   : > { %v3299_v38 = vmul.f32 %v3923_v28, %v3077_v42  ;;  %v3301_v60 = vmul.f32 %v3088_v31, %v1852_v54  ;;  %v5743_v54 = vld [vmem:[#allocation6 + $0x3c] sm:$0xff]  }
 0x47f   : > { %v5716_v2 = vsel %vm1416_vm6, %v1977_v56, %v2149_v13  ;;  %v3348_v45 = vrot.slane %v3347_v53, 4  ;;  %1595 = vbcast.lane.b32.xlu1 %v5581_v25, 272  ;;  %1715 = vbcast.lane.b32.xlu0 %v5516_v41, 272  ;;  %v6230_v41 = vunpack.c.h.bf16 %v5722_v1  ;;  %v5731_v25 = vld [vmem:[#allocation6 + $0x2c] sm:$0x1]  ;;  %v6226_v3 = vunpack.c.l.bf16 %v5743_v54 }
 0x480   : > { %v3366_v58 = vsel %vm964_vm1, %v3299_v38, 0.0  ;;  %v6240_v4 = vunpack.c.l.bf16 %v5731_v25  ;;  %v3376_v11 = vsel %vm964_vm1, %v3301_v60, 0.0  ;;  %v6228_v57 = vunpack.c.h.bf16 %v5743_v54 }
 0x481   : > { %v3349_v39 = vadd.f32 %v3348_v45, %v3347_v53  ;;  %v3367_v50 = vadd.f32 %v3366_v58, %v3365_v30  ;;  %v3066_v16 = vpop.permute.xlu1 %3065  ;;  %v3081_v19 = vpop.permute.xlu0 %3080 }
 0x482   : > { %v3297_v63 = vmul.f32 %v3066_v16, %v1848_v36  ;;  %v3300_v28 = vmul.f32 %v3081_v19, %v1851_v55  ;;  %v6227_v19 = vunpack.c.l.bf16 %v5759_v59 }
 0x483   : > { %1621 = vbcast.lane.b32.xlu1 %v5489_v7, 264  ;;  %1741 = vbcast.lane.b32.xlu0 %v5524_v34, 264  ;;  %v3350_v48 = vrot.slane %v3349_v39, 2 }
 0x484   : > { %v3357_v18 = vsel %vm971_vm2, %v3297_v63, 0.0  ;;  %v3368_v47 = vsel %vm971_vm2, %v3300_v28, 0.0  ;;  %v6218_v63 = vunpack.c.l.bf16 %v5749_v44 }
 0x485   : > { %v3358_v36 = vadd.f32 %v3357_v18, %v3356_v29  ;;  %v3369_v52 = vadd.f32 %v3368_v47, %v3367_v50  ;;  %v3092_v20 = vpop.permute.xlu1 %3091  ;;  %v3107_v55 = vpop.permute.xlu0 %3106  ;;  %v3351_v43 = vadd.f32 %v3350_v48, %v3349_v39  ;;  %v5764_v50 = vld [vmem:[#allocation6 + $0x48] sm:$0xff]  }
 0x486   : > { %v3302_v40 = vmul.f32 %v3092_v20, %v1853_v0  ;;  %v3305_v15 = vmul.f32 %v6230_v41, %v3107_v55  ;;  %v5775_v18 = vld [vmem:[#allocation6 + $0xc8] sm:$0x1]  ;;  %v6223_v20 = vunpack.c.l.bf16 %v5764_v50 }
 0x487   : > { %v3359_v10 = vrot.slane %v3358_v36, 4  ;;  %v3370_v32 = vrot.slane %v3369_v52, 4  ;;  %1737 = vbcast.lane.b32.xlu1 %v5524_v34, 256  ;;  %1632 = vbcast.lane.b32.xlu0 %v5493_v33, 256  ;;  %v3352_v56 = vrot.slane %v3351_v43, 1  ;;  %6257 = vst [vmem:[#allocation9_spill] sm:$0xff] %v5775_v18 }
 0x488   : > { %v3377_v5 = vsel %vm964_vm1, %v3302_v40, 0.0  ;;  %v3388_v29 = vsel %vm964_vm1, %v3305_v15, 0.0 }
 0x489   : > { %v3360_v0 = vadd.f32 %v3359_v10, %v3358_v36  ;;  %v3371_v27 = vadd.f32 %v3370_v32, %v3369_v52  ;;  %v3378_v24 = vadd.f32 %v3377_v5, %v3376_v11  ;;  %v3103_v37 = vpop.permute.xlu1 %3102  ;;  %v3096_v22 = vpop.permute.xlu0 %3095  ;;  %v3353_v47 = vadd.f32 %v3352_v56, %v3351_v43 }
 0x48a   : > { %v3304_v14 = vmul.f32 %v6229_v8, %v3103_v37  ;;  %v3303_v13 = vmul.f32 %v3096_v22, %v6240_v4  ;;  %v5787_v37 = vld [vmem:[#allocation6 + $0x60] sm:$0xff]   ;;  %v3340_v56 = vmul.f32 %v6218_v63, %v5612_v62  ;;  %v5812_v62 = vld [vmem:[#allocation6 + $0x6c] sm:$0xff]  }
 0x48b   : > { %v3361_v35 = vrot.slane %v3360_v0, 2  ;;  %v3372_v51 = vrot.slane %v3371_v27, 2  ;;  %1610 = vbcast.lane.b32.xlu1 %v5485_v23, 272  ;;  %1730 = vbcast.lane.b32.xlu0 %v5520_v61, 272  ;;  %v6217_v23 = vunpack.c.h.bf16 %v5749_v44  ;;  %v5789_v22 = vld [vmem:[#allocation6 + $0x44] sm:$0x1] }
 0x48c   : > { %v3387_v53 = vsel %vm964_vm1, %v3304_v14, 0.0  ;;  %v3379_v42 = vsel %vm971_vm2, %v3303_v13, 0.0 }
 0x48d   : > { %v3362_v31 = vadd.f32 %v3361_v35, %v3360_v0  ;;  %v3373_v38 = vadd.f32 %v3372_v51, %v3371_v27  ;;  %v3389_v45 = vadd.f32 %v3388_v29, %v3387_v53  ;;  %v3380_v30 = vadd.f32 %v3379_v42, %v3378_v24  ;;  %v3118_v58 = vpop.permute.xlu1 %3117  ;;  %v3122_v39 = vpop.permute.xlu0 %3121  ;;  %v5801_v42 = vld [vmem:[#allocation6 + $0x54] sm:$0xff]  }
 0x48e   : > { %v3307_v61 = vmul.f32 %v3118_v58, %v6226_v3  ;;  %v3308_v16 = vmul.f32 %v3122_v39, %v6228_v57  ;;  %v6224_v0 = vunpack.c.h.bf16 %v5764_v50  ;;  %v6216_v27 = vunpack.c.l.bf16 %v5775_v18 }
 0x48f   : > { %v3363_v28 = vrot.slane %v3362_v31, 1  ;;  %v3374_v48 = vrot.slane %v3373_v38, 1  ;;  %v3381_v60 = vrot.slane %v3380_v30, 4  ;;  %1636 = vbcast.lane.b32.xlu1 %v5493_v33, 264  ;;  %1756 = vbcast.lane.b32.xlu0 %v5528_v17, 264  ;;  %v3341_v14 = vmul.f32 %v6217_v23, %v5610_v9 }
 0x490   : > { %v3398_v36 = vsel %vm964_vm1, %v3307_v61, 0.0  ;;  %v3399_v52 = vsel %vm964_vm1, %v3308_v16, 0.0  ;;  %v6225_v58 = vunpack.c.l.bf16 %v5789_v22  ;;  %v3342_v39 = vmul.f32 %v5618_v12, %v6216_v27 }
 0x491   : > { %v3364_v55 = vadd.f32 %v3363_v28, %v3362_v31  ;;  %v3375_v40 = vadd.f32 %v3374_v48, %v3373_v38  ;;  %v3382_v10 = vadd.f32 %v3381_v60, %v3380_v30  ;;  %v3400_v32 = vadd.f32 %v3399_v52, %v3398_v36  ;;  %v3133_v11 = vpop.permute.xlu1 %3132  ;;  %v3111_v5 = vpop.permute.xlu0 %3110 }
 0x492   : > { %v3306_v15 = vmul.f32 %v3111_v5, %v6227_v19  ;;  %v3310_v13 = vmul.f32 %v6223_v20, %v3133_v11  ;;  %v3934_v30 = vunpack.c.l.bf16 %v5787_v37  ;;  %v6221_v48 = vunpack.c.l.bf16 %v5801_v42  ;;  %v5827_v5 = vld [vmem:[#allocation6 + $0x78] sm:$0xff]  }
 0x493   : > { %v3547_v43 = vsel %vm1414_vm5, %v3364_v55, %v3353_v47  ;;  %v3383_v24 = vrot.slane %v3382_v10, 2  ;;  %1752 = vbcast.lane.b32.xlu1 %v5528_v17, 256  ;;  %1647 = vbcast.lane.b32.xlu0 %v5497_v46, 256  ;;  %v3519_v47 = vsel %vm964_vm1, %v3340_v56, 0.0  ;;  %v6222_v11 = vunpack.c.h.bf16 %v5801_v42  ;;  %v4126_v20 = vld [vmem:[%s6207_s2] sm:$0xff]  }
 0x494   : > { %v3390_v35 = vsel %vm971_vm2, %v3306_v15, 0.0  ;;  %v3548_v51 = vsel %vm1416_vm6, %v3375_v40, %v3547_v43  ;;  %v3409_v28 = vsel %vm964_vm1, %v3310_v13, 0.0  ;;  %v3522_v15 = vsel %vm971_vm2, %v3342_v39, 0.0  ;;  %4022 = vmatprep.subr.bf16.mxu0 %v4126_v20 }
 0x495   : > { %v3384_v29 = vadd.f32 %v3383_v24, %v3382_v10  ;;  %v3391_v53 = vadd.f32 %v3390_v35, %v3389_v45  ;;  %v3148_v31 = vpop.permute.xlu1 %3147  ;;  %v3137_v38 = vpop.permute.xlu0 %3136  ;;  %v3520_v45 = vsel %vm964_vm1, %v3341_v14, 0.0  ;;  %v1870_v10 = vunpack.c.l.bf16 %v5812_v62  ;;  %v5832_v24 = vld [vmem:[#allocation6 + $0x50] sm:$0x1]  ;;  %4023 = vmatpush3.bf16.msra.mxu0 %v4126_v20 }
 0x496   : > { %v3311_v9 = vmul.f32 %v6224_v0, %v3137_v38  ;;  %v3521_v13 = vadd.f32 %v3520_v45, %v3519_v47  ;;  %v3313_v35 = vmul.f32 %v3148_v31, %v6221_v48  ;;  %v3938_v39 = vunpack.c.l.bf16 %v5827_v5 }
 0x497   : > { %v3385_v61 = vrot.slane %v3384_v29, 1  ;;  %v3392_v16 = vrot.slane %v3391_v53, 4  ;;  %1625 = vbcast.lane.b32.xlu1 %v5489_v7, 272  ;;  %1745 = vbcast.lane.b32.xlu0 %v5524_v34, 272  ;;  %v6220_v45 = vunpack.c.l.bf16 %v5832_v24 }
 0x498   : > { %v3410_v60 = vsel %vm964_vm1, %v3311_v9, 0.0  ;;  %v3420_v47 = vsel %vm964_vm1, %v3313_v35, 0.0 }
 0x499   : > { %v3386_v36 = vadd.f32 %v3385_v61, %v3384_v29  ;;  %v3393_v12 = vadd.f32 %v3392_v16, %v3391_v53  ;;  %v3411_v52 = vadd.f32 %v3410_v60, %v3409_v28  ;;  %v1663_v55 = vpop.permute.xlu1 %1662  ;;  %v3126_v40 = vpop.permute.xlu0 %3125  ;;  %v3523_v61 = vadd.f32 %v3522_v15, %v3521_v13  ;;  %v5846_v28 = vld [vmem:[#allocation6 + $0x68] sm:$0x1] }
 0x49a   : > { %v5821_v7 = vmul.f32 %v3934_v30, %v1663_v55  ;;  %v3309_v34 = vmul.f32 %v3126_v40, %v6225_v58 }
 0x49b   : > { %v3394_v43 = vrot.slane %v3393_v12, 2  ;;  %1651 = vbcast.lane.b32.xlu1 %v5497_v46, 264  ;;  %1771 = vbcast.lane.b32.xlu0 %v5535_v6, 264  ;;  %v3549_v14 = vsel %vm1418_vm8, %v3386_v36, %v3548_v51  ;;  %v3524_v13 = vrot.slane %v3523_v61, 4 }
 0x49c   : > { %v3401_v56 = vsel %vm971_vm2, %v3309_v34, 0.0 }
 0x49d   : > { %v3395_v29 = vadd.f32 %v3394_v43, %v3393_v12  ;;  %v3402_v53 = vadd.f32 %v3401_v56, %v3400_v32  ;;  %v1678_v38 = vpop.permute.xlu1 %1677  ;;  %v3152_v9 = vpop.permute.xlu0 %3151  ;;  %v5850_v32 = vld [vmem:[#allocation6 + $0x5c] sm:$0x1]  ;;  %v1869_v43 = vunpack.c.l.bf16 %v5846_v28 }
 0x49e   : > { %v5841_v16 = vmul.f32 %v1870_v10, %v1678_v38  ;;  %v3314_v51 = vmul.f32 %v3152_v9, %v6222_v11  ;;  %v6219_v38 = vunpack.c.l.bf16 %v5850_v32 }
 0x49f   : > { %v3396_v31 = vrot.slane %v3395_v29, 1  ;;  %v3403_v60 = vrot.slane %v3402_v53, 4  ;;  %1767 = vbcast.lane.b32.xlu1 %v5535_v6, 256  ;;  %1760 = vbcast.lane.b32.xlu0 %v5528_v17, 272 }
 0x4a0   : > { %v3421_v36 = vsel %vm964_vm1, %v3314_v51, 0.0 }
 0x4a1   : > { %v3397_v12 = vadd.f32 %v3396_v31, %v3395_v29  ;;  %v3404_v55 = vadd.f32 %v3403_v60, %v3402_v53  ;;  %v3422_v40 = vadd.f32 %v3421_v36, %v3420_v47  ;;  %v1693_v34 = vpop.permute.xlu1 %1692  ;;  %v3141_v15 = vpop.permute.xlu0 %3140  ;;  %v5864_v29 = vld [vmem:[#allocation6 + $0x84] sm:$0xff]   ;;  %v1780_v36 = vrot.slane %v5530_v49, %v6256_v26 }
 0x4a2   : > { %v5857_v56 = vmul.f32 %v3938_v39, %v1693_v34  ;;  %v3312_v17 = vmul.f32 %v3141_v15, %v6220_v45  ;;  %v3935_v34 = vunpack.c.h.bf16 %v5787_v37  ;;  %v1876_v15 = vunpack.c.l.bf16 %v5864_v29 }
 0x4a3   : > { %v3405_v35 = vrot.slane %v3404_v55, 2  ;;  %1640 = vbcast.lane.b32.xlu1 %v5493_v33, 272  ;;  %1775 = vbcast.lane.b32.xlu0 %v5535_v6, 272  ;;  %v3550_v53 = vsel %vm1420_vm9, %v3397_v12, %v3549_v14  ;;  %v3525_v14 = vadd.f32 %v3524_v13, %v3523_v61  ;;  %v1871_v13 = vunpack.c.h.bf16 %v5812_v62 }
 0x4a4   : > { %v3412_v9 = vsel %vm971_vm2, %v3312_v17, 0.0 }
 0x4a5   : > { %v3406_v51 = vadd.f32 %v3405_v35, %v3404_v55  ;;  %v3413_v31 = vadd.f32 %v3412_v9, %v3411_v52  ;;  %v1671_v60 = vpop.permute.xlu1 %1670  ;;  %v3156_v47 = vpop.permute.xlu0 %3155 }
 0x4a6   : > { %v1920_v33 = vmul.f32 %v1869_v43, %v1671_v60  ;;  %v3315_v6 = vmul.f32 %v3156_v47, %v6219_v38 }
 0x4a7   : > { %v3407_v12 = vrot.slane %v3406_v51, 1  ;;  %v3414_v17 = vrot.slane %v3413_v31, 4  ;;  %1655 = vbcast.lane.b32.xlu1 %v5497_v46, 272  ;;  %1786 = vbcast.lane.b32.xlu0 %v1780_v36, 264  ;;  %v3526_v46 = vrot.slane %v3525_v14, 2 }
 0x4a8   : > { %v3423_v52 = vsel %vm971_vm2, %v3315_v6, 0.0  ;;  %v2036_v38 = vsel %vm971_vm2, %v1920_v33, 0.0 }
 0x4a9   : > { %v3408_v55 = vadd.f32 %v3407_v12, %v3406_v51  ;;  %v3415_v49 = vadd.f32 %v3414_v17, %v3413_v31  ;;  %v3424_v26 = vadd.f32 %v3423_v52, %v3422_v40  ;;  %v1708_v35 = vpop.permute.xlu1 %1707  ;;  %v1667_v9 = vpop.permute.xlu0 %1666  ;;  %v2033_v31 = vsel %vm964_vm1, %v5821_v7, 0.0 }
 0x4aa   : > { %v5880_v60 = vmul.f32 %v1876_v15, %v1708_v35  ;;  %v1919_v47 = vmul.f32 %v3935_v34, %v1667_v9 }
 0x4ab   : > { %v5884_v61 = vpop.f32.mrb[12].mxu1  ;;  %v3416_v27 = vrot.slane %v3415_v49, 2  ;;  %v3425_v23 = vrot.slane %v3424_v26, 4  ;;  %1782 = vbcast.lane.b32.xlu1 %v1780_v36, 256  ;;  %v3551_v40 = vsel %vm1422_vm10, %v3408_v55, %v3550_v53  ;;  %v3939_v53 = vunpack.c.h.bf16 %v5827_v5 }
 0x4ac   : > { %6258 = vst [vmem:[#allocation10_spill] sm:$0xff] %v5884_v61  ;;  %v5887_v51 = vpop.f32.mrb[13].mxu1  ;;  %v2034_v6 = vsel %vm964_vm1, %v1919_v47, 0.0  ;;  %v3527_v55 = vadd.f32 %v3526_v46, %v3525_v14 }
 0x4ad   : > { %v4005_v12 = vpop.f32.mrb[14].mxu1  ;;  %v3417_v17 = vadd.f32 %v3416_v27, %v3415_v49  ;;  %v3426_v52 = vadd.f32 %v3425_v23, %v3424_v26  ;;  %v2035_v35 = vadd.f32 %v2034_v6, %v2033_v31  ;;  %v5893_v9 = vpop.permute.xlu1 %3166  ;;  %v5901_v27 = vld [vmem:[#allocation6 + $0x74] sm:$0x1]  ;;  %v2044_v23 = vsel %vm964_vm1, %v5841_v16, 0.0 }
 0x4ae   : > { %v1682_v63 = vpop.permute.xlu0 %1681  ;;  %v5898_v48 = vpop.f32.mrb[15].mxu1  ;;  %v2055_v16 = vsel %vm964_vm1, %v5857_v56, 0.0  ;;  %v4127_v56 = vld [vmem:[%s6207_s2 + $0x8] sm:$0xff]  }
 0x4af   : > { %v1922_v45 = vmul.f32 %v1871_v13, %v1682_v63  ;;  %v3418_v7 = vrot.slane %v3417_v17, 1  ;;  %v3427_v11 = vrot.slane %v3426_v52, 2  ;;  %v2037_v47 = vadd.f32 %v2036_v38, %v2035_v35  ;;  %1790 = vbcast.lane.b32.xlu1 %v1780_v36, 272  ;;  %4024 = vmatprep.subr.bf16.mxu0 %v4127_v56 }
 0x4b0   : > { %v1872_v38 = vunpack.c.l.bf16 %v5901_v27  ;;  %v3528_v36 = vrot.slane %v3527_v55, 1  ;;  %4025 = vmatpush3.bf16.msra.mxu0 %v4127_v56 }
 0x4b1   : > { %v2045_v49 = vsel %vm964_vm1, %v1922_v45, 0.0  ;;  %v3428_v33 = vadd.f32 %v3427_v11, %v3426_v52  ;;  %v2038_v26 = vrot.slane %v2037_v47, 4  ;;  %v5906_v63 = vpop.permute.xlu1 %3181  ;;  %v3419_v12 = vadd.f32 %v3418_v7, %v3417_v17 }
 0x4b2   : > { %v2046_v31 = vadd.f32 %v2045_v49, %v2044_v23  ;;  %v1697_v6 = vpop.permute.xlu0 %1696 }
 0x4b3   : > { %v1925_v14 = vmul.f32 %v3939_v53, %v1697_v6  ;;  %v3429_v46 = vrot.slane %v3428_v33, 1  ;;  %v3552_v35 = vsel %vm1424_vm11, %v3419_v12, %v3551_v40  ;;  %v2039_v45 = vadd.f32 %v2038_v26, %v2037_v47 }
 0x4b4   : > { %v3529_v6 = vadd.f32 %v3528_v36, %v3527_v55  ;;  %v1877_v26 = vunpack.c.h.bf16 %v5864_v29  ;;  %v5992_v29 = vld [vmem:[#allocation6 + $0xa4] sm:$0x1] }
 0x4b5   : > { %v2056_v11 = vsel %vm964_vm1, %v1925_v14, 0.0  ;;  %v3197_v23 = vpop.permute.xlu1 %3196  ;;  %v3430_v17 = vadd.f32 %v3429_v46, %v3428_v33  ;;  %v2040_v46 = vrot.slane %v2039_v45, 2 }
 0x4b6   : > { %v5915_v52 = vadd.f32 %v2056_v11, %v2055_v16  ;;  %v1686_v49 = vpop.permute.xlu0 %1685 }
 0x4b7   : > { %v1923_v7 = vmul.f32 %v1872_v38, %v1686_v49  ;;  %v4020_v40 = vpop.f32.mrb[16].mxu1  ;;  %v3553_v47 = vsel %vm1426_vm12, %v3430_v17, %v3552_v35  ;;  %v4128_v35 = vld [vmem:[%s6207_s2 + $0x10] sm:$0xff]  }
 0x4b8   : > { %v3616_v33 = vadd.f32 %v4020_v40, %v3529_v6  ;;  %v3607_v14 = vpop.f32.mrb[17].mxu1  ;;  %v2041_v6 = vadd.f32 %v2040_v46, %v2039_v45  ;;  %4026 = vmatprep.subr.bf16.mxu0 %v4128_v35 }
 0x4b9   : > { %v2047_v12 = vsel %vm971_vm2, %v1923_v7, 0.0  ;;  %v5928_v36 = vadd.f32 %v3607_v14, %v3553_v47  ;;  %v4021_v16 = vpop.f32.mrb[18].mxu1  ;;  %v3186_v11 = vpop.permute.xlu1 %3185  ;;  %4027 = vmatpush3.bf16.msra.mxu0 %v4128_v35  ;;  %v5952_v35 = vld [vmem:[#allocation6 + $0x8c] sm:$0x1] }
 0x4ba   : > { %v2048_v55 = vadd.f32 %v2047_v12, %v2046_v31  ;;  %v1712_v49 = vpop.permute.xlu0 %1711  ;;  %3628 = vrot.lane.b32.xlu1 %v3616_v33, %s4263_s10  ;;  %v5931_v0 = vpop.f32.mrb[19].mxu1  ;;  %v2066_v31 = vsel %vm964_vm1, %v5880_v60, 0.0  ;;  %v2042_v16 = vrot.slane %v2041_v6, 1 }
 0x4bb   : > { %v1928_v7 = vmul.f32 %v1877_v26, %v1712_v49 }
 0x4bc   : > { %v2049_v17 = vrot.slane %v2048_v55, 4  ;;  %v2043_v57 = vadd.f32 %v2042_v16, %v2041_v6 }
 0x4bd   : > { %v2067_v20 = vsel %vm964_vm1, %v1928_v7, 0.0  ;;  %v3212_v47 = vpop.permute.xlu1 %3211 }
 0x4be   : > { %v2050_v40 = vadd.f32 %v2049_v17, %v2048_v55  ;;  %v5939_v12 = vadd.f32 %v2067_v20, %v2066_v31  ;;  %v3163_v33 = vpop.permute.xlu0 %3162  ;;  %v5946_v55 = vld [vmem:[#allocation6 + $0x80] sm:$0x1]  ;;  %v5950_v31 = vld [vmem:[#allocation6 + $0x90] sm:$0xff]  }
 0x4bf   : > { %v3316_v56 = vmul.f32 %v3934_v30, %v3163_v33  ;;  %v6243_v20 = vunpack.c.l.bf16 %v5946_v55  ;;  %v6241_v5 = vunpack.c.l.bf16 %v5950_v31 }
 0x4c0   : > { %v2051_v14 = vrot.slane %v2050_v40, 2 }
 0x4c1   : > { %v3201_v3 = vpop.permute.xlu1 %3200  ;;  %v3431_v37 = vsel %vm964_vm1, %v3316_v56, 0.0 }
 0x4c2   : > { %v2052_v58 = vadd.f32 %v2051_v14, %v2050_v40  ;;  %v3178_v19 = vpop.permute.xlu0 %3177  ;;  %v5963_v40 = vld [vmem:[#allocation6 + $0x98] sm:$0x1] }
 0x4c3   : > { %v3319_v7 = vmul.f32 %v3178_v19, %v1870_v10  ;;  %v3320_v19 = vmul.f32 %v5906_v63, %v1871_v13  ;;  %v3323_v10 = vmul.f32 %v3939_v53, %v3197_v23  ;;  %v6231_v13 = vunpack.c.l.bf16 %v5963_v40 }
 0x4c4   : > { %v2053_v49 = vrot.slane %v2052_v58, 1 }
 0x4c5   : > { %v3227_v60 = vpop.permute.xlu1 %3226  ;;  %v3442_v33 = vsel %vm964_vm1, %v3319_v7, 0.0  ;;  %v3443_v16 = vsel %vm964_vm1, %v3320_v19, 0.0 }
 0x4c6   : > { %v2054_v8 = vadd.f32 %v2053_v49, %v2052_v58  ;;  %v3193_v45 = vpop.permute.xlu0 %3192  ;;  %v5954_v58 = vld [vmem:[#allocation6 + $0x9c] sm:$0xff]   ;;  %v3444_v56 = vadd.f32 %v3443_v16, %v3442_v33 }
 0x4c7   : > { %v6233_v28 = vunpack.c.h.bf16 %v5954_v58  ;;  %v6232_v19 = vunpack.c.l.bf16 %v5954_v58 }
 0x4c8   : > { %v5942_v46 = vsel %vm1414_vm5, %v2054_v8, %v2043_v57  ;;  %v3317_v8 = vmul.f32 %v3935_v34, %v5893_v9  ;;  %v3322_v57 = vmul.f32 %v3938_v39, %v3193_v45  ;;  %v6242_v34 = vunpack.c.h.bf16 %v5950_v31 }
 0x4c9   : > { %v3216_v17 = vpop.permute.xlu1 %3215  ;;  %v6234_v39 = vunpack.c.l.bf16 %v5952_v35  ;;  %v3326_v9 = vmul.f32 %v3212_v47, %v1877_v26  ;;  %v3454_v26 = vsel %vm964_vm1, %v3323_v10, 0.0  ;;  %v3321_v47 = vmul.f32 %v3186_v11, %v1872_v38 }
 0x4ca   : > { %v3171_v6 = vpop.permute.xlu0 %3170  ;;  %v3432_v53 = vsel %vm964_vm1, %v3317_v8, 0.0  ;;  %v3453_v63 = vsel %vm964_vm1, %v3322_v57, 0.0  ;;  %v3324_v45 = vmul.f32 %v3201_v3, %v6243_v20  ;;  %v3329_v7 = vmul.f32 %v6242_v34, %v3227_v60 }
 0x4cb   : > { %v3318_v30 = vmul.f32 %v3171_v6, %v1869_v43  ;;  %v3433_v49 = vadd.f32 %v3432_v53, %v3431_v37  ;;  %v3455_v57 = vadd.f32 %v3454_v26, %v3453_v63  ;;  %v3327_v27 = vmul.f32 %v3216_v17, %v6234_v39 }
 0x4cc   : > { %v3445_v10 = vsel %vm971_vm2, %v3321_v47, 0.0  ;;  %v6235_v37 = vunpack.c.l.bf16 %v5992_v29  ;;  %v3476_v17 = vsel %vm964_vm1, %v3329_v7, 0.0 }
 0x4cd   : > { %v3242_v43 = vpop.permute.xlu1 %3241  ;;  %v3434_v23 = vsel %vm971_vm2, %v3318_v30, 0.0  ;;  %v3446_v33 = vadd.f32 %v3445_v10, %v3444_v56 }
 0x4ce   : > { %v3208_v62 = vpop.permute.xlu0 %3207  ;;  %v3435_v38 = vadd.f32 %v3434_v23, %v3433_v49  ;;  %v3467_v23 = vsel %vm971_vm2, %v3327_v27, 0.0  ;;  %v3332_v49 = vmul.f32 %v3242_v43, %v6233_v28 }
 0x4cf   : > { %v3325_v14 = vmul.f32 %v3208_v62, %v1876_v15  ;;  %v3465_v15 = vsel %vm964_vm1, %v3326_v9, 0.0  ;;  %v3456_v9 = vsel %vm971_vm2, %v3324_v45, 0.0  ;;  %v3447_v7 = vrot.slane %v3446_v33, 4 }
 0x4d0   : > { %v3457_v63 = vadd.f32 %v3456_v9, %v3455_v57 }
 0x4d1   : > { %v3464_v6 = vsel %vm964_vm1, %v3325_v14, 0.0  ;;  %v3231_v8 = vpop.permute.xlu1 %3230  ;;  %v3436_v14 = vrot.slane %v3435_v38, 4 }
 0x4d2   : > { %v3223_v11 = vpop.permute.xlu0 %3222  ;;  %v3466_v30 = vadd.f32 %v3465_v15, %v3464_v6  ;;  %v3330_v3 = vmul.f32 %v3231_v8, %v6231_v13  ;;  %v6011_v8 = vld [vmem:[#allocation6 + $0xa8] sm:$0xff]  }
 0x4d3   : > { %v3328_v60 = vmul.f32 %v6241_v5, %v3223_v11  ;;  %v6236_v27 = vunpack.c.l.bf16 %v6011_v8  ;;  %v6017_v11 = vld [vmem:[#allocation6 + $0xb4] sm:$0xff]   ;;  %v3437_v10 = vadd.f32 %v3436_v14, %v3435_v38  ;;  %v6239_v43 = vunpack.c.h.bf16 %v6011_v8 }
 0x4d4   : > { %v3468_v47 = vadd.f32 %v3467_v23, %v3466_v30  ;;  %v3478_v6 = vsel %vm971_vm2, %v3330_v3, 0.0  ;;  %v3487_v3 = vsel %vm964_vm1, %v3332_v49, 0.0 }
 0x4d5   : > { %v3475_v62 = vsel %vm964_vm1, %v3328_v60, 0.0  ;;  %v3257_v53 = vpop.permute.xlu1 %3256  ;;  %v3458_v60 = vrot.slane %v3457_v63, 4  ;;  %v3438_v13 = vrot.slane %v3437_v10, 2 }
 0x4d6   : > { %v3477_v16 = vadd.f32 %v3476_v17, %v3475_v62  ;;  %v3238_v26 = vpop.permute.xlu0 %3237  ;;  %v3469_v9 = vrot.slane %v3468_v47, 4 }
 0x4d7   : > { %v3331_v45 = vmul.f32 %v3238_v26, %v6232_v19  ;;  %v6238_v26 = vunpack.c.l.bf16 %v6017_v11  ;;  %v3459_v49 = vadd.f32 %v3458_v60, %v3457_v63 }
 0x4d8   : > { %v3479_v56 = vadd.f32 %v3478_v6, %v3477_v16  ;;  %v6237_v16 = vunpack.c.h.bf16 %v6017_v11  ;;  %v6025_v6 = vld [vmem:[#allocation6 + $0xb0] sm:$0x1]  ;;  %v3470_v39 = vadd.f32 %v3469_v9, %v3468_v47 }
 0x4d9   : > { %v3486_v15 = vsel %vm964_vm1, %v3331_v45, 0.0  ;;  %v3246_v57 = vpop.permute.xlu1 %3245  ;;  %v3448_v45 = vadd.f32 %v3447_v7, %v3446_v33  ;;  %v3460_v47 = vrot.slane %v3459_v49, 2 }
 0x4da   : > { %v3253_v30 = vpop.permute.xlu0 %3252  ;;  %v3480_v17 = vrot.slane %v3479_v56, 4  ;;  %v3333_v62 = vmul.f32 %v3246_v57, %v6235_v37  ;;  %v3488_v23 = vadd.f32 %v3487_v3, %v3486_v15  ;;  %v3335_v15 = vmul.f32 %v6239_v43, %v3257_v53  ;;  %v6033_v37 = vld [vmem:[#allocation6 + $0xbc] sm:$0x1] }
 0x4db   : > { %v3334_v14 = vmul.f32 %v6236_v27, %v3253_v30  ;;  %v6245_v3 = vunpack.c.l.bf16 %v6025_v6  ;;  %v3449_v63 = vrot.slane %v3448_v45, 2  ;;  %v6244_v53 = vunpack.c.l.bf16 %v6033_v37 }
 0x4dc   : > { %v3489_v38 = vsel %vm971_vm2, %v3333_v62, 0.0  ;;  %v3481_v57 = vadd.f32 %v3480_v17, %v3479_v56  ;;  %v3439_v56 = vadd.f32 %v3438_v13, %v3437_v10  ;;  %v3498_v27 = vsel %vm964_vm1, %v3335_v15, 0.0 }
 0x4dd   : > { %v3272_v41 = vpop.permute.xlu1 %3271  ;;  %v3490_v19 = vadd.f32 %v3489_v38, %v3488_v23  ;;  %v3497_v60 = vsel %vm964_vm1, %v3334_v14, 0.0  ;;  %v3471_v23 = vrot.slane %v3470_v39, 2  ;;  %v3461_v10 = vadd.f32 %v3460_v47, %v3459_v49 }
 0x4de   : > { %v3268_v28 = vpop.permute.xlu0 %3267  ;;  %v3338_v7 = vmul.f32 %v3272_v41, %v6237_v16  ;;  %v3482_v38 = vrot.slane %v3481_v57, 2  ;;  %v3499_v16 = vadd.f32 %v3498_v27, %v3497_v60  ;;  %v6259_v27 = vunpack.c.l.bf16 %v5946_v55 }
 0x4df   : > { %v3491_v33 = vrot.slane %v3490_v19, 4  ;;  %v3337_v30 = vmul.f32 %v3268_v28, %v6238_v26  ;;  %v3450_v26 = vadd.f32 %v3449_v63, %v3448_v45  ;;  %v3472_v34 = vadd.f32 %v3471_v23, %v3470_v39 }
 0x4e0   : > { %v3509_v28 = vsel %vm964_vm1, %v3338_v7, 0.0  ;;  %v3483_v20 = vadd.f32 %v3482_v38, %v3481_v57 }
 0x4e1   : > { %v3261_v62 = vpop.permute.xlu1 %3260  ;;  %v3492_v9 = vadd.f32 %v3491_v33, %v3490_v19  ;;  %v3508_v14 = vsel %vm964_vm1, %v3337_v30, 0.0  ;;  %v3440_v33 = vrot.slane %v3439_v56, 1  ;;  %v3451_v30 = vrot.slane %v3450_v26, 1 }
 0x4e2   : > { %v6040_v17 = vpop.permute.xlu0 %1602  ;;  %v3336_v41 = vmul.f32 %v3261_v62, %v6245_v3  ;;  %v3510_v62 = vadd.f32 %v3509_v28, %v3508_v14  ;;  %v3473_v23 = vrot.slane %v3472_v34, 1  ;;  %v3484_v38 = vrot.slane %v3483_v20, 1 }
 0x4e3   : > { %v3493_v43 = vrot.slane %v3492_v9, 2  ;;  %v3441_v57 = vadd.f32 %v3440_v33, %v3439_v56 }
 0x4e4   : > { %v3500_v13 = vsel %vm971_vm2, %v3336_v41, 0.0  ;;  %v3474_v33 = vadd.f32 %v3473_v23, %v3472_v34 }
 0x4e5   : > { %v3276_v19 = vpop.permute.xlu1 %3275  ;;  %v3501_v4 = vadd.f32 %v3500_v13, %v3499_v16  ;;  %v3494_v63 = vadd.f32 %v3493_v43, %v3492_v9  ;;  %v3462_v16 = vrot.slane %v3461_v10, 1  ;;  %v3452_v43 = vadd.f32 %v3451_v30, %v3450_v26 }
 0x4e6   : > { %v3339_v5 = vmul.f32 %v3276_v19, %v6244_v53  ;;  %v1701_v15 = vpop.permute.xlu0 %1700 }
 0x4e7   : > { %v1926_v7 = vmul.f32 %v6259_v27, %v1701_v15  ;;  %v3502_v60 = vrot.slane %v3501_v4, 4  ;;  %v3495_v9 = vrot.slane %v3494_v63, 1  ;;  %v3554_v56 = vsel %vm1414_vm5, %v3452_v43, %v3441_v57 }
 0x4e8   : > { %v3511_v45 = vsel %vm971_vm2, %v3339_v5, 0.0  ;;  %v6260_v5 = vunpack.c.h.bf16 %v5950_v31 }
 0x4e9   : > { %v3512_v41 = vadd.f32 %v3511_v45, %v3510_v62  ;;  %v2058_v49 = vsel %vm971_vm2, %v1926_v7, 0.0  ;;  %v6055_v47 = vpop.permute.xlu1 %1606  ;;  %v3503_v13 = vadd.f32 %v3502_v60, %v3501_v4  ;;  %v3463_v7 = vadd.f32 %v3462_v16, %v3461_v10 }
 0x4ea   : > { %v2059_v19 = vadd.f32 %v2058_v49, %v5915_v52  ;;  %v1727_v39 = vpop.permute.xlu0 %1726  ;;  %v6261_v4 = vunpack.c.l.bf16 %v5950_v31  ;;  %v3485_v49 = vadd.f32 %v3484_v38, %v3483_v20  ;;  %v4129_v20 = vld [vmem:[%s6207_s2 + $0x18] sm:$0xff]  }
 0x4eb   : > { %v3513_v55 = vrot.slane %v3512_v41, 4  ;;  %v3504_v28 = vrot.slane %v3503_v13, 2  ;;  %v1931_v15 = vmul.f32 %v6260_v5, %v1727_v39  ;;  %v3555_v31 = vsel %vm1416_vm6, %v3463_v7, %v3554_v56  ;;  %4028 = vmatprep.subr.bf16.mxu0 %v4129_v20 }
 0x4ec   : > { %v2060_v14 = vrot.slane %v2059_v19, 4  ;;  %v3556_v23 = vsel %vm1418_vm8, %v3474_v33, %v3555_v31  ;;  %4029 = vmatpush3.bf16.msra.mxu0 %v4129_v20 }
 0x4ed   : > { %v3514_v62 = vadd.f32 %v3513_v55, %v3512_v41  ;;  %v1723_v27 = vpop.permute.xlu1 %1722  ;;  %v3505_v45 = vadd.f32 %v3504_v28, %v3503_v13  ;;  %v2078_v26 = vsel %vm964_vm1, %v1931_v15, 0.0  ;;  %v3496_v41 = vadd.f32 %v3495_v9, %v3494_v63 }
 0x4ee   : > { %v2061_v53 = vadd.f32 %v2060_v14, %v2059_v19  ;;  %v1930_v52 = vmul.f32 %v6261_v4, %v1723_v27  ;;  %v6062_v60 = vpop.permute.xlu0 %1617  ;;  %v6262_v55 = vunpack.c.l.bf16 %v5731_v25  ;;  %v6263_v63 = vunpack.c.l.bf16 %v5952_v35 }
 0x4ef   : > { %v3515_v3 = vrot.slane %v3514_v62, 2  ;;  %v3506_v61 = vrot.slane %v3505_v45, 1  ;;  %v3557_v28 = vsel %vm1420_vm9, %v3485_v49, %v3556_v23 }
 0x4f0   : > { %v2062_v18 = vrot.slane %v2061_v53, 2  ;;  %v2077_v30 = vsel %vm964_vm1, %v1930_v52, 0.0  ;;  %v3558_v25 = vsel %vm1422_vm10, %v3496_v41, %v3557_v28  ;;  %v6264_v52 = vunpack.c.h.bf16 %v5954_v58 }
 0x4f1   : > { %v3516_v10 = vadd.f32 %v3515_v3, %v3514_v62  ;;  %v2079_v16 = vadd.f32 %v2078_v26, %v2077_v30  ;;  %v1596_v13 = vpop.permute.xlu1 %1595  ;;  %v3507_v19 = vadd.f32 %v3506_v61, %v3505_v45  ;;  %v6267_v28 = vunpack.c.h.bf16 %v5722_v1 }
 0x4f2   : > { %v2063_v39 = vadd.f32 %v2062_v18, %v2061_v53  ;;  %v1905_v57 = vmul.f32 %v6262_v55, %v1596_v13  ;;  %v1716_v34 = vpop.permute.xlu0 %1715 }
 0x4f3   : > { %v3517_v38 = vrot.slane %v3516_v10, 1  ;;  %v1929_v3 = vmul.f32 %v6263_v63, %v1716_v34  ;;  %v3559_v62 = vsel %vm1424_vm11, %v3507_v19, %v3558_v25 }
 0x4f4   : > { %v2064_v14 = vrot.slane %v2063_v39, 1  ;;  %v1981_v61 = vsel %vm971_vm2, %v1905_v57, 0.0 }
 0x4f5   : > { %v3518_v18 = vadd.f32 %v3517_v38, %v3516_v10  ;;  %v1982_v53 = vadd.f32 %v1981_v61, %v5687_v21  ;;  %v2069_v5 = vsel %vm971_vm2, %v1929_v3, 0.0  ;;  %v1622_v15 = vpop.permute.xlu1 %1621 }
 0x4f6   : > { %v2065_v43 = vadd.f32 %v2064_v14, %v2063_v39  ;;  %v2070_v9 = vadd.f32 %v2069_v5, %v5939_v12  ;;  %v1742_v35 = vpop.permute.xlu0 %1741  ;;  %v6265_v12 = vunpack.c.l.bf16 %v5954_v58  ;;  %v6266_v58 = vunpack.c.l.bf16 %v5963_v40 }
 0x4f7   : > { %v1983_v27 = vrot.slane %v1982_v53, 4  ;;  %v3560_v7 = vsel %vm1426_vm12, %v3518_v18, %v3559_v62  ;;  %v1934_v21 = vmul.f32 %v6264_v52, %v1742_v35  ;;  %v1907_v14 = vmul.f32 %v6267_v28, %v6055_v47 }
 0x4f8   : > { %v2157_v45 = vsel %vm1416_vm6, %v2065_v43, %v5942_v46  ;;  %v2071_v4 = vrot.slane %v2070_v9, 4  ;;  %v3611_v56 = vadd.f32 %v5931_v0, %v3560_v7  ;;  %v6269_v43 = vunpack.c.h.bf16 %v5743_v54 }
 0x4f9   : > { %v1984_v33 = vadd.f32 %v1983_v27, %v1982_v53  ;;  %v1738_v49 = vpop.permute.xlu1 %1737  ;;  %v2089_v46 = vsel %vm964_vm1, %v1934_v21, 0.0  ;;  %v6268_v53 = vunpack.c.l.bf16 %v5722_v1  ;;  %v6270_v62 = vunpack.c.l.bf16 %v5759_v59 }
 0x4fa   : > { %v2072_v26 = vadd.f32 %v2071_v4, %v2070_v9  ;;  %v1933_v30 = vmul.f32 %v6265_v12, %v1738_v49  ;;  %v6091_v41 = vpop.permute.xlu0 %1632  ;;  %v4085_v10 = vpack.i.bf16 %v3611_v56, %v5928_v36  ;;  %v1910_v9 = vmul.f32 %v6269_v43, %v1622_v15 }
 0x4fb   : > { %v1985_v13 = vrot.slane %v1984_v33, 2  ;;  %v1906_v5 = vmul.f32 %v6268_v53, %v6040_v17  ;;  %v1990_v1 = vsel %vm964_vm1, %v1907_v14, 0.0  ;;  %v6272_v17 = vunpack.c.l.bf16 %v5743_v54 }
 0x4fc   : > { %v2073_v31 = vrot.slane %v2072_v26, 2  ;;  %v2088_v19 = vsel %vm964_vm1, %v1933_v30, 0.0  ;;  %4086 = vrot.lane.b32.xlu0 %v4085_v10, %s4263_s10  ;;  %v6273_v21 = vunpack.c.l.bf16 %v6011_v8  ;;  %v2001_v59 = vsel %vm964_vm1, %v1910_v9, 0.0 }
 0x4fd   : > { %v1986_v39 = vadd.f32 %v1985_v13, %v1984_v33  ;;  %v2090_v0 = vadd.f32 %v2089_v46, %v2088_v19  ;;  %v1611_v55 = vpop.permute.xlu1 %1610  ;;  %v6278_v9 = vunpack.c.l.bf16 %v5764_v50 }
 0x4fe   : > { %v2074_v57 = vadd.f32 %v2073_v31, %v2072_v26  ;;  %v1731_v34 = vpop.permute.xlu0 %1730  ;;  %v1908_v27 = vmul.f32 %v6270_v62, %v1611_v55  ;;  %v6275_v55 = vunpack.c.l.bf16 %v5992_v29  ;;  %v6277_v29 = vunpack.c.h.bf16 %v6017_v11 }
 0x4ff   : > { %v1987_v20 = vrot.slane %v1986_v39, 1  ;;  %v1932_v23 = vmul.f32 %v6266_v58, %v1731_v34  ;;  %v1912_v62 = vmul.f32 %v6278_v9, %v6091_v41  ;;  %v6282_v41 = vunpack.c.l.bf16 %v5801_v42 }
 0x500   : > { %v2075_v38 = vrot.slane %v2074_v57, 1  ;;  %v1992_v33 = vsel %vm971_vm2, %v1908_v27, 0.0 }
 0x501   : > { %v1988_v63 = vadd.f32 %v1987_v20, %v1986_v39  ;;  %v2080_v36 = vsel %vm971_vm2, %v1932_v23, 0.0  ;;  %v1637_v3 = vpop.permute.xlu1 %1636 }
 0x502   : > { %v2076_v61 = vadd.f32 %v2075_v38, %v2074_v57  ;;  %v2081_v25 = vadd.f32 %v2080_v36, %v2079_v16  ;;  %v1757_v18 = vpop.permute.xlu0 %1756  ;;  %v6271_v16 = vunpack.c.h.bf16 %v6011_v8  ;;  %v6274_v8 = vunpack.c.l.bf16 %v5789_v22 }
 0x503   : > { %v6108_v40 = vsel %vm1418_vm8, %v1988_v63, %v5716_v2  ;;  %v1909_v2 = vmul.f32 %v6272_v17, %v6062_v60  ;;  %v6276_v22 = vunpack.c.h.bf16 %v5764_v50  ;;  %v6281_v17 = vunpack.c.h.bf16 %v5801_v42 }
 0x504   : > { %v2158_v35 = vsel %vm1418_vm8, %v2076_v61, %v2157_v45  ;;  %v2082_v47 = vrot.slane %v2081_v25, 4  ;;  %v1937_v7 = vmul.f32 %v6271_v16, %v1757_v18  ;;  %v1989_v45 = vsel %vm964_vm1, %v1906_v5, 0.0 }
 0x505   : > { %v1753_v4 = vpop.permute.xlu1 %1752  ;;  %v1991_v30 = vadd.f32 %v1990_v1, %v1989_v45  ;;  %v2000_v60 = vsel %vm964_vm1, %v1909_v2, 0.0  ;;  %v1913_v61 = vmul.f32 %v6276_v22, %v1637_v3 }
 0x506   : > { %v2083_v52 = vadd.f32 %v2082_v47, %v2081_v25  ;;  %v1936_v15 = vmul.f32 %v6273_v21, %v1753_v4  ;;  %v1648_v56 = vpop.permute.xlu0 %1647  ;;  %v2100_v26 = vsel %vm964_vm1, %v1937_v7, 0.0  ;;  %v2002_v19 = vadd.f32 %v2001_v59, %v2000_v60 }
 0x507   : > { %v1993_v39 = vadd.f32 %v1992_v33, %v1991_v30  ;;  %v2012_v3 = vsel %vm964_vm1, %v1913_v61, 0.0  ;;  %v1915_v21 = vmul.f32 %v6282_v41, %v1648_v56  ;;  %v2011_v33 = vsel %vm964_vm1, %v1912_v62, 0.0 }
 0x508   : > { %v2084_v49 = vrot.slane %v2083_v52, 2  ;;  %v2099_v12 = vsel %vm964_vm1, %v1936_v15, 0.0  ;;  %v2013_v60 = vadd.f32 %v2012_v3, %v2011_v33 }
 0x509   : > { %v2101_v10 = vadd.f32 %v2100_v26, %v2099_v12  ;;  %v1626_v54 = vpop.permute.xlu1 %1625  ;;  %v1994_v14 = vrot.slane %v1993_v39, 4  ;;  %v6283_v26 = vunpack.c.l.bf16 %v5832_v24 }
 0x50a   : > { %v2085_v13 = vadd.f32 %v2084_v49, %v2083_v52  ;;  %v1911_v31 = vmul.f32 %v6274_v8, %v1626_v54  ;;  %v1746_v46 = vpop.permute.xlu0 %1745 }
 0x50b   : > { %v1935_v57 = vmul.f32 %v6275_v55, %v1746_v46  ;;  %v1995_v7 = vadd.f32 %v1994_v14, %v1993_v39 }
 0x50c   : > { %v2086_v34 = vrot.slane %v2085_v13, 1  ;;  %v2003_v20 = vsel %vm971_vm2, %v1911_v31, 0.0 }
 0x50d   : > { %v2004_v58 = vadd.f32 %v2003_v20, %v2002_v19  ;;  %v2091_v23 = vsel %vm971_vm2, %v1935_v57, 0.0  ;;  %v1652_v38 = vpop.permute.xlu1 %1651  ;;  %v1996_v54 = vrot.slane %v1995_v7, 2  ;;  %v2022_v19 = vsel %vm964_vm1, %v1915_v21, 0.0 }
 0x50e   : > { %v2087_v63 = vadd.f32 %v2086_v34, %v2085_v13  ;;  %v2092_v36 = vadd.f32 %v2091_v23, %v2090_v0  ;;  %v1772_v28 = vpop.permute.xlu0 %1771  ;;  %v6279_v0 = vunpack.c.l.bf16 %v6017_v11  ;;  %v1916_v2 = vmul.f32 %v6281_v17, %v1652_v38 }
 0x50f   : > { %v1940_v53 = vmul.f32 %v6277_v29, %v1772_v28  ;;  %v2005_v5 = vrot.slane %v2004_v58, 4  ;;  %v6284_v13 = vunpack.c.l.bf16 %v6033_v37  ;;  %v1997_v23 = vadd.f32 %v1996_v54, %v1995_v7 }
 0x510   : > { %v2159_v25 = vsel %vm1420_vm9, %v2087_v63, %v2158_v35  ;;  %v2093_v18 = vrot.slane %v2092_v36, 4  ;;  %v6280_v35 = vunpack.c.l.bf16 %v6025_v6  ;;  %v2023_v56 = vsel %vm964_vm1, %v1916_v2, 0.0 }
 0x511   : > { %v1768_v43 = vpop.permute.xlu1 %1767  ;;  %v2111_v52 = vsel %vm964_vm1, %v1940_v53, 0.0  ;;  %v2006_v11 = vadd.f32 %v2005_v5, %v2004_v58  ;;  %v6285_v58 = vunpack.c.l.bf16 %v5850_v32  ;;  %v2024_v38 = vadd.f32 %v2023_v56, %v2022_v19 }
 0x512   : > { %v2094_v27 = vadd.f32 %v2093_v18, %v2092_v36  ;;  %v1939_v47 = vmul.f32 %v6279_v0, %v1768_v43  ;;  %v1761_v16 = vpop.permute.xlu0 %1760  ;;  %v1998_v62 = vrot.slane %v1997_v23, 1 }
 0x513   : > { %v1938_v4 = vmul.f32 %v6280_v35, %v1761_v16  ;;  %v2007_v39 = vrot.slane %v2006_v11, 2 }
 0x514   : > { %v2095_v1 = vrot.slane %v2094_v27, 2  ;;  %v2110_v50 = vsel %vm964_vm1, %v1939_v47, 0.0 }
 0x515   : > { %v2112_v15 = vadd.f32 %v2111_v52, %v2110_v50  ;;  %v2102_v45 = vsel %vm971_vm2, %v1938_v4, 0.0  ;;  %v1641_v59 = vpop.permute.xlu1 %1640  ;;  %v2008_v61 = vadd.f32 %v2007_v39, %v2006_v11  ;;  %v1999_v4 = vadd.f32 %v1998_v62, %v1997_v23 }
 0x516   : > { %v2096_v6 = vadd.f32 %v2095_v1, %v2094_v27  ;;  %v2103_v49 = vadd.f32 %v2102_v45, %v2101_v10  ;;  %v1914_v12 = vmul.f32 %v6283_v26, %v1641_v59  ;;  %v1776_v30 = vpop.permute.xlu0 %1775 }
 0x517   : > { %v1941_v8 = vmul.f32 %v6284_v13, %v1776_v30  ;;  %v2009_v0 = vrot.slane %v2008_v61, 1  ;;  %v2152_v11 = vsel %vm1420_vm9, %v1999_v4, %v6108_v40  ;;  %v6287_v40 = vunpack.c.h.bf16 %v5749_v44 }
 0x518   : > { %v2097_v42 = vrot.slane %v2096_v6, 1  ;;  %v2104_v31 = vrot.slane %v2103_v49, 4  ;;  %v2014_v46 = vsel %vm971_vm2, %v1914_v12, 0.0 }
 0x519   : > { %v2015_v55 = vadd.f32 %v2014_v46, %v2013_v60  ;;  %v2113_v10 = vsel %vm971_vm2, %v1941_v8, 0.0  ;;  %v1656_v24 = vpop.permute.xlu1 %1655  ;;  %v2010_v2 = vadd.f32 %v2009_v0, %v2008_v61  ;;  %v6286_v60 = vunpack.c.l.bf16 %v5749_v44  ;;  %v6290_v44 = vld [vmem:[#allocation10_spill] sm:$0xff] }
 0x51a   : > { %v2098_v57 = vadd.f32 %v2097_v42, %v2096_v6  ;;  %v2105_v34 = vadd.f32 %v2104_v31, %v2103_v49  ;;  %v2114_v20 = vadd.f32 %v2113_v10, %v2112_v15  ;;  %v1917_v37 = vmul.f32 %v6285_v58, %v1656_v24  ;;  %v1787_v30 = vpop.permute.xlu0 %1786  ;;  %v6288_v42 = vld [vmem:[#allocation9_spill] sm:$0xff] }
 0x51b   : > { %v2016_v63 = vrot.slane %v2015_v55, 4  ;;  %v2153_v45 = vsel %vm1422_vm10, %v2010_v2, %v2152_v11  ;;  %v1943_v8 = vmul.f32 %v6287_v40, %v1787_v30  ;;  %v6289_v56 = vunpack.c.l.bf16 %v6288_v42 }
 0x51c   : > { %v2160_v36 = vsel %vm1422_vm10, %v2098_v57, %v2159_v25  ;;  %v2106_v28 = vrot.slane %v2105_v34, 2  ;;  %v2115_v14 = vrot.slane %v2114_v20, 4  ;;  %v2025_v22 = vsel %vm971_vm2, %v1917_v37, 0.0 }
 0x51d   : > { %v2017_v18 = vadd.f32 %v2016_v63, %v2015_v55  ;;  %v2026_v29 = vadd.f32 %v2025_v22, %v2024_v38  ;;  %v1783_v12 = vpop.permute.xlu1 %1782  ;;  %v2122_v46 = vsel %vm964_vm1, %v1943_v8, 0.0 }
 0x51e   : > { %v2107_v53 = vadd.f32 %v2106_v28, %v2105_v34  ;;  %v2116_v5 = vadd.f32 %v2115_v14, %v2114_v20  ;;  %v1942_v13 = vmul.f32 %v6286_v60, %v1783_v12 }
 0x51f   : > { %v2018_v43 = vrot.slane %v2017_v18, 2  ;;  %v2027_v9 = vrot.slane %v2026_v29, 4 }
 0x520   : > { %v2108_v27 = vrot.slane %v2107_v53, 1  ;;  %v2117_v32 = vrot.slane %v2116_v5, 2 }
 0x521   : > { %v2019_v47 = vadd.f32 %v2018_v43, %v2017_v18  ;;  %v2028_v16 = vadd.f32 %v2027_v9, %v2026_v29  ;;  %v1791_v54 = vpop.permute.xlu1 %1790  ;;  %v3871_v18 = vld [vmem:[%s6208_s3] ss:$0 sm:$0xff] }
 0x522   : > { %v2109_v7 = vadd.f32 %v2108_v27, %v2107_v53  ;;  %v2118_v3 = vadd.f32 %v2117_v32, %v2116_v5  ;;  %v1944_v31 = vmul.f32 %v6289_v56, %v1791_v54 }
 0x523   : > { %v2020_v25 = vrot.slane %v2019_v47, 1  ;;  %v2029_v35 = vrot.slane %v2028_v16, 2 }
 0x524   : > { %v2119_v1 = vrot.slane %v2118_v3, 1  ;;  %v2161_v17 = vsel %vm1424_vm11, %v2109_v7, %v2160_v36  ;;  %v2124_v19 = vsel %vm971_vm2, %v1944_v31, 0.0 }
 0x525   : > { %v2030_v52 = vadd.f32 %v2029_v35, %v2028_v16  ;;  %v2021_v50 = vadd.f32 %v2020_v25, %v2019_v47 }
 0x526   : > { %v2120_v41 = vadd.f32 %v2119_v1, %v2118_v3 }
 0x527   : > { %v2031_v21 = vrot.slane %v2030_v52, 1  ;;  %v2154_v6 = vsel %vm1424_vm11, %v2021_v50, %v2153_v45 }
 0x528   : > { %v2162_v15 = vsel %vm1426_vm12, %v2120_v41, %v2161_v17 }
 0x529   : > { %v2032_v59 = vadd.f32 %v2031_v21, %v2030_v52  ;;  %v2216_v33 = vadd.f32 %v5898_v48, %v2162_v15  ;;  %v2121_v48 = vsel %vm964_vm1, %v1942_v13, 0.0 }
 0x52a   : > { %v2123_v39 = vadd.f32 %v2122_v46, %v2121_v48 }
 0x52b   : > { %v2155_v49 = vsel %vm1426_vm12, %v2032_v59, %v2154_v6 }
 0x52c   : > { %v2213_v26 = vadd.f32 %v5887_v51, %v2155_v49  ;;  %v2125_v51 = vadd.f32 %v2124_v19, %v2123_v39  ;;  %v3629_v23 = vpop.permute.xlu1 %3628 }
 0x52e   : > { %v2126_v55 = vrot.slane %v2125_v51, 4 }
 0x530   : > { %v2127_v10 = vadd.f32 %v2126_v55, %v2125_v51 }
 0x532   : > { %v2128_v24 = vrot.slane %v2127_v10, 2 }
 0x534   : > { %v2129_v57 = vadd.f32 %v2128_v24, %v2127_v10 }
 0x536   : > { %v2130_v34 = vrot.slane %v2129_v57, 1 }
 0x538   : > { %v2131_v20 = vadd.f32 %v2130_v34, %v2129_v57 }
 0x53a   : > { %v2221_v58 = vadd.f32 %v6290_v44, %v2131_v20 }
 0x53c   : > { %v3635_v36 = vsel %vm964_vm1, %v2221_v58, %v3629_v23 }
 0x53d   : > { %v3637_v61 = vpack.c.bf16 %v3635_v36, %v3635_v36 }
 0x56e   : > { %v4087_v37 = vpop.permute.xlu0 %4086 }
 0x56f   : > { %v4089_v38 = vunpack.i.h.bf16 %v4087_v37  ;;  %v4088_v63 = vunpack.i.l.bf16 %v4087_v37 }
 0x571   : > { %v3634_v28 = vsel %vm964_vm1, %v2216_v33, %v4089_v38  ;;  %v3633_v14 = vsel %vm964_vm1, %v2213_v26, %v4088_v63 }
 0x572   : > { %v3636_v22 = vpack.c.bf16 %v3634_v28, %v3633_v14 }
 0x574   : > { %4030 = vmatprep.mubr.msk.bf16.mxu0 %vm447_vm0, %v3636_v22 }
 0x575   : > { %4031 = vmatmul.mubr.msk.bf16.vlgmr.msra.gmra.mrb[20].mxu0 %vm447_vm0, %v3637_v61 }
 0x648   : > { %v4032_v29 = vpop.f32.mrb[20].mxu0 }
 0x649   : > { %v3725_v53 = vadd.f32 %v4032_v29, %v3871_v18  ;;  %v3716_v5 = vpop.f32.mrb[21].mxu0 }
 0x64a   : > { %v3717_v43 = vadd.f32 %v3871_v18, %v3716_v5  ;;  %v4033_v9 = vpop.f32.mrb[22].mxu0 }
 0x64b   : > { %3733 = vst.msk [vmem:[%s295_s26 + $0x10] sm:$0x1] %vm3732_vm15, %v3725_v53  ;;  %v3719_v62 = vpop.f32.mrb[23].mxu0 }
 0x64c   : > { %3730 = vst.msk [vmem:[%s295_s26] sm:$0xff] %vm447_vm0, %v3717_v43  ;;  %v3720_v27 = vadd.f32 %v3871_v18, %v3719_v62 }
 0x64e   : > { %3731 = vst.msk [vmem:[%s295_s26 + $0x8] sm:$0xff] %vm447_vm0, %v3720_v27 }
 0x64f PF: > { %s18_s21 = sadd.s32 1, %s4252_s21  }
 0x650   : > { %p15_p13 = scmp.ge.s32.totalorder %s18_s21, 4  }
 0x652   :  { %17 = sbr.rel (!%p15_p13) target bundleno = 2 (0x2), region = 87 }
 0x659   :  { %3755 = vsyncpa [#allocation3], 1 }
 0x65a   :  { %3757 = vsyncpa [#allocation3 + $0x1], 1 }
 0x65b   :  { %3758 = vsyncpa [#allocation5], 1 }

</bundles_post_ra>
